<compile_context>
chip_gen: v7x
topology: tpu7x:2x2x1
jax: 0.10.0
libtpu: 0.0.40
codegen_flags: <defaults>
</compile_context>

<pallas_src>
import functools
import math

import numpy as np
import jax
import jax.numpy as jnp
from jax import lax
from jax.experimental import pallas as pl
from jax.experimental.pallas import tpu as pltpu

SABP_RATIO = 0.9
N_LOCAL_NODES = 112
LOCAL_FEAT_DIM = 112
HIDDEN1 = 64
HIDDEN2 = 20
POOL_K = int(math.ceil(SABP_RATIO * N_LOCAL_NODES))     # 101
GLOBAL_FEAT_DIM = POOL_K * HIDDEN2                      # 2020
LOCAL_OUT_W = 23                                        # [h2(20) | score(1) | joint(1) | margin(1)]

_F32 = jnp.float32
_BF16 = jnp.bfloat16


# ----------------------------------------------------------------------------- #
# Pallas kernels
# ----------------------------------------------------------------------------- #
def _full_spec(shape):
    nd = len(shape)
    return pl.BlockSpec(shape, lambda i, _nd=nd: (0,) * _nd)


def _local_fused_kernel(a_ref, x_ref, pneg_ref,
                        w1_ref, b1_ref, w2_ref, b2_ref,
                        wes_ref, bes_ref, fwa_ref, fwb_ref, fcb_ref,
                        o_ref):
    """Fused Local_GNN front-end for one graph (grid point): gc1, gc2, SABP heads."""
    a = a_ref[...].astype(_BF16)
    x = x_ref[...].astype(_BF16)

    # gc1: relu(A_hat @ (X @ W1) + b1)
    xw1 = jnp.dot(x, w1_ref[...], preferred_element_type=_F32)
    h1 = jnp.maximum(
        jnp.dot(a, xw1.astype(_BF16), preferred_element_type=_F32) + b1_ref[...], 0.0)

    # gc2: relu(A_hat @ (h1 @ W2) + b2)
    xw2 = jnp.dot(h1.astype(_BF16), w2_ref[...], preferred_element_type=_F32)
    h2 = jnp.maximum(
        jnp.dot(a, xw2.astype(_BF16), preferred_element_type=_F32) + b2_ref[...], 0.0)
    h2b = h2.astype(_BF16)

    # merged SABP heads: W_es = [gcn_w (20->20) | score_w (20->1)]  ->  (20, 21)
    es = jnp.dot(a, jnp.dot(h2b, wes_ref[...], preferred_element_type=_F32).astype(_BF16),
                 preferred_element_type=_F32) + bes_ref[...]
    embed = es[:, 0:20]
    score = es[:, 20:21]

    # SABP fc split across the concat boundary:
    #   joint  = [embed | h2        ] @ fc_w + b = embed@fw_a + h2@fw_b + b
    #   margin = [embed | h2[negperm]] @ fc_w + b = embed@fw_a + (Pneg@h2)@fw_b + b
    e_part = jnp.dot(embed.astype(_BF16), fwa_ref[...], preferred_element_type=_F32) + fcb_ref[...]
    u = jnp.dot(h2b, fwb_ref[...], preferred_element_type=_F32)
    sneg = jnp.dot(pneg_ref[...].astype(_BF16), h2b, preferred_element_type=_F32)
    u_neg = jnp.dot(sneg.astype(_BF16), fwb_ref[...], preferred_element_type=_F32)

    o_ref[:, 0:20] = h2
    o_ref[:, 20:21] = score
    o_ref[:, 21:22] = e_part + u
    o_ref[:, 22:23] = e_part + u_neg


def pallas_local_fused(a_hat, x, pneg, prep):
    g, n, _ = a_hat.shape
    per_graph = lambda i: (i, 0, 0)
    const2 = lambda i: (0, 0)
    in_specs = [
        pl.BlockSpec((None, n, n), per_graph),
        pl.BlockSpec((None, n, x.shape[2]), per_graph),
        pl.BlockSpec((None, n, n), per_graph),
        pl.BlockSpec(prep["gc1_w"].shape, const2),
        pl.BlockSpec(prep["gc1_b"].shape, const2),
        pl.BlockSpec(prep["gc2_w"].shape, const2),
        pl.BlockSpec(prep["gc2_b"].shape, const2),
        pl.BlockSpec(prep["sabp_es_w"].shape, const2),
        pl.BlockSpec(prep["sabp_es_b"].shape, const2),
        pl.BlockSpec(prep["sabp_fc_wa"].shape, const2),
        pl.BlockSpec(prep["sabp_fc_wb"].shape, const2),
        pl.BlockSpec(prep["sabp_fc_b"].shape, const2),
    ]
    return pl.pallas_call(
        _local_fused_kernel,
        grid=(g,),
        in_specs=in_specs,
        out_specs=pl.BlockSpec((None, n, LOCAL_OUT_W), per_graph),
        out_shape=jax.ShapeDtypeStruct((g, n, LOCAL_OUT_W), jnp.float32),
        compiler_params=pltpu.CompilerParams(dimension_semantics=("parallel",)),
    )(a_hat, x, pneg,
      prep["gc1_w"], prep["gc1_b"], prep["gc2_w"], prep["gc2_b"],
      prep["sabp_es_w"], prep["sabp_es_b"],
      prep["sabp_fc_wa"], prep["sabp_fc_wb"], prep["sabp_fc_b"])


def _pool_gcn_kernel(a_ref, xp_ref, w3_ref, b3_ref, o_ref):
    """gc3 on the pooled graph + residual: out = x_pool + relu(A_hat_p @ (x_pool @ W3) + b3)."""
    xp = xp_ref[...]
    xw = jnp.dot(xp.astype(_BF16), w3_ref[...], preferred_element_type=_F32)
    h3 = jnp.maximum(
        jnp.dot(a_ref[...].astype(_BF16), xw.astype(_BF16), preferred_element_type=_F32)
        + b3_ref[...], 0.0)
    o_ref[...] = xp + h3


def pallas_pool_gcn(a_hat_pool, x_pool, prep):
    g, k, c = x_pool.shape
    per_graph = lambda i: (i, 0, 0)
    const2 = lambda i: (0, 0)
    return pl.pallas_call(
        _pool_gcn_kernel,
        grid=(g,),
        in_specs=[pl.BlockSpec((None, k, k), per_graph),
                  pl.BlockSpec((None, k, c), per_graph),
                  pl.BlockSpec(prep["gc3_w"].shape, const2),
                  pl.BlockSpec(prep["gc3_b"].shape, const2)],
        out_specs=pl.BlockSpec((None, k, c), per_graph),
        out_shape=jax.ShapeDtypeStruct((g, k, c), jnp.float32),
        compiler_params=pltpu.CompilerParams(dimension_semantics=("parallel",)),
    )(a_hat_pool, x_pool, prep["gc3_w"], prep["gc3_b"])


def _edge_mlp_kernel(x_ref, w1_ref, b1_ref, w2_ref, b2_ref, o_ref):
    # TODO(synk): EDGE(2, dropout=0.2) is not defined in the reference; modelled as a
    # 2-layer MLP (Linear->ReLU->[dropout=id in eval]->Linear), fused into one kernel.
    h = jnp.maximum(
        jnp.dot(x_ref[...], w1_ref[...], preferred_element_type=_F32) + b1_ref[...], 0.0)
    o_ref[...] = jnp.dot(h, w2_ref[...], preferred_element_type=_F32) + b2_ref[...]


def pallas_edge_mlp(edge_input, prep):
    e = edge_input.shape[0]
    return pl.pallas_call(
        _edge_mlp_kernel,
        grid=(1,),
        in_specs=[_full_spec(edge_input.shape),
                  _full_spec(prep["edge_w1"].shape), _full_spec(prep["edge_b1"].shape),
                  _full_spec(prep["edge_w2"].shape), _full_spec(prep["edge_b2"].shape)],
        out_specs=_full_spec((e, 1)),
        out_shape=jax.ShapeDtypeStruct((e, 1), jnp.float32),
    )(edge_input, prep["edge_w1"], prep["edge_b1"], prep["edge_w2"], prep["edge_b2"])


def _global_fused_kernel(l_ref, x_ref,
                         w0_ref, sc0_ref, sh0_ref,
                         w1_ref, sc1_ref, sh1_ref,
                         w2_ref, sc2_ref, sh2_ref,
                         w3_ref, sc3_ref, sh3_ref,
                         sw_ref, wo_ref, bo_ref, o_ref):
    """Whole Global_GNN: 4x (ChebConv K=3 + folded BN + ReLU + 0.7*residual) + mix + out_fc."""
    lhat = l_ref[...].astype(_BF16)

    def cheb_layer(x, w_ref, sc_ref, sh_ref, res):
        # T0 = x, T1 = Lhat @ x, T2 = 2*Lhat@T1 - x ; one dot with K-stacked weights.
        t1 = jnp.dot(lhat, x.astype(_BF16), preferred_element_type=_F32)
        t2 = 2.0 * jnp.dot(lhat, t1.astype(_BF16), preferred_element_type=_F32) - x
        stacked = jnp.concatenate([x, t1, t2], axis=-1).astype(_BF16)
        y = jnp.dot(stacked, w_ref[...], preferred_element_type=_F32)
        y = y * sc_ref[...] + sh_ref[...]        # ChebConv bias + BatchNorm1d (eval) folded
        y = jnp.maximum(y, 0.0)
        if res is not None:
            y = y + 0.7 * res
        return y

    x0 = x_ref[...]
    l0 = cheb_layer(x0, w0_ref, sc0_ref, sh0_ref, None)
    l1 = cheb_layer(l0, w1_ref, sc1_ref, sh1_ref, l0)
    l2 = cheb_layer(l1, w2_ref, sc2_ref, sh2_ref, l1)
    l3 = cheb_layer(l2, w3_ref, sc3_ref, sh3_ref, l2)

    sw = sw_ref[...]
    emb = (l0 * sw[:, 0:1] + l1 * sw[:, 1:2] + l2 * sw[:, 2:3] + l3 * sw[:, 3:4])
    o_ref[...] = jnp.dot(emb.astype(_BF16), wo_ref[...], preferred_element_type=_F32) + bo_ref[...]


def pallas_global_fused(lhat, feats, sw, prep):
    g = feats.shape[0]
    args = [lhat, feats]
    specs = [_full_spec(lhat.shape), _full_spec(feats.shape)]
    for i in range(4):
        for name in (f"cheb_w{i}", f"cheb_scale{i}", f"cheb_shift{i}"):
            args.append(prep[name])
            specs.append(_full_spec(prep[name].shape))
    for arr in (sw, prep["out_w"], prep["out_b"]):
        args.append(arr)
        specs.append(_full_spec(arr.shape))
    return pl.pallas_call(
        _global_fused_kernel,
        grid=(1,),
        in_specs=specs,
        out_specs=_full_spec((g, 2)),
        out_shape=jax.ShapeDtypeStruct((g, 2), jnp.float32),
    )(*args)


# ----------------------------------------------------------------------------- #
# JAX glue: graph normalization, pooling, model plumbing
# ----------------------------------------------------------------------------- #
def dense_adj(edge_index, edge_attr, n):
    src, dst = edge_index[0], edge_index[1]
    return jnp.zeros((n, n), jnp.float32).at[dst, src].add(edge_attr)


def gcn_norm(a_w):
    # D^{-1/2} (A + I) D^{-1/2}  (GCNConv 'sym' normalization with self loops)
    n = a_w.shape[0]
    a_t = a_w + jnp.eye(n, dtype=jnp.float32)
    deg = a_t.sum(axis=1)
    dinv = jnp.where(deg > 0.0, lax.rsqrt(deg), 0.0)
    return a_t * dinv[:, None] * dinv[None, :]


def cheb_lhat_from_edges(src, dst, n):
    # scaled Laplacian 2L/lambda_max - I with 'sym' norm, lambda_max=2  ->  -(D^-1/2 A D^-1/2)
    a = jnp.zeros((n, n), jnp.float32).at[dst, src].add(1.0)
    deg = a.sum(axis=1)
    dinv = jnp.where(deg > 0.0, lax.rsqrt(deg), 0.0)
    return -(a * dinv[:, None] * dinv[None, :])


def lg_gnn_forward(prep, xs, edge_indices, edge_attrs, negperms,
                   nonimg, phonetic_score, pop_src, pop_dst):
    g, n, _ = xs.shape

    # ---- Local_GNN: all graphs batched through two fused Pallas kernels ----
    a_w = jax.vmap(lambda ei, ea: dense_adj(ei, ea, n))(edge_indices, edge_attrs)
    a_hat = jax.vmap(gcn_norm)(a_w)
    pneg = jnp.eye(n, dtype=jnp.float32)[negperms]          # row-permutation matrices (g,n,n)

    local_out = pallas_local_fused(a_hat, xs, pneg, prep)   # (g, n, 23)
    h2 = local_out[:, :, 0:20]
    score = local_out[:, :, 20]
    joint = local_out[:, :, 21]
    margin = local_out[:, :, 22]

    # MI estimate (matches F.normalize(dim=1) on (n,1) tensors, eps clamp 1e-12)
    joint_n = joint / jnp.maximum(jnp.abs(joint), 1e-12)
    margin_n = margin / jnp.maximum(jnp.abs(margin), 1e-12)
    mi = jnp.mean(joint_n, axis=1) - jnp.log(jnp.mean(jnp.exp(margin_n), axis=1))
    mi_loss = jnp.mean(mi)

    # SABP top-k pooling; sort/top_k has no Pallas path -> XLA glue
    score_p, perm = lax.top_k(score, POOL_K)                # (g, k)
    x_pool = (jnp.take_along_axis(h2, perm[:, :, None], axis=1)
              * jnp.tanh(score_p)[:, :, None])              # (g, k, 20)
    a_w_pool = jax.vmap(lambda A, p: A[p][:, p])(a_w, perm)
    a_hat_pool = jax.vmap(gcn_norm)(a_w_pool)

    pooled = pallas_pool_gcn(a_hat_pool, x_pool, prep)      # (g, k, 20)
    embeddings = pooled.reshape(g, -1)                      # (g, 2020)

    # ---- population-graph EDGE weights (computed, then unused — as in the reference) ----
    # TODO(synk): dataloader().get_inputs is external; synthesized as a fully connected
    # population graph with 2-d pairwise edge features (|nonimg diff|, phonetic score).
    d = jnp.abs(nonimg[pop_src] - nonimg[pop_dst]).sum(axis=1)
    ps = phonetic_score[pop_src, pop_dst]
    edge_input = jnp.stack([d, ps], axis=1).astype(jnp.float32)
    edge_input = (edge_input - edge_input.mean(axis=0)) / edge_input.std(axis=0)
    edge_weight = pallas_edge_mlp(edge_input, prep)[:, 0]
    del edge_weight      # Global_GNN.forward never uses edge_weight (same as PyTorch code)

    # ---- Global_GNN: single fused kernel ----
    lhat = cheb_lhat_from_edges(pop_src, pop_dst, g)
    sw = jax.nn.softmax(prep["layer_weights"]).reshape(1, 4)
    predictions = pallas_global_fused(lhat, embeddings, sw, prep)
    return predictions, mi_loss, perm


# ----------------------------------------------------------------------------- #
# Parameter construction & one-time preparation (reshape / cast / fold)
# ----------------------------------------------------------------------------- #
def init_params(key):
    keys = iter(jax.random.split(key, 64))

    def w(shape, scale=0.1):
        return (scale * jax.random.normal(next(keys), shape)).astype(jnp.float32)

    p = {}
    # Local_GNN
    p["gc1_w"], p["gc1_b"] = w((LOCAL_FEAT_DIM, HIDDEN1)), w((HIDDEN1,))
    p["gc2_w"], p["gc2_b"] = w((HIDDEN1, HIDDEN2)), w((HIDDEN2,))
    p["gc3_w"], p["gc3_b"] = w((HIDDEN2, HIDDEN2)), w((HIDDEN2,))
    # SABP(20, ratio=0.9)
    p["sabp_score_w"], p["sabp_score_b"] = w((HIDDEN2, 1)), w((1,))
    p["sabp_gcn_w"], p["sabp_gcn_b"] = w((HIDDEN2, HIDDEN2)), w((HIDDEN2,))
    p["sabp_fc_w"], p["sabp_fc_b"] = w((2 * HIDDEN2, 1)), w((1,))
    # EDGE(2) MLP
    p["edge_w1"], p["edge_b1"] = w((2, 16)), w((16,))
    p["edge_w2"], p["edge_b2"] = w((16, 1)), w((1,))
    # Global_GNN: 4 ChebConv(K=3) layers + BatchNorm1d(20) running stats (PyTorch defaults)
    cheb_dims = [(GLOBAL_FEAT_DIM, 20), (20, 20), (20, 20), (20, 20)]
    p["cheb_w"] = [tuple(w(d) for _ in range(3)) for d in cheb_dims]
    p["cheb_b"] = [w((20,)) for _ in cheb_dims]
    p["bn_gamma"] = [jnp.ones((20,), jnp.float32)] * 4
    p["bn_beta"] = [jnp.zeros((20,), jnp.float32)] * 4
    p["bn_mean"] = [jnp.zeros((20,), jnp.float32)] * 4
    p["bn_var"] = [jnp.ones((20,), jnp.float32)] * 4
    p["out_w"], p["out_b"] = w((20, 2)), w((2,))
    p["layer_weights"] = jax.random.normal(next(keys), (4,)).astype(jnp.float32)
    return p


def prepare_params(p):
    """One-time reshape / bf16 cast / bias+BN fold so the kernels get ready-to-use tensors."""
    prep = {}
    prep["gc1_w"] = p["gc1_w"].astype(_BF16)
    prep["gc1_b"] = p["gc1_b"].reshape(1, -1).astype(_F32)
    prep["gc2_w"] = p["gc2_w"].astype(_BF16)
    prep["gc2_b"] = p["gc2_b"].reshape(1, -1).astype(_F32)
    prep["gc3_w"] = p["gc3_w"].astype(_BF16)
    prep["gc3_b"] = p["gc3_b"].reshape(1, -1).astype(_F32)
    # merge SABP gcn (20->20) and score (20->1) heads into one (20,21) GCN
    prep["sabp_es_w"] = jnp.concatenate([p["sabp_gcn_w"], p["sabp_score_w"]], axis=1).astype(_BF16)
    prep["sabp_es_b"] = jnp.concatenate([p["sabp_gcn_b"], p["sabp_score_b"]]).reshape(1, -1).astype(_F32)
    # split SABP fc across the concat boundary (avoids in-kernel concatenation + unaligned slices)
    prep["sabp_fc_wa"] = p["sabp_fc_w"][0:HIDDEN2, :].astype(_BF16)
    prep["sabp_fc_wb"] = p["sabp_fc_w"][HIDDEN2:2 * HIDDEN2, :].astype(_BF16)
    prep["sabp_fc_b"] = p["sabp_fc_b"].reshape(1, 1).astype(_F32)
    # EDGE MLP (tiny, kept f32)
    prep["edge_w1"] = p["edge_w1"].astype(_F32)
    prep["edge_b1"] = p["edge_b1"].reshape(1, -1).astype(_F32)
    prep["edge_w2"] = p["edge_w2"].astype(_F32)
    prep["edge_b2"] = p["edge_b2"].reshape(1, -1).astype(_F32)
    # Global ChebConv stack: stack the K=3 weights along the input axis -> one dot / layer,
    # and fold ChebConv bias + eval-mode BatchNorm into per-channel (scale, shift).
    eps = 1e-5
    for i in range(4):
        w3 = p["cheb_w"][i]
        prep[f"cheb_w{i}"] = jnp.concatenate([w3[0], w3[1], w3[2]], axis=0).astype(_BF16)
        scale = p["bn_gamma"][i] / jnp.sqrt(p["bn_var"][i] + eps)
        shift = p["bn_beta"][i] - p["bn_mean"][i] * scale
        prep[f"cheb_scale{i}"] = scale.reshape(1, -1).astype(_F32)
        prep[f"cheb_shift{i}"] = (p["cheb_b"][i] * scale + shift).reshape(1, -1).astype(_F32)
    prep["out_w"] = p["out_w"].astype(_BF16)
    prep["out_b"] = p["out_b"].reshape(1, -1).astype(_F32)
    prep["layer_weights"] = p["layer_weights"].astype(_F32)
    return prep


# ----------------------------------------------------------------------------- #
# Deterministic example inputs
# ----------------------------------------------------------------------------- #
def make_graph(key, n_nodes=N_LOCAL_NODES, feat_dim=LOCAL_FEAT_DIM, n_und=300):
    k1, k2, k3, k4 = jax.random.split(key, 4)
    x = jax.random.normal(k1, (n_nodes, feat_dim), jnp.float32)
    pairs = np.array([(i, j) for i in range(n_nodes) for j in range(i + 1, n_nodes)],
                     dtype=np.int32)
    sel = jax.random.choice(k2, pairs.shape[0], (n_und,), replace=False)
    ij = jnp.asarray(pairs)[sel]
    wgt = jax.random.uniform(k3, (n_und,), jnp.float32, 0.1, 1.0)
    src = jnp.concatenate([ij[:, 0], ij[:, 1]])
    dst = jnp.concatenate([ij[:, 1], ij[:, 0]])
    edge_index = jnp.stack([src, dst]).astype(jnp.int32)
    edge_attr = jnp.concatenate([wgt, wgt])
    negperm = jax.random.permutation(k4, n_nodes)           # stand-in for torch.randperm
    return x, edge_index, edge_attr, negperm


if __name__ == "__main__":
    key = jax.random.PRNGKey(0)
    kp, kg, kn, kps = jax.random.split(key, 4)

    params = init_params(kp)
    prep = prepare_params(params)

    n_graphs = 4
    gkeys = jax.random.split(kg, n_graphs)
    graphs = [make_graph(k) for k in gkeys]
    xs = jnp.stack([g_[0] for g_ in graphs])                 # (4, 112, 112)
    eis = jnp.stack([g_[1] for g_ in graphs])                # (4, 2, 600)
    eas = jnp.stack([g_[2] for g_ in graphs])                # (4, 600)
    negperms = jnp.stack([g_[3] for g_ in graphs])           # (4, 112)

    nonimg = jax.random.normal(kn, (n_graphs, 2), jnp.float32)
    phonetic_score = jax.random.uniform(kps, (n_graphs, n_graphs), jnp.float32)

    # fully connected population graph (no self loops)
    src_np, dst_np = np.nonzero(~np.eye(n_graphs, dtype=bool))
    pop_src = jnp.asarray(src_np, jnp.int32)
    pop_dst = jnp.asarray(dst_np, jnp.int32)

    fwd = jax.jit(lg_gnn_forward)
    predictions, mi_loss, perms = fwd(prep, xs, eis, eas, negperms,
                                      nonimg, phonetic_score, pop_src, pop_dst)
    predictions = jax.block_until_ready(predictions)
    mi_loss = jax.block_until_ready(mi_loss)
    perms = jax.block_until_ready(perms)

    assert predictions.shape == (n_graphs, 2)
    assert perms.shape == (n_graphs, POOL_K)
    assert bool(jnp.all(jnp.isfinite(predictions))) and bool(jnp.isfinite(mi_loss))
    print("KERNEL_OK")
</pallas_src>

<mosaic_0001>
module attributes {stable_mosaic.version = 11 : i64} {
  func.func private @main(%arg0: i32) attributes {dimension_semantics = [#tpu.dimension_semantics<core_parallel>], iteration_bounds = array<i64: 2>, tpu.core_type = #tpu.core_type<sc_scalar_subcore>, window_params = []} {
    return
  }
}

module attributes {stable_mosaic.version = 11 : i64} {
  func.func private @main(%arg0: i32) attributes {dimension_semantics = [#tpu.dimension_semantics<core_parallel>], iteration_bounds = array<i64: 2>, tpu.core_type = #tpu.core_type<sc_scalar_subcore>, window_params = []} {
    return
  }
}

module attributes {stable_mosaic.version = 11 : i64} {
  func.func @_local_fused_kernel(%arg0: i32, %arg1: memref<1x112x112xf32, #tpu.memory_space<vmem>>, %arg2: memref<1x112x112xf32, #tpu.memory_space<vmem>>, %arg3: memref<1x112x112xf32, #tpu.memory_space<vmem>>, %arg4: memref<112x64xbf16, #tpu.memory_space<vmem>>, %arg5: memref<1x64xf32, #tpu.memory_space<vmem>>, %arg6: memref<64x20xbf16, #tpu.memory_space<vmem>>, %arg7: memref<1x20xf32, #tpu.memory_space<vmem>>, %arg8: memref<20x21xbf16, #tpu.memory_space<vmem>>, %arg9: memref<1x21xf32, #tpu.memory_space<vmem>>, %arg10: memref<20x1xbf16, #tpu.memory_space<vmem>>, %arg11: memref<20x1xbf16, #tpu.memory_space<vmem>>, %arg12: memref<1x1xf32, #tpu.memory_space<vmem>>, %arg13: memref<1x112x23xf32, #tpu.memory_space<vmem>>) attributes {dimension_semantics = [#tpu.dimension_semantics<parallel>], iteration_bounds = array<i64: 4>, scalar_prefetch = 0 : i64, scratch_operands = 0 : i64, tpu.core_type = #tpu.core_type<tc>, window_params = [{transform_indices = @transform_0, window_bounds = array<i64: 1, 112, 112>}, {transform_indices = @transform_1, window_bounds = array<i64: 1, 112, 112>}, {transform_indices = @transform_2, window_bounds = array<i64: 1, 112, 112>}, {pipeline_mode = #tpu.pipeline_mode<synchronous>, transform_indices = @transform_3, window_bounds = array<i64: 112, 64>}, {pipeline_mode = #tpu.pipeline_mode<synchronous>, transform_indices = @transform_4, window_bounds = array<i64: 1, 64>}, {pipeline_mode = #tpu.pipeline_mode<synchronous>, transform_indices = @transform_5, window_bounds = array<i64: 64, 20>}, {pipeline_mode = #tpu.pipeline_mode<synchronous>, transform_indices = @transform_6, window_bounds = array<i64: 1, 20>}, {pipeline_mode = #tpu.pipeline_mode<synchronous>, transform_indices = @transform_7, window_bounds = array<i64: 20, 21>}, {pipeline_mode = #tpu.pipeline_mode<synchronous>, transform_indices = @transform_8, window_bounds = array<i64: 1, 21>}, {pipeline_mode = #tpu.pipeline_mode<synchronous>, transform_indices = @transform_9, window_bounds = array<i64: 20, 1>}, {pipeline_mode = #tpu.pipeline_mode<synchronous>, transform_indices = @transform_10, window_bounds = array<i64: 20, 1>}, {pipeline_mode = #tpu.pipeline_mode<synchronous>, transform_indices = @transform_11, window_bounds = array<i64: 1, 1>}, {transform_indices = @transform_12, window_bounds = array<i64: 1, 112, 23>}]} {
    %c0 = arith.constant 0 : index
    %c0_0 = arith.constant 0 : index
    %c0_1 = arith.constant 0 : index
    %0 = vector.load %arg1[%c0, %c0_0, %c0_1] : memref<1x112x112xf32, #tpu.memory_space<vmem>>, vector<1x112x112xf32>
    %1 = vector.shape_cast %0 : vector<1x112x112xf32> to vector<112x112xf32>
    %2 = arith.truncf %1 : vector<112x112xf32> to vector<112x112xbf16>
    %c0_2 = arith.constant 0 : index
    %c0_3 = arith.constant 0 : index
    %c0_4 = arith.constant 0 : index
    %3 = vector.load %arg2[%c0_2, %c0_3, %c0_4] : memref<1x112x112xf32, #tpu.memory_space<vmem>>, vector<1x112x112xf32>
    %4 = vector.shape_cast %3 : vector<1x112x112xf32> to vector<112x112xf32>
    %5 = arith.truncf %4 : vector<112x112xf32> to vector<112x112xbf16>
    %c0_5 = arith.constant 0 : index
    %c0_6 = arith.constant 0 : index
    %6 = vector.load %arg4[%c0_5, %c0_6] : memref<112x64xbf16, #tpu.memory_space<vmem>>, vector<112x64xbf16>
    %cst = arith.constant dense<0.000000e+00> : vector<112x64xf32>
    %7 = tpu.matmul %5, %6, %cst {dimension_numbers = #tpu.dot_dimension_numbers<[1], [0], [0], [1], [0, 0, 1, 1], [], []>} : vector<112x112xbf16>, vector<112x64xbf16>, vector<112x64xf32> -> vector<112x64xf32>
    %8 = arith.truncf %7 : vector<112x64xf32> to vector<112x64xbf16>
    %cst_7 = arith.constant dense<0.000000e+00> : vector<112x64xf32>
    %9 = tpu.matmul %2, %8, %cst_7 {dimension_numbers = #tpu.dot_dimension_numbers<[1], [0], [0], [1], [0, 0, 1, 1], [], []>} : vector<112x112xbf16>, vector<112x64xbf16>, vector<112x64xf32> -> vector<112x64xf32>
    %c0_8 = arith.constant 0 : index
    %c0_9 = arith.constant 0 : index
    %10 = vector.load %arg5[%c0_8, %c0_9] : memref<1x64xf32, #tpu.memory_space<vmem>>, vector<1x64xf32>
    %11 = vector.broadcast %10 : vector<1x64xf32> to vector<112x64xf32>
    %12 = arith.addf %9, %11 : vector<112x64xf32>
    %cst_10 = arith.constant 0.000000e+00 : f32
    %13 = vector.broadcast %cst_10 : f32 to vector<112x64xf32>
    %14 = arith.maximumf %12, %13 : vector<112x64xf32>
    %15 = arith.truncf %14 : vector<112x64xf32> to vector<112x64xbf16>
    %c0_11 = arith.constant 0 : index
    %c0_12 = arith.constant 0 : index
    %16 = vector.load %arg6[%c0_11, %c0_12] : memref<64x20xbf16, #tpu.memory_space<vmem>>, vector<64x20xbf16>
    %cst_13 = arith.constant dense<0.000000e+00> : vector<112x20xf32>
    %17 = tpu.matmul %15, %16, %cst_13 {dimension_numbers = #tpu.dot_dimension_numbers<[1], [0], [0], [1], [0, 0, 1, 1], [], []>} : vector<112x64xbf16>, vector<64x20xbf16>, vector<112x20xf32> -> vector<112x20xf32>
    %18 = arith.truncf %17 : vector<112x20xf32> to vector<112x20xbf16>
    %cst_14 = arith.constant dense<0.000000e+00> : vector<112x20xf32>
    %19 = tpu.matmul %2, %18, %cst_14 {dimension_numbers = #tpu.dot_dimension_numbers<[1], [0], [0], [1], [0, 0, 1, 1], [], []>} : vector<112x112xbf16>, vector<112x20xbf16>, vector<112x20xf32> -> vector<112x20xf32>
    %c0_15 = arith.constant 0 : index
    %c0_16 = arith.constant 0 : index
    %20 = vector.load %arg7[%c0_15, %c0_16] : memref<1x20xf32, #tpu.memory_space<vmem>>, vector<1x20xf32>
    %21 = vector.broadcast %20 : vector<1x20xf32> to vector<112x20xf32>
    %22 = arith.addf %19, %21 : vector<112x20xf32>
    %cst_17 = arith.constant 0.000000e+00 : f32
    %23 = vector.broadcast %cst_17 : f32 to vector<112x20xf32>
    %24 = arith.maximumf %22, %23 : vector<112x20xf32>
    %25 = arith.truncf %24 : vector<112x20xf32> to vector<112x20xbf16>
    %c0_18 = arith.constant 0 : index
    %c0_19 = arith.constant 0 : index
    %26 = vector.load %arg8[%c0_18, %c0_19] : memref<20x21xbf16, #tpu.memory_space<vmem>>, vector<20x21xbf16>
    %cst_20 = arith.constant dense<0.000000e+00> : vector<112x21xf32>
    %27 = tpu.matmul %25, %26, %cst_20 {dimension_numbers = #tpu.dot_dimension_numbers<[1], [0], [0], [1], [0, 0, 1, 1], [], []>} : vector<112x20xbf16>, vector<20x21xbf16>, vector<112x21xf32> -> vector<112x21xf32>
    %28 = arith.truncf %27 : vector<112x21xf32> to vector<112x21xbf16>
    %cst_21 = arith.constant dense<0.000000e+00> : vector<112x21xf32>
    %29 = tpu.matmul %2, %28, %cst_21 {dimension_numbers = #tpu.dot_dimension_numbers<[1], [0], [0], [1], [0, 0, 1, 1], [], []>} : vector<112x112xbf16>, vector<112x21xbf16>, vector<112x21xf32> -> vector<112x21xf32>
    %c0_22 = arith.constant 0 : index
    %c0_23 = arith.constant 0 : index
    %30 = vector.load %arg9[%c0_22, %c0_23] : memref<1x21xf32, #tpu.memory_space<vmem>>, vector<1x21xf32>
    %31 = vector.broadcast %30 : vector<1x21xf32> to vector<112x21xf32>
    %32 = arith.addf %29, %31 : vector<112x21xf32>
    %33 = vector.extract_strided_slice %32 {offsets = [0, 0], sizes = [112, 20], strides = [1, 1]} : vector<112x21xf32> to vector<112x20xf32>
    %34 = vector.extract_strided_slice %32 {offsets = [0, 20], sizes = [112, 1], strides = [1, 1]} : vector<112x21xf32> to vector<112x1xf32>
    %35 = arith.truncf %33 : vector<112x20xf32> to vector<112x20xbf16>
    %c0_24 = arith.constant 0 : index
    %c0_25 = arith.constant 0 : index
    %36 = vector.load %arg10[%c0_24, %c0_25] : memref<20x1xbf16, #tpu.memory_space<vmem>>, vector<20x1xbf16>
    %cst_26 = arith.constant dense<0.000000e+00> : vector<112x1xf32>
    %37 = tpu.matmul %35, %36, %cst_26 {dimension_numbers = #tpu.dot_dimension_numbers<[1], [0], [0], [1], [0, 0, 1, 1], [], []>} : vector<112x20xbf16>, vector<20x1xbf16>, vector<112x1xf32> -> vector<112x1xf32>
    %c0_27 = arith.constant 0 : index
    %c0_28 = arith.constant 0 : index
    %38 = vector.load %arg12[%c0_27, %c0_28] : memref<1x1xf32, #tpu.memory_space<vmem>>, vector<1x1xf32>
    %39 = vector.broadcast %38 : vector<1x1xf32> to vector<112x1xf32>
    %40 = arith.addf %37, %39 : vector<112x1xf32>
    %c0_29 = arith.constant 0 : index
    %c0_30 = arith.constant 0 : index
    %41 = vector.load %arg11[%c0_29, %c0_30] : memref<20x1xbf16, #tpu.memory_space<vmem>>, vector<20x1xbf16>
    %cst_31 = arith.constant dense<0.000000e+00> : vector<112x1xf32>
    %42 = tpu.matmul %25, %41, %cst_31 {dimension_numbers = #tpu.dot_dimension_numbers<[1], [0], [0], [1], [0, 0, 1, 1], [], []>} : vector<112x20xbf16>, vector<20x1xbf16>, vector<112x1xf32> -> vector<112x1xf32>
    %c0_32 = arith.constant 0 : index
    %c0_33 = arith.constant 0 : index
    %c0_34 = arith.constant 0 : index
    %43 = vector.load %arg3[%c0_32, %c0_33, %c0_34] : memref<1x112x112xf32, #tpu.memory_space<vmem>>, vector<1x112x112xf32>
    %44 = vector.shape_cast %43 : vector<1x112x112xf32> to vector<112x112xf32>
    %45 = arith.truncf %44 : vector<112x112xf32> to vector<112x112xbf16>
    %cst_35 = arith.constant dense<0.000000e+00> : vector<112x20xf32>
    %46 = tpu.matmul %45, %25, %cst_35 {dimension_numbers = #tpu.dot_dimension_numbers<[1], [0], [0], [1], [0, 0, 1, 1], [], []>} : vector<112x112xbf16>, vector<112x20xbf16>, vector<112x20xf32> -> vector<112x20xf32>
    %47 = arith.truncf %46 : vector<112x20xf32> to vector<112x20xbf16>
    %c0_36 = arith.constant 0 : index
    %c0_37 = arith.constant 0 : index
    %48 = vector.load %arg11[%c0_36, %c0_37] : memref<20x1xbf16, #tpu.memory_space<vmem>>, vector<20x1xbf16>
    %cst_38 = arith.constant dense<0.000000e+00> : vector<112x1xf32>
    %49 = tpu.matmul %47, %48, %cst_38 {dimension_numbers = #tpu.dot_dimension_numbers<[1], [0], [0], [1], [0, 0, 1, 1], [], []>} : vector<112x20xbf16>, vector<20x1xbf16>, vector<112x1xf32> -> vector<112x1xf32>
    %c0_39 = arith.constant 0 : index
    %c0_40 = arith.constant 0 : index
    %c0_41 = arith.constant 0 : index
    %50 = vector.load %arg13[%c0_39, %c0_40, %c0_41] : memref<1x112x23xf32, #tpu.memory_space<vmem>>, vector<1x112x20xf32>
    %51 = vector.shape_cast %50 : vector<1x112x20xf32> to vector<112x20xf32>
    %52 = vector.shape_cast %24 : vector<112x20xf32> to vector<1x112x20xf32>
    tpu.vector_store %arg13[%c0_39, %c0_40, %c0_41], %52 {strides = array<i32>} : memref<1x112x23xf32, #tpu.memory_space<vmem>>, vector<1x112x20xf32>,
    %c0_42 = arith.constant 0 : index
    %c0_43 = arith.constant 0 : index
    %c20 = arith.constant 20 : index
    %53 = vector.load %arg13[%c0_42, %c0_43, %c20] : memref<1x112x23xf32, #tpu.memory_space<vmem>>, vector<1x112x1xf32>
    %54 = vector.shape_cast %53 : vector<1x112x1xf32> to vector<112x1xf32>
    %55 = vector.shape_cast %34 : vector<112x1xf32> to vector<1x112x1xf32>
    tpu.vector_store %arg13[%c0_42, %c0_43, %c20], %55 {strides = array<i32>} : memref<1x112x23xf32, #tpu.memory_space<vmem>>, vector<1x112x1xf32>,
    %56 = arith.addf %40, %42 : vector<112x1xf32>
    %c0_44 = arith.constant 0 : index
    %c0_45 = arith.constant 0 : index
    %c21 = arith.constant 21 : index
    %57 = vector.load %arg13[%c0_44, %c0_45, %c21] : memref<1x112x23xf32, #tpu.memory_space<vmem>>, vector<1x112x1xf32>
    %58 = vector.shape_cast %57 : vector<1x112x1xf32> to vector<112x1xf32>
    %59 = vector.shape_cast %56 : vector<112x1xf32> to vector<1x112x1xf32>
    tpu.vector_store %arg13[%c0_44, %c0_45, %c21], %59 {strides = array<i32>} : memref<1x112x23xf32, #tpu.memory_space<vmem>>, vector<1x112x1xf32>,
    %60 = arith.addf %40, %49 : vector<112x1xf32>
    %c0_46 = arith.constant 0 : index
    %c0_47 = arith.constant 0 : index
    %c22 = arith.constant 22 : index
    %61 = vector.load %arg13[%c0_46, %c0_47, %c22] : memref<1x112x23xf32, #tpu.memory_space<vmem>>, vector<1x112x1xf32>
    %62 = vector.shape_cast %61 : vector<1x112x1xf32> to vector<112x1xf32>
    %63 = vector.shape_cast %60 : vector<112x1xf32> to vector<1x112x1xf32>
    tpu.vector_store %arg13[%c0_46, %c0_47, %c22], %63 {strides = array<i32>} : memref<1x112x23xf32, #tpu.memory_space<vmem>>, vector<1x112x1xf32>,
    return
  }
  func.func @transform_0(%arg0: i32) -> (i32, i32, i32) {
    %c0_i32 = arith.constant 0 : i32
    %c0_i32_0 = arith.constant 0 : i32
    %c0_i32_1 = arith.constant 0 : i32
    return %arg0, %c0_i32, %c0_i32_0 : i32, i32, i32
  }
  func.func @transform_1(%arg0: i32) -> (i32, i32, i32) {
    %c0_i32 = arith.constant 0 : i32
    %c0_i32_0 = arith.constant 0 : i32
    %c0_i32_1 = arith.constant 0 : i32
    return %arg0, %c0_i32, %c0_i32_0 : i32, i32, i32
  }
  func.func @transform_2(%arg0: i32) -> (i32, i32, i32) {
    %c0_i32 = arith.constant 0 : i32
    %c0_i32_0 = arith.constant 0 : i32
    %c0_i32_1 = arith.constant 0 : i32
    return %arg0, %c0_i32, %c0_i32_0 : i32, i32, i32
  }
  func.func @transform_3(%arg0: i32) -> (i32, i32) {
    %c0_i32 = arith.constant 0 : i32
    %c0_i32_0 = arith.constant 0 : i32
    %c0_i32_1 = arith.constant 0 : i32
    return %c0_i32, %c0_i32_0 : i32, i32
  }
  func.func @transform_4(%arg0: i32) -> (i32, i32) {
    %c0_i32 = arith.constant 0 : i32
    %c0_i32_0 = arith.constant 0 : i32
    %c0_i32_1 = arith.constant 0 : i32
    return %c0_i32, %c0_i32_0 : i32, i32
  }
  func.func @transform_5(%arg0: i32) -> (i32, i32) {
    %c0_i32 = arith.constant 0 : i32
    %c0_i32_0 = arith.constant 0 : i32
    %c0_i32_1 = arith.constant 0 : i32
    return %c0_i32, %c0_i32_0 : i32, i32
  }
  func.func @transform_6(%arg0: i32) -> (i32, i32) {
    %c0_i32 = arith.constant 0 : i32
    %c0_i32_0 = arith.constant 0 : i32
    %c0_i32_1 = arith.constant 0 : i32
    return %c0_i32, %c0_i32_0 : i32, i32
  }
  func.func @transform_7(%arg0: i32) -> (i32, i32) {
    %c0_i32 = arith.constant 0 : i32
    %c0_i32_0 = arith.constant 0 : i32
    %c0_i32_1 = arith.constant 0 : i32
    return %c0_i32, %c0_i32_0 : i32, i32
  }
  func.func @transform_8(%arg0: i32) -> (i32, i32) {
    %c0_i32 = arith.constant 0 : i32
    %c0_i32_0 = arith.constant 0 : i32
    %c0_i32_1 = arith.constant 0 : i32
    return %c0_i32, %c0_i32_0 : i32, i32
  }
  func.func @transform_9(%arg0: i32) -> (i32, i32) {
    %c0_i32 = arith.constant 0 : i32
    %c0_i32_0 = arith.constant 0 : i32
    %c0_i32_1 = arith.constant 0 : i32
    return %c0_i32, %c0_i32_0 : i32, i32
  }
  func.func @transform_10(%arg0: i32) -> (i32, i32) {
    %c0_i32 = arith.constant 0 : i32
    %c0_i32_0 = arith.constant 0 : i32
    %c0_i32_1 = arith.constant 0 : i32
    return %c0_i32, %c0_i32_0 : i32, i32
  }
  func.func @transform_11(%arg0: i32) -> (i32, i32) {
    %c0_i32 = arith.constant 0 : i32
    %c0_i32_0 = arith.constant 0 : i32
    %c0_i32_1 = arith.constant 0 : i32
    return %c0_i32, %c0_i32_0 : i32, i32
  }
  func.func @transform_12(%arg0: i32) -> (i32, i32, i32) {
    %c0_i32 = arith.constant 0 : i32
    %c0_i32_0 = arith.constant 0 : i32
    %c0_i32_1 = arith.constant 0 : i32
    return %arg0, %c0_i32, %c0_i32_0 : i32, i32, i32
  }
}

module attributes {stable_mosaic.version = 11 : i64} {
  func.func @_pool_gcn_kernel(%arg0: i32, %arg1: memref<1x101x101xf32, #tpu.memory_space<vmem>>, %arg2: memref<1x101x20xf32, #tpu.memory_space<vmem>>, %arg3: memref<20x20xbf16, #tpu.memory_space<vmem>>, %arg4: memref<1x20xf32, #tpu.memory_space<vmem>>, %arg5: memref<1x101x20xf32, #tpu.memory_space<vmem>>) attributes {dimension_semantics = [#tpu.dimension_semantics<parallel>], iteration_bounds = array<i64: 4>, scalar_prefetch = 0 : i64, scratch_operands = 0 : i64, tpu.core_type = #tpu.core_type<tc>, window_params = [{transform_indices = @transform_0, window_bounds = array<i64: 1, 101, 101>}, {transform_indices = @transform_1, window_bounds = array<i64: 1, 101, 20>}, {pipeline_mode = #tpu.pipeline_mode<synchronous>, transform_indices = @transform_2, window_bounds = array<i64: 20, 20>}, {pipeline_mode = #tpu.pipeline_mode<synchronous>, transform_indices = @transform_3, window_bounds = array<i64: 1, 20>}, {transform_indices = @transform_4, window_bounds = array<i64: 1, 101, 20>}]} {
    %c0 = arith.constant 0 : index
    %c0_0 = arith.constant 0 : index
    %c0_1 = arith.constant 0 : index
    %0 = vector.load %arg2[%c0, %c0_0, %c0_1] : memref<1x101x20xf32, #tpu.memory_space<vmem>>, vector<1x101x20xf32>
    %1 = vector.shape_cast %0 : vector<1x101x20xf32> to vector<101x20xf32>
    %2 = arith.truncf %1 : vector<101x20xf32> to vector<101x20xbf16>
    %c0_2 = arith.constant 0 : index
    %c0_3 = arith.constant 0 : index
    %3 = vector.load %arg3[%c0_2, %c0_3] : memref<20x20xbf16, #tpu.memory_space<vmem>>, vector<20x20xbf16>
    %cst = arith.constant dense<0.000000e+00> : vector<101x20xf32>
    %4 = tpu.matmul %2, %3, %cst {dimension_numbers = #tpu.dot_dimension_numbers<[1], [0], [0], [1], [0, 0, 1, 1], [], []>} : vector<101x20xbf16>, vector<20x20xbf16>, vector<101x20xf32> -> vector<101x20xf32>
    %c0_4 = arith.constant 0 : index
    %c0_5 = arith.constant 0 : index
    %c0_6 = arith.constant 0 : index
    %5 = vector.load %arg1[%c0_4, %c0_5, %c0_6] : memref<1x101x101xf32, #tpu.memory_space<vmem>>, vector<1x101x101xf32>
    %6 = vector.shape_cast %5 : vector<1x101x101xf32> to vector<101x101xf32>
    %7 = arith.truncf %6 : vector<101x101xf32> to vector<101x101xbf16>
    %8 = arith.truncf %4 : vector<101x20xf32> to vector<101x20xbf16>
    %cst_7 = arith.constant dense<0.000000e+00> : vector<101x20xf32>
    %9 = tpu.matmul %7, %8, %cst_7 {dimension_numbers = #tpu.dot_dimension_numbers<[1], [0], [0], [1], [0, 0, 1, 1], [], []>} : vector<101x101xbf16>, vector<101x20xbf16>, vector<101x20xf32> -> vector<101x20xf32>
    %c0_8 = arith.constant 0 : index
    %c0_9 = arith.constant 0 : index
    %10 = vector.load %arg4[%c0_8, %c0_9] : memref<1x20xf32, #tpu.memory_space<vmem>>, vector<1x20xf32>
    %11 = vector.broadcast %10 : vector<1x20xf32> to vector<101x20xf32>
    %12 = arith.addf %9, %11 : vector<101x20xf32>
    %cst_10 = arith.constant 0.000000e+00 : f32
    %13 = vector.broadcast %cst_10 : f32 to vector<101x20xf32>
    %14 = arith.maximumf %12, %13 : vector<101x20xf32>
    %15 = arith.addf %1, %14 : vector<101x20xf32>
    %c0_11 = arith.constant 0 : index
    %c0_12 = arith.constant 0 : index
    %c0_13 = arith.constant 0 : index
    %16 = vector.load %arg5[%c0_11, %c0_12, %c0_13] : memref<1x101x20xf32, #tpu.memory_space<vmem>>, vector<1x101x20xf32>
    %17 = vector.shape_cast %16 : vector<1x101x20xf32> to vector<101x20xf32>
    %18 = vector.shape_cast %15 : vector<101x20xf32> to vector<1x101x20xf32>
    tpu.vector_store %arg5[%c0_11, %c0_12, %c0_13], %18 {strides = array<i32>} : memref<1x101x20xf32, #tpu.memory_space<vmem>>, vector<1x101x20xf32>,
    return
  }
  func.func @transform_0(%arg0: i32) -> (i32, i32, i32) {
    %c0_i32 = arith.constant 0 : i32
    %c0_i32_0 = arith.constant 0 : i32
    %c0_i32_1 = arith.constant 0 : i32
    return %arg0, %c0_i32, %c0_i32_0 : i32, i32, i32
  }
  func.func @transform_1(%arg0: i32) -> (i32, i32, i32) {
    %c0_i32 = arith.constant 0 : i32
    %c0_i32_0 = arith.constant 0 : i32
    %c0_i32_1 = arith.constant 0 : i32
    return %arg0, %c0_i32, %c0_i32_0 : i32, i32, i32
  }
  func.func @transform_2(%arg0: i32) -> (i32, i32) {
    %c0_i32 = arith.constant 0 : i32
    %c0_i32_0 = arith.constant 0 : i32
    %c0_i32_1 = arith.constant 0 : i32
    return %c0_i32, %c0_i32_0 : i32, i32
  }
  func.func @transform_3(%arg0: i32) -> (i32, i32) {
    %c0_i32 = arith.constant 0 : i32
    %c0_i32_0 = arith.constant 0 : i32
    %c0_i32_1 = arith.constant 0 : i32
    return %c0_i32, %c0_i32_0 : i32, i32
  }
  func.func @transform_4(%arg0: i32) -> (i32, i32, i32) {
    %c0_i32 = arith.constant 0 : i32
    %c0_i32_0 = arith.constant 0 : i32
    %c0_i32_1 = arith.constant 0 : i32
    return %arg0, %c0_i32, %c0_i32_0 : i32, i32, i32
  }
}

module attributes {stable_mosaic.version = 11 : i64} {
  func.func @_global_fused_kernel(%arg0: i32, %arg1: memref<4x4xf32, #tpu.memory_space<vmem>>, %arg2: memref<4x2020xf32, #tpu.memory_space<vmem>>, %arg3: memref<6060x20xbf16, #tpu.memory_space<vmem>>, %arg4: memref<1x20xf32, #tpu.memory_space<vmem>>, %arg5: memref<1x20xf32, #tpu.memory_space<vmem>>, %arg6: memref<60x20xbf16, #tpu.memory_space<vmem>>, %arg7: memref<1x20xf32, #tpu.memory_space<vmem>>, %arg8: memref<1x20xf32, #tpu.memory_space<vmem>>, %arg9: memref<60x20xbf16, #tpu.memory_space<vmem>>, %arg10: memref<1x20xf32, #tpu.memory_space<vmem>>, %arg11: memref<1x20xf32, #tpu.memory_space<vmem>>, %arg12: memref<60x20xbf16, #tpu.memory_space<vmem>>, %arg13: memref<1x20xf32, #tpu.memory_space<vmem>>, %arg14: memref<1x20xf32, #tpu.memory_space<vmem>>, %arg15: memref<1x4xf32, #tpu.memory_space<vmem>>, %arg16: memref<20x2xbf16, #tpu.memory_space<vmem>>, %arg17: memref<1x2xf32, #tpu.memory_space<vmem>>, %arg18: memref<4x2xf32, #tpu.memory_space<vmem>>) attributes {dimension_semantics = [#tpu.dimension_semantics<arbitrary>], iteration_bounds = array<i64: 1>, scalar_prefetch = 0 : i64, scratch_operands = 0 : i64, tpu.core_type = #tpu.core_type<tc>, window_params = [{pipeline_mode = #tpu.pipeline_mode<synchronous>, transform_indices = @transform_0, window_bounds = array<i64: 4, 4>}, {pipeline_mode = #tpu.pipeline_mode<synchronous>, transform_indices = @transform_1, window_bounds = array<i64: 4, 2020>}, {pipeline_mode = #tpu.pipeline_mode<synchronous>, transform_indices = @transform_2, window_bounds = array<i64: 6060, 20>}, {pipeline_mode = #tpu.pipeline_mode<synchronous>, transform_indices = @transform_3, window_bounds = array<i64: 1, 20>}, {pipeline_mode = #tpu.pipeline_mode<synchronous>, transform_indices = @transform_4, window_bounds = array<i64: 1, 20>}, {pipeline_mode = #tpu.pipeline_mode<synchronous>, transform_indices = @transform_5, window_bounds = array<i64: 60, 20>}, {pipeline_mode = #tpu.pipeline_mode<synchronous>, transform_indices = @transform_6, window_bounds = array<i64: 1, 20>}, {pipeline_mode = #tpu.pipeline_mode<synchronous>, transform_indices = @transform_7, window_bounds = array<i64: 1, 20>}, {pipeline_mode = #tpu.pipeline_mode<synchronous>, transform_indices = @transform_8, window_bounds = array<i64: 60, 20>}, {pipeline_mode = #tpu.pipeline_mode<synchronous>, transform_indices = @transform_9, window_bounds = array<i64: 1, 20>}, {pipeline_mode = #tpu.pipeline_mode<synchronous>, transform_indices = @transform_10, window_bounds = array<i64: 1, 20>}, {pipeline_mode = #tpu.pipeline_mode<synchronous>, transform_indices = @transform_11, window_bounds = array<i64: 60, 20>}, {pipeline_mode = #tpu.pipeline_mode<synchronous>, transform_indices = @transform_12, window_bounds = array<i64: 1, 20>}, {pipeline_mode = #tpu.pipeline_mode<synchronous>, transform_indices = @transform_13, window_bounds = array<i64: 1, 20>}, {pipeline_mode = #tpu.pipeline_mode<synchronous>, transform_indices = @transform_14, window_bounds = array<i64: 1, 4>}, {pipeline_mode = #tpu.pipeline_mode<synchronous>, transform_indices = @transform_15, window_bounds = array<i64: 20, 2>}, {pipeline_mode = #tpu.pipeline_mode<synchronous>, transform_indices = @transform_16, window_bounds = array<i64: 1, 2>}, {pipeline_mode = #tpu.pipeline_mode<synchronous>, transform_indices = @transform_17, window_bounds = array<i64: 4, 2>}]} {
    %c0 = arith.constant 0 : index
    %c0_0 = arith.constant 0 : index
    %0 = vector.load %arg1[%c0, %c0_0] : memref<4x4xf32, #tpu.memory_space<vmem>>, vector<4x4xf32>
    %1 = arith.truncf %0 : vector<4x4xf32> to vector<4x4xbf16>
    %c0_1 = arith.constant 0 : index
    %c0_2 = arith.constant 0 : index
    %2 = vector.load %arg2[%c0_1, %c0_2] : memref<4x2020xf32, #tpu.memory_space<vmem>>, vector<4x2020xf32>
    %3 = arith.truncf %2 : vector<4x2020xf32> to vector<4x2020xbf16>
    %cst = arith.constant dense<0.000000e+00> : vector<4x2020xf32>
    %4 = tpu.matmul %1, %3, %cst {dimension_numbers = #tpu.dot_dimension_numbers<[1], [0], [0], [1], [0, 0, 1, 1], [], []>} : vector<4x4xbf16>, vector<4x2020xbf16>, vector<4x2020xf32> -> vector<4x2020xf32>
    %5 = arith.truncf %4 : vector<4x2020xf32> to vector<4x2020xbf16>
    %cst_3 = arith.constant dense<0.000000e+00> : vector<4x2020xf32>
    %6 = tpu.matmul %1, %5, %cst_3 {dimension_numbers = #tpu.dot_dimension_numbers<[1], [0], [0], [1], [0, 0, 1, 1], [], []>} : vector<4x4xbf16>, vector<4x2020xbf16>, vector<4x2020xf32> -> vector<4x2020xf32>
    %cst_4 = arith.constant 2.000000e+00 : f32
    %7 = vector.broadcast %cst_4 : f32 to vector<4x2020xf32>
    %8 = arith.mulf %7, %6 : vector<4x2020xf32>
    %9 = arith.subf %8, %2 : vector<4x2020xf32>
    %10 = tpu.concatenate %2, %4, %9 in 1 : vector<4x2020xf32>, vector<4x2020xf32>, vector<4x2020xf32> -> vector<4x6060xf32>
    %11 = arith.truncf %10 : vector<4x6060xf32> to vector<4x6060xbf16>
    %c0_5 = arith.constant 0 : index
    %c0_6 = arith.constant 0 : index
    %12 = vector.load %arg3[%c0_5, %c0_6] : memref<6060x20xbf16, #tpu.memory_space<vmem>>, vector<6060x20xbf16>
    %cst_7 = arith.constant dense<0.000000e+00> : vector<4x20xf32>
    %13 = tpu.matmul %11, %12, %cst_7 {dimension_numbers = #tpu.dot_dimension_numbers<[1], [0], [0], [1], [0, 0, 1, 1], [], []>} : vector<4x6060xbf16>, vector<6060x20xbf16>, vector<4x20xf32> -> vector<4x20xf32>
    %c0_8 = arith.constant 0 : index
    %c0_9 = arith.constant 0 : index
    %14 = vector.load %arg4[%c0_8, %c0_9] : memref<1x20xf32, #tpu.memory_space<vmem>>, vector<1x20xf32>
    %15 = vector.broadcast %14 : vector<1x20xf32> to vector<4x20xf32>
    %16 = arith.mulf %13, %15 : vector<4x20xf32>
    %c0_10 = arith.constant 0 : index
    %c0_11 = arith.constant 0 : index
    %17 = vector.load %arg5[%c0_10, %c0_11] : memref<1x20xf32, #tpu.memory_space<vmem>>, vector<1x20xf32>
    %18 = vector.broadcast %17 : vector<1x20xf32> to vector<4x20xf32>
    %19 = arith.addf %16, %18 : vector<4x20xf32>
    %cst_12 = arith.constant 0.000000e+00 : f32
    %20 = vector.broadcast %cst_12 : f32 to vector<4x20xf32>
    %21 = arith.maximumf %19, %20 : vector<4x20xf32>
    %22 = arith.truncf %21 : vector<4x20xf32> to vector<4x20xbf16>
    %cst_13 = arith.constant dense<0.000000e+00> : vector<4x20xf32>
    %23 = tpu.matmul %1, %22, %cst_13 {dimension_numbers = #tpu.dot_dimension_numbers<[1], [0], [0], [1], [0, 0, 1, 1], [], []>} : vector<4x4xbf16>, vector<4x20xbf16>, vector<4x20xf32> -> vector<4x20xf32>
    %24 = arith.truncf %23 : vector<4x20xf32> to vector<4x20xbf16>
    %cst_14 = arith.constant dense<0.000000e+00> : vector<4x20xf32>
    %25 = tpu.matmul %1, %24, %cst_14 {dimension_numbers = #tpu.dot_dimension_numbers<[1], [0], [0], [1], [0, 0, 1, 1], [], []>} : vector<4x4xbf16>, vector<4x20xbf16>, vector<4x20xf32> -> vector<4x20xf32>
    %cst_15 = arith.constant 2.000000e+00 : f32
    %26 = vector.broadcast %cst_15 : f32 to vector<4x20xf32>
    %27 = arith.mulf %26, %25 : vector<4x20xf32>
    %28 = arith.subf %27, %21 : vector<4x20xf32>
    %29 = tpu.concatenate %21, %23, %28 in 1 : vector<4x20xf32>, vector<4x20xf32>, vector<4x20xf32> -> vector<4x60xf32>
    %30 = arith.truncf %29 : vector<4x60xf32> to vector<4x60xbf16>
    %c0_16 = arith.constant 0 : index
    %c0_17 = arith.constant 0 : index
    %31 = vector.load %arg6[%c0_16, %c0_17] : memref<60x20xbf16, #tpu.memory_space<vmem>>, vector<60x20xbf16>
    %cst_18 = arith.constant dense<0.000000e+00> : vector<4x20xf32>
    %32 = tpu.matmul %30, %31, %cst_18 {dimension_numbers = #tpu.dot_dimension_numbers<[1], [0], [0], [1], [0, 0, 1, 1], [], []>} : vector<4x60xbf16>, vector<60x20xbf16>, vector<4x20xf32> -> vector<4x20xf32>
    %c0_19 = arith.constant 0 : index
    %c0_20 = arith.constant 0 : index
    %33 = vector.load %arg7[%c0_19, %c0_20] : memref<1x20xf32, #tpu.memory_space<vmem>>, vector<1x20xf32>
    %34 = vector.broadcast %33 : vector<1x20xf32> to vector<4x20xf32>
    %35 = arith.mulf %32, %34 : vector<4x20xf32>
    %c0_21 = arith.constant 0 : index
    %c0_22 = arith.constant 0 : index
    %36 = vector.load %arg8[%c0_21, %c0_22] : memref<1x20xf32, #tpu.memory_space<vmem>>, vector<1x20xf32>
    %37 = vector.broadcast %36 : vector<1x20xf32> to vector<4x20xf32>
    %38 = arith.addf %35, %37 : vector<4x20xf32>
    %cst_23 = arith.constant 0.000000e+00 : f32
    %39 = vector.broadcast %cst_23 : f32 to vector<4x20xf32>
    %40 = arith.maximumf %38, %39 : vector<4x20xf32>
    %cst_24 = arith.constant 0.699999988 : f32
    %41 = vector.broadcast %cst_24 : f32 to vector<4x20xf32>
    %42 = arith.mulf %41, %21 : vector<4x20xf32>
    %43 = arith.addf %40, %42 : vector<4x20xf32>
    %44 = arith.truncf %43 : vector<4x20xf32> to vector<4x20xbf16>
    %cst_25 = arith.constant dense<0.000000e+00> : vector<4x20xf32>
    %45 = tpu.matmul %1, %44, %cst_25 {dimension_numbers = #tpu.dot_dimension_numbers<[1], [0], [0], [1], [0, 0, 1, 1], [], []>} : vector<4x4xbf16>, vector<4x20xbf16>, vector<4x20xf32> -> vector<4x20xf32>
    %46 = arith.truncf %45 : vector<4x20xf32> to vector<4x20xbf16>
    %cst_26 = arith.constant dense<0.000000e+00> : vector<4x20xf32>
    %47 = tpu.matmul %1, %46, %cst_26 {dimension_numbers = #tpu.dot_dimension_numbers<[1], [0], [0], [1], [0, 0, 1, 1], [], []>} : vector<4x4xbf16>, vector<4x20xbf16>, vector<4x20xf32> -> vector<4x20xf32>
    %cst_27 = arith.constant 2.000000e+00 : f32
    %48 = vector.broadcast %cst_27 : f32 to vector<4x20xf32>
    %49 = arith.mulf %48, %47 : vector<4x20xf32>
    %50 = arith.subf %49, %43 : vector<4x20xf32>
    %51 = tpu.concatenate %43, %45, %50 in 1 : vector<4x20xf32>, vector<4x20xf32>, vector<4x20xf32> -> vector<4x60xf32>
    %52 = arith.truncf %51 : vector<4x60xf32> to vector<4x60xbf16>
    %c0_28 = arith.constant 0 : index
    %c0_29 = arith.constant 0 : index
    %53 = vector.load %arg9[%c0_28, %c0_29] : memref<60x20xbf16, #tpu.memory_space<vmem>>, vector<60x20xbf16>
    %cst_30 = arith.constant dense<0.000000e+00> : vector<4x20xf32>
    %54 = tpu.matmul %52, %53, %cst_30 {dimension_numbers = #tpu.dot_dimension_numbers<[1], [0], [0], [1], [0, 0, 1, 1], [], []>} : vector<4x60xbf16>, vector<60x20xbf16>, vector<4x20xf32> -> vector<4x20xf32>
    %c0_31 = arith.constant 0 : index
    %c0_32 = arith.constant 0 : index
    %55 = vector.load %arg10[%c0_31, %c0_32] : memref<1x20xf32, #tpu.memory_space<vmem>>, vector<1x20xf32>
    %56 = vector.broadcast %55 : vector<1x20xf32> to vector<4x20xf32>
    %57 = arith.mulf %54, %56 : vector<4x20xf32>
    %c0_33 = arith.constant 0 : index
    %c0_34 = arith.constant 0 : index
    %58 = vector.load %arg11[%c0_33, %c0_34] : memref<1x20xf32, #tpu.memory_space<vmem>>, vector<1x20xf32>
    %59 = vector.broadcast %58 : vector<1x20xf32> to vector<4x20xf32>
    %60 = arith.addf %57, %59 : vector<4x20xf32>
    %cst_35 = arith.constant 0.000000e+00 : f32
    %61 = vector.broadcast %cst_35 : f32 to vector<4x20xf32>
    %62 = arith.maximumf %60, %61 : vector<4x20xf32>
    %cst_36 = arith.constant 0.699999988 : f32
    %63 = vector.broadcast %cst_36 : f32 to vector<4x20xf32>
    %64 = arith.mulf %63, %43 : vector<4x20xf32>
    %65 = arith.addf %62, %64 : vector<4x20xf32>
    %66 = arith.truncf %65 : vector<4x20xf32> to vector<4x20xbf16>
    %cst_37 = arith.constant dense<0.000000e+00> : vector<4x20xf32>
    %67 = tpu.matmul %1, %66, %cst_37 {dimension_numbers = #tpu.dot_dimension_numbers<[1], [0], [0], [1], [0, 0, 1, 1], [], []>} : vector<4x4xbf16>, vector<4x20xbf16>, vector<4x20xf32> -> vector<4x20xf32>
    %68 = arith.truncf %67 : vector<4x20xf32> to vector<4x20xbf16>
    %cst_38 = arith.constant dense<0.000000e+00> : vector<4x20xf32>
    %69 = tpu.matmul %1, %68, %cst_38 {dimension_numbers = #tpu.dot_dimension_numbers<[1], [0], [0], [1], [0, 0, 1, 1], [], []>} : vector<4x4xbf16>, vector<4x20xbf16>, vector<4x20xf32> -> vector<4x20xf32>
    %cst_39 = arith.constant 2.000000e+00 : f32
    %70 = vector.broadcast %cst_39 : f32 to vector<4x20xf32>
    %71 = arith.mulf %70, %69 : vector<4x20xf32>
    %72 = arith.subf %71, %65 : vector<4x20xf32>
    %73 = tpu.concatenate %65, %67, %72 in 1 : vector<4x20xf32>, vector<4x20xf32>, vector<4x20xf32> -> vector<4x60xf32>
    %74 = arith.truncf %73 : vector<4x60xf32> to vector<4x60xbf16>
    %c0_40 = arith.constant 0 : index
    %c0_41 = arith.constant 0 : index
    %75 = vector.load %arg12[%c0_40, %c0_41] : memref<60x20xbf16, #tpu.memory_space<vmem>>, vector<60x20xbf16>
    %cst_42 = arith.constant dense<0.000000e+00> : vector<4x20xf32>
    %76 = tpu.matmul %74, %75, %cst_42 {dimension_numbers = #tpu.dot_dimension_numbers<[1], [0], [0], [1], [0, 0, 1, 1], [], []>} : vector<4x60xbf16>, vector<60x20xbf16>, vector<4x20xf32> -> vector<4x20xf32>
    %c0_43 = arith.constant 0 : index
    %c0_44 = arith.constant 0 : index
    %77 = vector.load %arg13[%c0_43, %c0_44] : memref<1x20xf32, #tpu.memory_space<vmem>>, vector<1x20xf32>
    %78 = vector.broadcast %77 : vector<1x20xf32> to vector<4x20xf32>
    %79 = arith.mulf %76, %78 : vector<4x20xf32>
    %c0_45 = arith.constant 0 : index
    %c0_46 = arith.constant 0 : index
    %80 = vector.load %arg14[%c0_45, %c0_46] : memref<1x20xf32, #tpu.memory_space<vmem>>, vector<1x20xf32>
    %81 = vector.broadcast %80 : vector<1x20xf32> to vector<4x20xf32>
    %82 = arith.addf %79, %81 : vector<4x20xf32>
    %cst_47 = arith.constant 0.000000e+00 : f32
    %83 = vector.broadcast %cst_47 : f32 to vector<4x20xf32>
    %84 = arith.maximumf %82, %83 : vector<4x20xf32>
    %cst_48 = arith.constant 0.699999988 : f32
    %85 = vector.broadcast %cst_48 : f32 to vector<4x20xf32>
    %86 = arith.mulf %85, %65 : vector<4x20xf32>
    %87 = arith.addf %84, %86 : vector<4x20xf32>
    %c0_49 = arith.constant 0 : index
    %c0_50 = arith.constant 0 : index
    %88 = vector.load %arg15[%c0_49, %c0_50] : memref<1x4xf32, #tpu.memory_space<vmem>>, vector<1x4xf32>
    %89 = vector.extract_strided_slice %88 {offsets = [0, 0], sizes = [1, 1], strides = [1, 1]} : vector<1x4xf32> to vector<1x1xf32>
    %90 = vector.broadcast %89 : vector<1x1xf32> to vector<4x20xf32>
    %91 = arith.mulf %21, %90 : vector<4x20xf32>
    %92 = vector.extract_strided_slice %88 {offsets = [0, 1], sizes = [1, 1], strides = [1, 1]} : vector<1x4xf32> to vector<1x1xf32>
    %93 = vector.broadcast %92 : vector<1x1xf32> to vector<4x20xf32>
    %94 = arith.mulf %43, %93 : vector<4x20xf32>
    %95 = arith.addf %91, %94 : vector<4x20xf32>
    %96 = vector.extract_strided_slice %88 {offsets = [0, 2], sizes = [1, 1], strides = [1, 1]} : vector<1x4xf32> to vector<1x1xf32>
    %97 = vector.broadcast %96 : vector<1x1xf32> to vector<4x20xf32>
    %98 = arith.mulf %65, %97 : vector<4x20xf32>
    %99 = arith.addf %95, %98 : vector<4x20xf32>
    %100 = vector.extract_strided_slice %88 {offsets = [0, 3], sizes = [1, 1], strides = [1, 1]} : vector<1x4xf32> to vector<1x1xf32>
    %101 = vector.broadcast %100 : vector<1x1xf32> to vector<4x20xf32>
    %102 = arith.mulf %87, %101 : vector<4x20xf32>
    %103 = arith.addf %99, %102 : vector<4x20xf32>
    %104 = arith.truncf %103 : vector<4x20xf32> to vector<4x20xbf16>
    %c0_51 = arith.constant 0 : index
    %c0_52 = arith.constant 0 : index
    %105 = vector.load %arg16[%c0_51, %c0_52] : memref<20x2xbf16, #tpu.memory_space<vmem>>, vector<20x2xbf16>
    %cst_53 = arith.constant dense<0.000000e+00> : vector<4x2xf32>
    %106 = tpu.matmul %104, %105, %cst_53 {dimension_numbers = #tpu.dot_dimension_numbers<[1], [0], [0], [1], [0, 0, 1, 1], [], []>} : vector<4x20xbf16>, vector<20x2xbf16>, vector<4x2xf32> -> vector<4x2xf32>
    %c0_54 = arith.constant 0 : index
    %c0_55 = arith.constant 0 : index
    %107 = vector.load %arg17[%c0_54, %c0_55] : memref<1x2xf32, #tpu.memory_space<vmem>>, vector<1x2xf32>
    %108 = vector.broadcast %107 : vector<1x2xf32> to vector<4x2xf32>
    %109 = arith.addf %106, %108 : vector<4x2xf32>
    %c0_56 = arith.constant 0 : index
    %c0_57 = arith.constant 0 : index
    %110 = vector.load %arg18[%c0_56, %c0_57] : memref<4x2xf32, #tpu.memory_space<vmem>>, vector<4x2xf32>
    tpu.vector_store %arg18[%c0_56, %c0_57], %109 {strides = array<i32>} : memref<4x2xf32, #tpu.memory_space<vmem>>, vector<4x2xf32>,
    return
  }
  func.func @transform_0(%arg0: i32) -> (i32, i32) {
    %c0_i32 = arith.constant 0 : i32
    %c0_i32_0 = arith.constant 0 : i32
    %c0_i32_1 = arith.constant 0 : i32
    return %c0_i32, %c0_i32_0 : i32, i32
  }
  func.func @transform_1(%arg0: i32) -> (i32, i32) {
    %c0_i32 = arith.constant 0 : i32
    %c0_i32_0 = arith.constant 0 : i32
    %c0_i32_1 = arith.constant 0 : i32
    return %c0_i32, %c0_i32_0 : i32, i32
  }
  func.func @transform_2(%arg0: i32) -> (i32, i32) {
    %c0_i32 = arith.constant 0 : i32
    %c0_i32_0 = arith.constant 0 : i32
    %c0_i32_1 = arith.constant 0 : i32
    return %c0_i32, %c0_i32_0 : i32, i32
  }
  func.func @transform_3(%arg0: i32) -> (i32, i32) {
    %c0_i32 = arith.constant 0 : i32
    %c0_i32_0 = arith.constant 0 : i32
    %c0_i32_1 = arith.constant 0 : i32
    return %c0_i32, %c0_i32_0 : i32, i32
  }
  func.func @transform_4(%arg0: i32) -> (i32, i32) {
    %c0_i32 = arith.constant 0 : i32
    %c0_i32_0 = arith.constant 0 : i32
    %c0_i32_1 = arith.constant 0 : i32
    return %c0_i32, %c0_i32_0 : i32, i32
  }
  func.func @transform_5(%arg0: i32) -> (i32, i32) {
    %c0_i32 = arith.constant 0 : i32
    %c0_i32_0 = arith.constant 0 : i32
    %c0_i32_1 = arith.constant 0 : i32
    return %c0_i32, %c0_i32_0 : i32, i32
  }
  func.func @transform_6(%arg0: i32) -> (i32, i32) {
    %c0_i32 = arith.constant 0 : i32
    %c0_i32_0 = arith.constant 0 : i32
    %c0_i32_1 = arith.constant 0 : i32
    return %c0_i32, %c0_i32_0 : i32, i32
  }
  func.func @transform_7(%arg0: i32) -> (i32, i32) {
    %c0_i32 = arith.constant 0 : i32
    %c0_i32_0 = arith.constant 0 : i32
    %c0_i32_1 = arith.constant 0 : i32
    return %c0_i32, %c0_i32_0 : i32, i32
  }
  func.func @transform_8(%arg0: i32) -> (i32, i32) {
    %c0_i32 = arith.constant 0 : i32
    %c0_i32_0 = arith.constant 0 : i32
    %c0_i32_1 = arith.constant 0 : i32
    return %c0_i32, %c0_i32_0 : i32, i32
  }
  func.func @transform_9(%arg0: i32) -> (i32, i32) {
    %c0_i32 = arith.constant 0 : i32
    %c0_i32_0 = arith.constant 0 : i32
    %c0_i32_1 = arith.constant 0 : i32
    return %c0_i32, %c0_i32_0 : i32, i32
  }
  func.func @transform_10(%arg0: i32) -> (i32, i32) {
    %c0_i32 = arith.constant 0 : i32
    %c0_i32_0 = arith.constant 0 : i32
    %c0_i32_1 = arith.constant 0 : i32
    return %c0_i32, %c0_i32_0 : i32, i32
  }
  func.func @transform_11(%arg0: i32) -> (i32, i32) {
    %c0_i32 = arith.constant 0 : i32
    %c0_i32_0 = arith.constant 0 : i32
    %c0_i32_1 = arith.constant 0 : i32
    return %c0_i32, %c0_i32_0 : i32, i32
  }
  func.func @transform_12(%arg0: i32) -> (i32, i32) {
    %c0_i32 = arith.constant 0 : i32
    %c0_i32_0 = arith.constant 0 : i32
    %c0_i32_1 = arith.constant 0 : i32
    return %c0_i32, %c0_i32_0 : i32, i32
  }
  func.func @transform_13(%arg0: i32) -> (i32, i32) {
    %c0_i32 = arith.constant 0 : i32
    %c0_i32_0 = arith.constant 0 : i32
    %c0_i32_1 = arith.constant 0 : i32
    return %c0_i32, %c0_i32_0 : i32, i32
  }
  func.func @transform_14(%arg0: i32) -> (i32, i32) {
    %c0_i32 = arith.constant 0 : i32
    %c0_i32_0 = arith.constant 0 : i32
    %c0_i32_1 = arith.constant 0 : i32
    return %c0_i32, %c0_i32_0 : i32, i32
  }
  func.func @transform_15(%arg0: i32) -> (i32, i32) {
    %c0_i32 = arith.constant 0 : i32
    %c0_i32_0 = arith.constant 0 : i32
    %c0_i32_1 = arith.constant 0 : i32
    return %c0_i32, %c0_i32_0 : i32, i32
  }
  func.func @transform_16(%arg0: i32) -> (i32, i32) {
    %c0_i32 = arith.constant 0 : i32
    %c0_i32_0 = arith.constant 0 : i32
    %c0_i32_1 = arith.constant 0 : i32
    return %c0_i32, %c0_i32_0 : i32, i32
  }
  func.func @transform_17(%arg0: i32) -> (i32, i32) {
    %c0_i32 = arith.constant 0 : i32
    %c0_i32_0 = arith.constant 0 : i32
    %c0_i32_1 = arith.constant 0 : i32
    return %c0_i32, %c0_i32_0 : i32, i32
  }
}

</mosaic_0001>

<bundles_post_ra>
// kernel: lg_gnn_forward.3
= control target key start
LH: loop header
LB: loop body
LE: loop exit
PB: predicated region body
PF: predicated region fallthrough
CT: control target
= control target key end

     0   :  { %s2780_s23 = smov 0   ;;  %s3551_s0 = inlined_call_operand.vmem [shape: f32[4,112,112], index: 0, kind: input, shape index: {}]   ;;  %s3552_s1 = inlined_call_operand.vmem [shape: f32[4,112,112], index: 1, kind: input, shape index: {}]   ;;  %s3553_s2 = inlined_call_operand.vmem [shape: f32[4,112,112], index: 2, kind: input, shape index: {}]   ;;  %s3554_s3 = inlined_call_operand.vmem [shape: bf16[112,64], index: 3, kind: input, shape index: {}]   ;;  %s3555_s4 = inlined_call_operand.vmem [shape: f32[1,64], index: 4, kind: input, shape index: {}]   ;;  %s3556_s5 = inlined_call_operand.vmem [shape: bf16[64,20], index: 5, kind: input, shape index: {}]   ;;  %s3557_s6 = inlined_call_operand.vmem [shape: f32[1,20], index: 6, kind: input, shape index: {}]   ;;  %s3558_s7 = inlined_call_operand.vmem [shape: bf16[20,21], index: 7, kind: input, shape index: {}]   ;;  %s3559_s8 = inlined_call_operand.vmem [shape: f32[1,21], index: 8, kind: input, shape index: {}]   ;;  %s3560_s9 = inlined_call_operand.vmem [shape: bf16[20,1], index: 9, kind: input, shape index: {}]   ;;  %s3561_s10 = inlined_call_operand.vmem [shape: bf16[20,1], index: 10, kind: input, shape index: {}]   ;;  %s3562_s11 = inlined_call_operand.<no memory space> [shape: f32[1,1], index: 11, kind: input, shape index: {}]   ;;  %s3563_s12 = inlined_call_operand.vmem [shape: f32[4,112,23], index: 12, kind: output, shape index: {}]  }
   0x1   :  { %v17_v0 = vstv %s3562_s11 }
   0x2   :  { %18 = vst [vmem:[#allocation2] sm:$0x1] %v17_v0 }
   0x3 LB: > { %s2077_s24 = sadd.s32 4294967295, %s2706_s23   ;;  %p2081_p0 = scmp.ge.s32.totalorder %s2706_s23, 1  ;;  %s2706_s23 = sphi %s2780_s23, %s24_s23  }
   0x4   : > { %p384_p1 = scmp.lt.s32.totalorder %s2706_s23, 5 }
   0x6   : > { %p385_p2 = pnand %p2081_p0, %p384_p1 }
   0x7   : > { %v2683_v1 = vld [vmem:[%s3554_s3] sm:$0xff] (!%p385_p2)   ;;  %v2708_v2 = vmov (!%p385_p2), 0.0   ;;  %v2684_v3 = vld [vmem:[%s3554_s3 + $0x8] sm:$0xff] (!%p385_p2)   ;;  %vm2709_vm0 = vmmov (!%p385_p2), 0   ;;  %p436_p3 = scmp.lt.s32.totalorder (!%p385_p2), %s2077_s24, 3  ;;  %v2685_v4 = vld [vmem:[%s3554_s3 + $0x10] sm:$0xff] (!%p385_p2)  }
   0x8   : > { %388 = sbr.rel (%p385_p2) target bundleno = 2147 (0x863), region = 68  ;;  %2296 = vmatprep.subr.bf16.mxu0 (!%p385_p2), %v2708_v2  ;;  %2338 = vmatprep.subr.bf16.mxu1 (!%p385_p2), %v2708_v2  ;;  %v2686_v5 = vld [vmem:[%s3554_s3 + $0x18] sm:$0xff] (!%p385_p2)   ;;  %v2687_v6 = vld [vmem:[%s3554_s3 + $0x20] sm:$0xff] (!%p385_p2)   ;;  %v2688_v7 = vld [vmem:[%s3554_s3 + $0x28] sm:$0xff] (!%p385_p2)   ;;  %vm555_vm1 = vcmask (!%p385_p2), 916480   ;;  %vm843_vm2 = vcmask (!%p385_p2), 523264  }
   0x9   : > { %2297 = vmatpush3.bf16.msra.mxu0 (!%p385_p2), %v2683_v1  ;;  %2310 = vmatprep.mubr.msk.bf16.mxu0 (!%p385_p2), %vm2709_vm0, %v2708_v2  ;;  %v2689_v8 = vld [vmem:[%s3554_s3 + $0x30] sm:$0xff] (!%p385_p2)   ;;  %v2690_v30 = vld [vmem:[%s3556_s5] sm:$0xff] (!%p385_p2)   ;;  %v2691_v31 = vld [vmem:[%s3556_s5 + $0x8] sm:$0xff] (!%p385_p2)   ;;  %vm1112_vm3 = vcmask (!%p385_p2), 1041408   ;;  %vm1090_vm4 = vcmask (!%p385_p2), 162816   ;;  %vm1813_vm5 = vcmask (!%p385_p2), 171168  }
   0xa   : > { %2298 = vmatprep.subr.bf16.mxu0 (!%p385_p2), %v2708_v2  ;;  %2352 = vmatprep.mubr.msk.bf16.mxu1 (!%p385_p2), %vm2709_vm0, %v2708_v2  ;;  %v2692_v32 = vld [vmem:[%s3556_s5 + $0x10] sm:$0xff] (!%p385_p2)   ;;  %vm1898_vm6 = vcmask (!%p385_p2), 179368   ;;  %s2711_s26 = smov (!%p385_p2), 22   ;;  %vm1983_vm7 = vcmask (!%p385_p2), 187568  }
   0xd   : > { %2299 = vmatpush3.bf16.msra.mxu0 (!%p385_p2), %v2684_v3 }
   0xe   : > { %2300 = vmatprep.subr.bf16.mxu0 (!%p385_p2), %v2708_v2 }
   0xf   : > { %s3565_s24 = smov (!%p436_p3, %s2077_s24), 3 }
  0x10   : > { %s2812_s16 = smul.u32 112, %s3565_s24 }
  0x11   : > { %2301 = vmatpush3.bf16.msra.mxu0 %v2685_v4 }
  0x12   : > { %2302 = vmatprep.subr.bf16.mxu0 %v2708_v2  ;;  %s2823_s21 = scalar_lea.vmem %s3552_s1, %s2812_s16  ;;  %s2887_s14 = scalar_lea.vmem %s3551_s0, %s2812_s16 }
  0x13   : > { %v478_v9 = vld [vmem:[%s2823_s21] sm:$0xff]  ;;  %v479_v10 = vld [vmem:[%s2823_s21 + $0x8] sm:$0xff]  ;;  %v480_v12 = vld [vmem:[%s2823_s21 + $0x10] sm:$0xff]  ;;  %s3044_s28 = scalar_lea.vmem %s3563_s12, %s2812_s16  ;;  %s3291_s25 = scalar_lea.vmem %s3553_s2, %s2812_s16 }
  0x14   : > { %v492_v11 = vpack.c.bf16 %v479_v10, %v478_v9  ;;  %v481_v13 = vld [vmem:[%s2823_s21 + $0x18] sm:$0xff]  ;;  %v482_v15 = vld [vmem:[%s2823_s21 + $0x20] sm:$0xff]  ;;  %v483_v16 = vld [vmem:[%s2823_s21 + $0x28] sm:$0xff]  ;;  %s2710_s16 = smov 21  }
  0x15   : > { %2303 = vmatpush3.bf16.msra.mxu0 %v2686_v5  ;;  %v493_v14 = vpack.c.bf16 %v481_v13, %v480_v12  ;;  %v494_v17 = vpack.c.bf16 %v483_v16, %v482_v15  ;;  %v484_v18 = vld [vmem:[%s2823_s21 + $0x30] sm:$0xff]  ;;  %v485_v19 = vld [vmem:[%s2823_s21 + $0x38] sm:$0xff]  ;;  %v486_v21 = vld [vmem:[%s2823_s21 + $0x40] sm:$0xff] }
  0x16   : > { %2304 = vmatprep.subr.bf16.mxu0 %v2708_v2  ;;  %v495_v20 = vpack.c.bf16 %v485_v19, %v484_v18  ;;  %v487_v22 = vld [vmem:[%s2823_s21 + $0x48] sm:$0xff]  ;;  %v488_v24 = vld [vmem:[%s2823_s21 + $0x50] sm:$0xff]  ;;  %v489_v25 = vld [vmem:[%s2823_s21 + $0x58] sm:$0xff] }
  0x17   : > { %v496_v23 = vpack.c.bf16 %v487_v22, %v486_v21  ;;  %v497_v26 = vpack.c.bf16 %v489_v25, %v488_v24  ;;  %v490_v27 = vld [vmem:[%s2823_s21 + $0x60] sm:$0xff]  ;;  %v491_v28 = vld [vmem:[%s2823_s21 + $0x68] sm:$0xff]  ;;  %v460_v9 = vld [vmem:[%s2887_s14 + $0x18] sm:$0xff] }
  0x18   : > { %v498_v29 = vpack.c.bf16 %v491_v28, %v490_v27  ;;  %v457_v1 = vld [vmem:[%s2887_s14] sm:$0xff]  ;;  %v458_v3 = vld [vmem:[%s2887_s14 + $0x8] sm:$0xff]  ;;  %v464_v15 = vld [vmem:[%s2887_s14 + $0x38] sm:$0xff] }
  0x19   : > { %2305 = vmatpush3.bf16.msra.mxu0 %v2687_v6  ;;  %v462_v12 = vld [vmem:[%s2887_s14 + $0x28] sm:$0xff]  ;;  %v468_v21 = vld [vmem:[%s2887_s14 + $0x58] sm:$0xff]  ;;  %v2953_v27 = vld [vmem:[%s3555_s4] ss:$0 sm:$0xff] }
  0x1a   : > { %2306 = vmatprep.subr.bf16.mxu0 %v2708_v2  ;;  %v466_v18 = vld [vmem:[%s2887_s14 + $0x48] sm:$0xff] }
  0x1b   : > { %v470_v24 = vld [vmem:[%s2887_s14 + $0x68] sm:$0xff] }
  0x1d   : > { %2307 = vmatpush3.bf16.msra.mxu0 %v2688_v7  ;;  %v2891_v7 = vpack.c.bf16 %v458_v3, %v457_v1 }
  0x1e   : > { %2308 = vmatprep.subr.bf16.mxu0 %v2708_v2 }
  0x21   : > { %2309 = vmatpush3.bf16.msra.mxu0 %v2689_v8  ;;  %v459_v8 = vld [vmem:[%s2887_s14 + $0x10] sm:$0xff] }
  0x22   : > { %2380 = vmatprep.subr.bf16.mxu0 %v2708_v2  ;;  %v2900_v10 = vpack.c.bf16 %v460_v9, %v459_v8 }
  0x24   : > { %2311 = vmatmul.mubr.msk.bf16.vlgmr.msra.gmra.mrb[0].mxu0 %vm555_vm1, %v492_v11  ;;  %v461_v11 = vld [vmem:[%s2887_s14 + $0x20] sm:$0xff] }
  0x25   : > { %2314 = vmatprep.mubr.msk.bf16.mxu0 %vm2709_vm0, %v2708_v2  ;;  %2381 = vmatpush3.bf16.msra.mxu0 %v2690_v30  ;;  %v2908_v13 = vpack.c.bf16 %v462_v12, %v461_v11 }
  0x26   : > { %2382 = vmatprep.subr.bf16.mxu0 %v2708_v2 }
  0x29   : > { %2383 = vmatpush3.bf16.msra.mxu0 %v2691_v31 }
  0x2a   : > { %2384 = vmatprep.subr.bf16.mxu0 %v2708_v2 }
  0x2c   : > { %2315 = vmatmul.mubr.msk.bf16.gmra.mrb[4].mxu0 %vm555_vm1, %v493_v14  ;;  %v463_v14 = vld [vmem:[%s2887_s14 + $0x30] sm:$0xff] }
  0x2d   : > { %2318 = vmatprep.mubr.msk.bf16.mxu0 %vm2709_vm0, %v2708_v2  ;;  %2385 = vmatpush3.bf16.msra.mxu0 %v2692_v32  ;;  %v2916_v16 = vpack.c.bf16 %v464_v15, %v463_v14 }
  0x2e   : > { %2386 = vmatprep.subr.bf16.mxu0 %v2708_v2 }
  0x34   : > { %2319 = vmatmul.mubr.msk.bf16.gmra.mrb[8].mxu0 %vm555_vm1, %v494_v17  ;;  %v465_v17 = vld [vmem:[%s2887_s14 + $0x40] sm:$0xff] }
  0x35   : > { %2322 = vmatprep.mubr.msk.bf16.mxu0 %vm2709_vm0, %v2708_v2  ;;  %v2924_v19 = vpack.c.bf16 %v466_v18, %v465_v17 }
  0x3c   : > { %2323 = vmatmul.mubr.msk.bf16.gmra.mrb[12].mxu0 %vm555_vm1, %v495_v20  ;;  %v467_v20 = vld [vmem:[%s2887_s14 + $0x50] sm:$0xff] }
  0x3d   : > { %2326 = vmatprep.mubr.msk.bf16.mxu0 %vm2709_vm0, %v2708_v2  ;;  %v2932_v22 = vpack.c.bf16 %v468_v21, %v467_v20 }
  0x44   : > { %2327 = vmatmul.mubr.msk.bf16.gmra.mrb[16].mxu0 %vm555_vm1, %v496_v23  ;;  %v469_v23 = vld [vmem:[%s2887_s14 + $0x60] sm:$0xff] }
  0x45   : > { %2330 = vmatprep.mubr.msk.bf16.mxu0 %vm2709_vm0, %v2708_v2  ;;  %v2940_v25 = vpack.c.bf16 %v470_v24, %v469_v23 }
  0x4c   : > { %2331 = vmatmul.mubr.msk.bf16.gmra.mrb[20].mxu0 %vm555_vm1, %v497_v26  ;;  %v2693_v26 = vld [vmem:[%s3556_s5 + $0x18] sm:$0xff]  }
  0x4d   : > { %2334 = vmatprep.mubr.msk.bf16.mxu0 %vm2709_vm0, %v2708_v2  ;;  %2387 = vmatpush3.bf16.msra.mxu0 %v2693_v26 }
  0x4e   : > { %2458 = vmatprep.subr.bf16.mxu0 %v2708_v2 }
  0x54   : > { %2335 = vmatmul.mubr.msk.bf16.gmra.mrb[24].mxu0 %vm555_vm1, %v498_v29 }
  0x55   : > { %2388 = vmatprep.mubr.msk.bf16.mxu0 %vm2709_vm0, %v2708_v2 }
  0xf7   : > { %v611_v33 = vpop.f32.mrb[0].mxu0 }
  0xf8   : > { %v2312_v34 = vpop.f32.mrb[1].mxu0 }
  0xf9   : > { %v614_v35 = vpop.f32.mrb[2].mxu0 }
  0xfa   : > { %v666_v36 = vpack.c.bf16 %v614_v35, %v611_v33  ;;  %v2313_v37 = vpop.f32.mrb[3].mxu0 }
  0xfc   : > { %2339 = vmatpush3.bf16.msra.mxu1 %v666_v36 }
  0xfd   : > { %2340 = vmatprep.subr.bf16.mxu1 %v2708_v2 }
  0xff   : > { %v619_v38 = vpop.f32.mrb[4].mxu0 }
 0x100   : > { %v2316_v39 = vpop.f32.mrb[5].mxu0 }
 0x101   : > { %v622_v40 = vpop.f32.mrb[6].mxu0 }
 0x102   : > { %v667_v41 = vpack.c.bf16 %v622_v40, %v619_v38  ;;  %v2317_v42 = vpop.f32.mrb[7].mxu0 }
 0x104   : > { %2341 = vmatpush3.bf16.msra.mxu1 %v667_v41 }
 0x105   : > { %2342 = vmatprep.subr.bf16.mxu1 %v2708_v2 }
 0x107   : > { %v627_v43 = vpop.f32.mrb[8].mxu0 }
 0x108   : > { %v2320_v44 = vpop.f32.mrb[9].mxu0 }
 0x109   : > { %v630_v45 = vpop.f32.mrb[10].mxu0 }
 0x10a   : > { %v668_v46 = vpack.c.bf16 %v630_v45, %v627_v43  ;;  %v2321_v47 = vpop.f32.mrb[11].mxu0 }
 0x10c   : > { %2343 = vmatpush3.bf16.msra.mxu1 %v668_v46 }
 0x10d   : > { %2344 = vmatprep.subr.bf16.mxu1 %v2708_v2 }
 0x10f   : > { %v635_v48 = vpop.f32.mrb[12].mxu0 }
 0x110   : > { %v2324_v49 = vpop.f32.mrb[13].mxu0 }
 0x111   : > { %v638_v50 = vpop.f32.mrb[14].mxu0 }
 0x112   : > { %v669_v51 = vpack.c.bf16 %v638_v50, %v635_v48  ;;  %v2325_v52 = vpop.f32.mrb[15].mxu0 }
 0x114   : > { %2345 = vmatpush3.bf16.msra.mxu1 %v669_v51 }
 0x115   : > { %2346 = vmatprep.subr.bf16.mxu1 %v2708_v2 }
 0x117   : > { %v643_v53 = vpop.f32.mrb[16].mxu0 }
 0x118   : > { %v2328_v54 = vpop.f32.mrb[17].mxu0 }
 0x119   : > { %v646_v55 = vpop.f32.mrb[18].mxu0 }
 0x11a   : > { %v670_v56 = vpack.c.bf16 %v646_v55, %v643_v53  ;;  %v2329_v57 = vpop.f32.mrb[19].mxu0 }
 0x11c   : > { %2347 = vmatpush3.bf16.msra.mxu1 %v670_v56 }
 0x11d   : > { %2348 = vmatprep.subr.bf16.mxu1 %v2708_v2 }
 0x11f   : > { %v651_v58 = vpop.f32.mrb[20].mxu0 }
 0x120   : > { %v2332_v59 = vpop.f32.mrb[21].mxu0 }
 0x121   : > { %v654_v60 = vpop.f32.mrb[22].mxu0 }
 0x122   : > { %v671_v61 = vpack.c.bf16 %v654_v60, %v651_v58  ;;  %v2333_v62 = vpop.f32.mrb[23].mxu0 }
 0x124   : > { %2349 = vmatpush3.bf16.msra.mxu1 %v671_v61 }
 0x125   : > { %2350 = vmatprep.subr.bf16.mxu1 %v2708_v2 }
 0x127   : > { %v659_v63 = vpop.f32.mrb[24].mxu0 }
 0x128   : > { %v2336_v0 = vpop.f32.mrb[25].mxu0 }
 0x129   : > { %v662_v4 = vpop.f32.mrb[26].mxu0 }
 0x12a   : > { %v672_v5 = vpack.c.bf16 %v662_v4, %v659_v63  ;;  %v2337_v6 = vpop.f32.mrb[27].mxu0 }
 0x12c   : > { %2351 = vmatpush3.bf16.msra.mxu1 %v672_v5 }
 0x12d   : > { %2416 = vmatprep.subr.bf16.mxu1 %v2708_v2 }
 0x12f   : > { %2353 = vmatmul.mubr.msk.bf16.vlgmr.msra.gmra.mrb[0].mxu1 %vm555_vm1, %v2891_v7 }
 0x130   : > { %2356 = vmatprep.mubr.msk.bf16.mxu1 %vm2709_vm0, %v2708_v2 }
 0x137   : > { %2357 = vmatmul.mubr.msk.bf16.gmra.mrb[4].mxu1 %vm555_vm1, %v2900_v10 }
 0x138   : > { %2360 = vmatprep.mubr.msk.bf16.mxu1 %vm2709_vm0, %v2708_v2 }
 0x13f   : > { %2361 = vmatmul.mubr.msk.bf16.gmra.mrb[8].mxu1 %vm555_vm1, %v2908_v13 }
 0x140   : > { %2364 = vmatprep.mubr.msk.bf16.mxu1 %vm2709_vm0, %v2708_v2 }
 0x147   : > { %2365 = vmatmul.mubr.msk.bf16.gmra.mrb[12].mxu1 %vm555_vm1, %v2916_v16 }
 0x148   : > { %2368 = vmatprep.mubr.msk.bf16.mxu1 %vm2709_vm0, %v2708_v2 }
 0x14f   : > { %2369 = vmatmul.mubr.msk.bf16.gmra.mrb[16].mxu1 %vm555_vm1, %v2924_v19 }
 0x150   : > { %2372 = vmatprep.mubr.msk.bf16.mxu1 %vm2709_vm0, %v2708_v2 }
 0x157   : > { %2373 = vmatmul.mubr.msk.bf16.gmra.mrb[20].mxu1 %vm555_vm1, %v2932_v22 }
 0x158   : > { %2376 = vmatprep.mubr.msk.bf16.mxu1 %vm2709_vm0, %v2708_v2 }
 0x15f   : > { %2377 = vmatmul.mubr.msk.bf16.gmra.mrb[24].mxu1 %vm555_vm1, %v2940_v25 }
 0x160   : > { %2430 = vmatprep.mubr.msk.bf16.mxu1 %vm2709_vm0, %v2708_v2 }
 0x202   : > { %v735_v28 = vpop.f32.mrb[0].mxu1 }
 0x203   : > { %v736_v29 = vadd.f32 %v2953_v27, %v735_v28  ;;  %v2354_v30 = vpop.f32.mrb[1].mxu1 }
 0x204   : > { %v738_v31 = vpop.f32.mrb[2].mxu1 }
 0x205   : > { %v739_v32 = vadd.f32 %v2953_v27, %v738_v31  ;;  %v2355_v33 = vpop.f32.mrb[3].mxu1  ;;  %v790_v34 = vmax.f32 %v736_v29, 0.0 }
 0x207   : > { %v791_v35 = vmax.f32 %v739_v32, 0.0 }
 0x209   : > { %v804_v36 = vpack.c.bf16 %v791_v35, %v790_v34 }
 0x20a   : > { %v743_v37 = vpop.f32.mrb[4].mxu1 }
 0x20b   : > { %v744_v38 = vadd.f32 %v2953_v27, %v743_v37  ;;  %v2358_v39 = vpop.f32.mrb[5].mxu1  ;;  %2389 = vmatmul.mubr.msk.bf16.vlgmr.msra.gmra.mrb[28].mxu0 %vm843_vm2, %v804_v36  ;;  %v2694_v36 = vld [vmem:[%s3558_s7] sm:$0xff]   ;;  %v2695_v37 = vld [vmem:[%s3558_s7 + $0x8] ss:$0 sps:$4 sm:$0x33]  }
 0x20c   : > { %v746_v40 = vpop.f32.mrb[6].mxu1  ;;  %2392 = vmatprep.mubr.msk.bf16.mxu0 %vm2709_vm0, %v2708_v2  ;;  %2459 = vmatpush3.bf16.msra.mxu0 %v2694_v36 }
 0x20d   : > { %v747_v41 = vadd.f32 %v2953_v27, %v746_v40  ;;  %v2359_v42 = vpop.f32.mrb[7].mxu1  ;;  %v792_v43 = vmax.f32 %v744_v38, 0.0  ;;  %2460 = vmatprep.subr.bf16.mxu0 %v2708_v2 }
 0x20f   : > { %v793_v44 = vmax.f32 %v747_v41, 0.0 }
 0x211   : > { %v805_v45 = vpack.c.bf16 %v793_v44, %v792_v43 }
 0x212   : > { %v751_v46 = vpop.f32.mrb[8].mxu1 }
 0x213   : > { %v752_v47 = vadd.f32 %v2953_v27, %v751_v46  ;;  %v2362_v48 = vpop.f32.mrb[9].mxu1  ;;  %2393 = vmatmul.mubr.msk.bf16.gmra.mrb[32].mxu0 %vm843_vm2, %v805_v45 }
 0x214   : > { %v754_v49 = vpop.f32.mrb[10].mxu1  ;;  %2396 = vmatprep.mubr.msk.bf16.mxu0 %vm2709_vm0, %v2708_v2 }
 0x215   : > { %v755_v50 = vadd.f32 %v2953_v27, %v754_v49  ;;  %v2363_v51 = vpop.f32.mrb[11].mxu1  ;;  %v794_v52 = vmax.f32 %v752_v47, 0.0 }
 0x217   : > { %v795_v53 = vmax.f32 %v755_v50, 0.0 }
 0x219   : > { %v806_v54 = vpack.c.bf16 %v795_v53, %v794_v52 }
 0x21a   : > { %v759_v55 = vpop.f32.mrb[12].mxu1 }
 0x21b   : > { %v760_v56 = vadd.f32 %v2953_v27, %v759_v55  ;;  %v2366_v57 = vpop.f32.mrb[13].mxu1  ;;  %2397 = vmatmul.mubr.msk.bf16.gmra.mrb[36].mxu0 %vm843_vm2, %v806_v54 }
 0x21c   : > { %v762_v58 = vpop.f32.mrb[14].mxu1  ;;  %2400 = vmatprep.mubr.msk.bf16.mxu0 %vm2709_vm0, %v2708_v2 }
 0x21d   : > { %v763_v59 = vadd.f32 %v2953_v27, %v762_v58  ;;  %v2367_v60 = vpop.f32.mrb[15].mxu1  ;;  %v796_v61 = vmax.f32 %v760_v56, 0.0 }
 0x21f   : > { %v797_v62 = vmax.f32 %v763_v59, 0.0 }
 0x221   : > { %v807_v63 = vpack.c.bf16 %v797_v62, %v796_v61 }
 0x222   : > { %v767_v0 = vpop.f32.mrb[16].mxu1 }
 0x223   : > { %v768_v1 = vadd.f32 %v2953_v27, %v767_v0  ;;  %v2370_v3 = vpop.f32.mrb[17].mxu1  ;;  %2401 = vmatmul.mubr.msk.bf16.gmra.mrb[40].mxu0 %vm843_vm2, %v807_v63 }
 0x224   : > { %v770_v4 = vpop.f32.mrb[18].mxu1  ;;  %2404 = vmatprep.mubr.msk.bf16.mxu0 %vm2709_vm0, %v2708_v2 }
 0x225   : > { %v771_v5 = vadd.f32 %v2953_v27, %v770_v4  ;;  %v2371_v6 = vpop.f32.mrb[19].mxu1  ;;  %v798_v8 = vmax.f32 %v768_v1, 0.0 }
 0x227   : > { %v799_v9 = vmax.f32 %v771_v5, 0.0 }
 0x229   : > { %v808_v11 = vpack.c.bf16 %v799_v9, %v798_v8 }
 0x22a   : > { %v775_v12 = vpop.f32.mrb[20].mxu1 }
 0x22b   : > { %v776_v14 = vadd.f32 %v2953_v27, %v775_v12  ;;  %v2374_v15 = vpop.f32.mrb[21].mxu1  ;;  %2405 = vmatmul.mubr.msk.bf16.gmra.mrb[44].mxu0 %vm843_vm2, %v808_v11  ;;  %v3037_v12 = vld [vmem:[%s3557_s6] ss:$0 sm:$0xff] }
 0x22c   : > { %v778_v17 = vpop.f32.mrb[22].mxu1  ;;  %2408 = vmatprep.mubr.msk.bf16.mxu0 %vm2709_vm0, %v2708_v2 }
 0x22d   : > { %v779_v18 = vadd.f32 %v2953_v27, %v778_v17  ;;  %v2375_v20 = vpop.f32.mrb[23].mxu1  ;;  %v800_v21 = vmax.f32 %v776_v14, 0.0 }
 0x22f   : > { %v801_v23 = vmax.f32 %v779_v18, 0.0 }
 0x231   : > { %v809_v24 = vpack.c.bf16 %v801_v23, %v800_v21 }
 0x232   : > { %v783_v26 = vpop.f32.mrb[24].mxu1 }
 0x233   : > { %v784_v28 = vadd.f32 %v2953_v27, %v783_v26  ;;  %v2378_v29 = vpop.f32.mrb[25].mxu1  ;;  %2409 = vmatmul.mubr.msk.bf16.gmra.mrb[48].mxu0 %vm843_vm2, %v809_v24 }
 0x234   : > { %v786_v30 = vpop.f32.mrb[26].mxu1  ;;  %2412 = vmatprep.mubr.msk.bf16.mxu0 %vm2709_vm0, %v2708_v2 }
 0x235   : > { %v787_v31 = vadd.f32 %v2953_v27, %v786_v30  ;;  %v2379_v32 = vpop.f32.mrb[27].mxu1  ;;  %v802_v33 = vmax.f32 %v784_v28, 0.0  ;;  %v1114_v27 = vsel %vm1112_vm3, %v2695_v37, 0 }
 0x236   : > { %2461 = vmatpush3.bf16.msra.mxu0 %v1114_v27 }
 0x237   : > { %v803_v34 = vmax.f32 %v787_v31, 0.0  ;;  %2532 = vmatprep.subr.bf16.mxu0 %v2708_v2 }
 0x239   : > { %v810_v35 = vpack.c.bf16 %v803_v34, %v802_v33 }
 0x23b   : > { %2413 = vmatmul.mubr.msk.bf16.gmra.mrb[52].mxu0 %vm843_vm2, %v810_v35 }
 0x23c   : > { %2462 = vmatprep.mubr.msk.bf16.mxu0 %vm2709_vm0, %v2708_v2 }
 0x2de   : > { %v899_v38 = vpop.f32.mrb[28].mxu0 }
 0x2df   : > { %v2390_v39 = vpop.f32.mrb[29].mxu0 }
 0x2e0   : > { %v902_v40 = vpop.f32.mrb[30].mxu0 }
 0x2e1   : > { %v954_v41 = vpack.c.bf16 %v902_v40, %v899_v38  ;;  %v2391_v42 = vpop.f32.mrb[31].mxu0 }
 0x2e3   : > { %2417 = vmatpush3.bf16.msra.mxu1 %v954_v41 }
 0x2e4   : > { %2418 = vmatprep.subr.bf16.mxu1 %v2708_v2 }
 0x2e6   : > { %v907_v43 = vpop.f32.mrb[32].mxu0 }
 0x2e7   : > { %v2394_v44 = vpop.f32.mrb[33].mxu0 }
 0x2e8   : > { %v910_v45 = vpop.f32.mrb[34].mxu0 }
 0x2e9   : > { %v955_v46 = vpack.c.bf16 %v910_v45, %v907_v43  ;;  %v2395_v47 = vpop.f32.mrb[35].mxu0 }
 0x2eb   : > { %2419 = vmatpush3.bf16.msra.mxu1 %v955_v46 }
 0x2ec   : > { %2420 = vmatprep.subr.bf16.mxu1 %v2708_v2 }
 0x2ee   : > { %v915_v48 = vpop.f32.mrb[36].mxu0 }
 0x2ef   : > { %v2398_v49 = vpop.f32.mrb[37].mxu0 }
 0x2f0   : > { %v918_v50 = vpop.f32.mrb[38].mxu0 }
 0x2f1   : > { %v956_v51 = vpack.c.bf16 %v918_v50, %v915_v48  ;;  %v2399_v52 = vpop.f32.mrb[39].mxu0 }
 0x2f3   : > { %2421 = vmatpush3.bf16.msra.mxu1 %v956_v51 }
 0x2f4   : > { %2422 = vmatprep.subr.bf16.mxu1 %v2708_v2 }
 0x2f6   : > { %v923_v53 = vpop.f32.mrb[40].mxu0 }
 0x2f7   : > { %v2402_v54 = vpop.f32.mrb[41].mxu0 }
 0x2f8   : > { %v926_v55 = vpop.f32.mrb[42].mxu0 }
 0x2f9   : > { %v957_v56 = vpack.c.bf16 %v926_v55, %v923_v53  ;;  %v2403_v57 = vpop.f32.mrb[43].mxu0 }
 0x2fb   : > { %2423 = vmatpush3.bf16.msra.mxu1 %v957_v56 }
 0x2fc   : > { %2424 = vmatprep.subr.bf16.mxu1 %v2708_v2 }
 0x2fe   : > { %v931_v58 = vpop.f32.mrb[44].mxu0 }
 0x2ff   : > { %v2406_v59 = vpop.f32.mrb[45].mxu0 }
 0x300   : > { %v934_v60 = vpop.f32.mrb[46].mxu0 }
 0x301   : > { %v958_v61 = vpack.c.bf16 %v934_v60, %v931_v58  ;;  %v2407_v62 = vpop.f32.mrb[47].mxu0 }
 0x303   : > { %2425 = vmatpush3.bf16.msra.mxu1 %v958_v61 }
 0x304   : > { %2426 = vmatprep.subr.bf16.mxu1 %v2708_v2 }
 0x306   : > { %v939_v63 = vpop.f32.mrb[48].mxu0 }
 0x307   : > { %v2410_v0 = vpop.f32.mrb[49].mxu0 }
 0x308   : > { %v942_v1 = vpop.f32.mrb[50].mxu0 }
 0x309   : > { %v959_v3 = vpack.c.bf16 %v942_v1, %v939_v63  ;;  %v2411_v4 = vpop.f32.mrb[51].mxu0 }
 0x30b   : > { %2427 = vmatpush3.bf16.msra.mxu1 %v959_v3 }
 0x30c   : > { %2428 = vmatprep.subr.bf16.mxu1 %v2708_v2 }
 0x30e   : > { %v947_v5 = vpop.f32.mrb[52].mxu0 }
 0x30f   : > { %v2414_v6 = vpop.f32.mrb[53].mxu0 }
 0x310   : > { %v950_v8 = vpop.f32.mrb[54].mxu0 }
 0x311   : > { %v960_v9 = vpack.c.bf16 %v950_v8, %v947_v5  ;;  %v2415_v11 = vpop.f32.mrb[55].mxu0 }
 0x313   : > { %2429 = vmatpush3.bf16.msra.mxu1 %v960_v9 }
 0x314   : > { %2490 = vmatprep.subr.bf16.mxu1 %v2708_v2 }
 0x316   : > { %2431 = vmatmul.mubr.msk.bf16.vlgmr.msra.gmra.mrb[28].mxu1 %vm555_vm1, %v2891_v7 }
 0x317   : > { %2434 = vmatprep.mubr.msk.bf16.mxu1 %vm2709_vm0, %v2708_v2 }
 0x31e   : > { %2435 = vmatmul.mubr.msk.bf16.gmra.mrb[32].mxu1 %vm555_vm1, %v2900_v10 }
 0x31f   : > { %2438 = vmatprep.mubr.msk.bf16.mxu1 %vm2709_vm0, %v2708_v2 }
 0x326   : > { %2439 = vmatmul.mubr.msk.bf16.gmra.mrb[36].mxu1 %vm555_vm1, %v2908_v13 }
 0x327   : > { %2442 = vmatprep.mubr.msk.bf16.mxu1 %vm2709_vm0, %v2708_v2 }
 0x32e   : > { %2443 = vmatmul.mubr.msk.bf16.gmra.mrb[40].mxu1 %vm555_vm1, %v2916_v16 }
 0x32f   : > { %2446 = vmatprep.mubr.msk.bf16.mxu1 %vm2709_vm0, %v2708_v2 }
 0x336   : > { %2447 = vmatmul.mubr.msk.bf16.gmra.mrb[44].mxu1 %vm555_vm1, %v2924_v19 }
 0x337   : > { %2450 = vmatprep.mubr.msk.bf16.mxu1 %vm2709_vm0, %v2708_v2 }
 0x33e   : > { %2451 = vmatmul.mubr.msk.bf16.gmra.mrb[48].mxu1 %vm555_vm1, %v2932_v22 }
 0x33f   : > { %2454 = vmatprep.mubr.msk.bf16.mxu1 %vm2709_vm0, %v2708_v2 }
 0x346   : > { %2455 = vmatmul.mubr.msk.bf16.gmra.mrb[52].mxu1 %vm555_vm1, %v2940_v25 }
 0x347   : > { %2504 = vmatprep.mubr.msk.bf16.mxu1 %vm2709_vm0, %v2708_v2 }
 0x3e9   : > { %v1002_v14 = vpop.f32.mrb[28].mxu1 }
 0x3ea   : > { %v1003_v15 = vadd.f32 %v3037_v12, %v1002_v14  ;;  %v2432_v17 = vpop.f32.mrb[29].mxu1 }
 0x3eb   : > { %v1005_v18 = vpop.f32.mrb[30].mxu1 }
 0x3ec   : > { %v1057_v20 = vmax.f32 %v1003_v15, 0.0  ;;  %v1006_v21 = vadd.f32 %v3037_v12, %v1005_v18  ;;  %v2433_v23 = vpop.f32.mrb[31].mxu1 }
 0x3ee   : > { %1799 = vst.msk [vmem:[%s3044_s28] sm:$0xff] %vm1090_vm4, %v1057_v20  ;;  %v1058_v24 = vmax.f32 %v1006_v21, 0.0 }
 0x3f0   : > { %v3049_v26 = vpack.c.bf16 %v1058_v24, %v1057_v20  ;;  %1800 = vst.msk [vmem:[%s3044_s28 + $0x8] sm:$0xff] %vm1090_vm4, %v1058_v24 }
 0x3f1   : > { %v1010_v28 = vpop.f32.mrb[32].mxu1 }
 0x3f2   : > { %v1011_v29 = vadd.f32 %v3037_v12, %v1010_v28  ;;  %v2436_v30 = vpop.f32.mrb[33].mxu1  ;;  %2463 = vmatmul.mubr.msk.bf16.vlgmr.msra.gmra.mrb[56].mxu0 %vm1090_vm4, %v3049_v26 }
 0x3f3   : > { %v1013_v31 = vpop.f32.mrb[34].mxu1  ;;  %2466 = vmatprep.mubr.msk.bf16.mxu0 %vm2709_vm0, %v2708_v2 }
 0x3f4   : > { %v1059_v32 = vmax.f32 %v1011_v29, 0.0  ;;  %v1014_v33 = vadd.f32 %v3037_v12, %v1013_v31  ;;  %v2437_v34 = vpop.f32.mrb[35].mxu1 }
 0x3f6   : > { %1801 = vst.msk [vmem:[%s3044_s28 + $0x10] sm:$0xff] %vm1090_vm4, %v1059_v32  ;;  %v1060_v35 = vmax.f32 %v1014_v33, 0.0 }
 0x3f8   : > { %v3061_v36 = vpack.c.bf16 %v1060_v35, %v1059_v32  ;;  %1802 = vst.msk [vmem:[%s3044_s28 + $0x18] sm:$0xff] %vm1090_vm4, %v1060_v35 }
 0x3f9   : > { %v1018_v37 = vpop.f32.mrb[36].mxu1 }
 0x3fa   : > { %v1019_v27 = vadd.f32 %v3037_v12, %v1018_v37  ;;  %v2440_v38 = vpop.f32.mrb[37].mxu1  ;;  %2467 = vmatmul.mubr.msk.bf16.gmra.mrb[60].mxu0 %vm1090_vm4, %v3061_v36 }
 0x3fb   : > { %v1021_v39 = vpop.f32.mrb[38].mxu1  ;;  %2470 = vmatprep.mubr.msk.bf16.mxu0 %vm2709_vm0, %v2708_v2 }
 0x3fc   : > { %v1061_v40 = vmax.f32 %v1019_v27, 0.0  ;;  %v1022_v41 = vadd.f32 %v3037_v12, %v1021_v39  ;;  %v2441_v42 = vpop.f32.mrb[39].mxu1 }
 0x3fe   : > { %1803 = vst.msk [vmem:[%s3044_s28 + $0x20] sm:$0xff] %vm1090_vm4, %v1061_v40  ;;  %v1062_v43 = vmax.f32 %v1022_v41, 0.0 }
 0x400   : > { %v3073_v44 = vpack.c.bf16 %v1062_v43, %v1061_v40  ;;  %1804 = vst.msk [vmem:[%s3044_s28 + $0x28] sm:$0xff] %vm1090_vm4, %v1062_v43 }
 0x401   : > { %v1026_v45 = vpop.f32.mrb[40].mxu1 }
 0x402   : > { %v1027_v46 = vadd.f32 %v3037_v12, %v1026_v45  ;;  %v2444_v47 = vpop.f32.mrb[41].mxu1  ;;  %2471 = vmatmul.mubr.msk.bf16.gmra.mrb[64].mxu0 %vm1090_vm4, %v3073_v44 }
 0x403   : > { %v1029_v48 = vpop.f32.mrb[42].mxu1  ;;  %2474 = vmatprep.mubr.msk.bf16.mxu0 %vm2709_vm0, %v2708_v2 }
 0x404   : > { %v1063_v49 = vmax.f32 %v1027_v46, 0.0  ;;  %v1030_v50 = vadd.f32 %v3037_v12, %v1029_v48  ;;  %v2445_v51 = vpop.f32.mrb[43].mxu1 }
 0x406   : > { %1805 = vst.msk [vmem:[%s3044_s28 + $0x30] sm:$0xff] %vm1090_vm4, %v1063_v49  ;;  %v1064_v52 = vmax.f32 %v1030_v50, 0.0  ;;  %v2699_v50 = vld [vmem:[%s3560_s9 + $0x8] ss:$0 sps:$4 sm:$0x33]  }
 0x408   : > { %v3085_v53 = vpack.c.bf16 %v1064_v52, %v1063_v49  ;;  %1806 = vst.msk [vmem:[%s3044_s28 + $0x38] sm:$0xff] %vm1090_vm4, %v1064_v52  ;;  %v2698_v49 = vld [vmem:[%s3560_s9] sm:$0xff]  }
 0x409   : > { %v1034_v54 = vpop.f32.mrb[44].mxu1  ;;  %2533 = vmatpush3.bf16.msra.mxu0 %v2698_v49 }
 0x40a   : > { %v1035_v55 = vadd.f32 %v3037_v12, %v1034_v54  ;;  %v2448_v56 = vpop.f32.mrb[45].mxu1  ;;  %2475 = vmatmul.mubr.msk.bf16.gmra.mrb[68].mxu0 %vm1090_vm4, %v3085_v53  ;;  %2534 = vmatprep.subr.bf16.mxu0 %v2708_v2 }
 0x40b   : > { %v1037_v57 = vpop.f32.mrb[46].mxu1  ;;  %2478 = vmatprep.mubr.msk.bf16.mxu0 %vm2709_vm0, %v2708_v2  ;;  %v1356_v56 = vsel %vm1112_vm3, %v2699_v50, 0 }
 0x40c   : > { %v1065_v58 = vmax.f32 %v1035_v55, 0.0  ;;  %v1038_v59 = vadd.f32 %v3037_v12, %v1037_v57  ;;  %v2449_v60 = vpop.f32.mrb[47].mxu1 }
 0x40d   : > { %2535 = vmatpush3.bf16.msra.mxu0 %v1356_v56 }
 0x40e   : > { %1807 = vst.msk [vmem:[%s3044_s28 + $0x40] sm:$0xff] %vm1090_vm4, %v1065_v58  ;;  %v1066_v61 = vmax.f32 %v1038_v59, 0.0  ;;  %2596 = vmatprep.subr.bf16.mxu0 %v2708_v2 }
 0x410   : > { %v3097_v62 = vpack.c.bf16 %v1066_v61, %v1065_v58  ;;  %1808 = vst.msk [vmem:[%s3044_s28 + $0x48] sm:$0xff] %vm1090_vm4, %v1066_v61 }
 0x411   : > { %v1042_v63 = vpop.f32.mrb[48].mxu1 }
 0x412   : > { %v1043_v0 = vadd.f32 %v3037_v12, %v1042_v63  ;;  %v2452_v1 = vpop.f32.mrb[49].mxu1  ;;  %2479 = vmatmul.mubr.msk.bf16.gmra.mrb[72].mxu0 %vm1090_vm4, %v3097_v62 }
 0x413   : > { %v1045_v3 = vpop.f32.mrb[50].mxu1  ;;  %2482 = vmatprep.mubr.msk.bf16.mxu0 %vm2709_vm0, %v2708_v2 }
 0x414   : > { %v1067_v4 = vmax.f32 %v1043_v0, 0.0  ;;  %v1046_v5 = vadd.f32 %v3037_v12, %v1045_v3  ;;  %v2453_v6 = vpop.f32.mrb[51].mxu1 }
 0x415   : > { %v2697_v6 = vld [vmem:[%s3561_s10 + $0x8] ss:$0 sps:$4 sm:$0x33]  }
 0x416   : > { %1809 = vst.msk [vmem:[%s3044_s28 + $0x50] sm:$0xff] %vm1090_vm4, %v1067_v4  ;;  %v1068_v8 = vmax.f32 %v1046_v5, 0.0  ;;  %v2696_v5 = vld [vmem:[%s3561_s10] sm:$0xff]  }
 0x418   : > { %v3109_v9 = vpack.c.bf16 %v1068_v8, %v1067_v4  ;;  %1810 = vst.msk [vmem:[%s3044_s28 + $0x58] sm:$0xff] %vm1090_vm4, %v1068_v8  ;;  %v1460_v8 = vsel %vm1112_vm3, %v2697_v6, 0 }
 0x419   : > { %v1050_v11 = vpop.f32.mrb[52].mxu1 }
 0x41a   : > { %v1051_v14 = vadd.f32 %v3037_v12, %v1050_v11  ;;  %v2456_v15 = vpop.f32.mrb[53].mxu1  ;;  %2483 = vmatmul.mubr.msk.bf16.gmra.mrb[76].mxu0 %vm1090_vm4, %v3109_v9 }
 0x41b   : > { %v1053_v17 = vpop.f32.mrb[54].mxu1  ;;  %2486 = vmatprep.mubr.msk.bf16.mxu0 %vm2709_vm0, %v2708_v2 }
 0x41c   : > { %v1069_v18 = vmax.f32 %v1051_v14, 0.0  ;;  %v1054_v20 = vadd.f32 %v3037_v12, %v1053_v17  ;;  %v2457_v21 = vpop.f32.mrb[55].mxu1 }
 0x41e   : > { %1811 = vst.msk [vmem:[%s3044_s28 + $0x60] sm:$0xff] %vm1090_vm4, %v1069_v18  ;;  %v1070_v23 = vmax.f32 %v1054_v20, 0.0 }
 0x420   : > { %v3121_v24 = vpack.c.bf16 %v1070_v23, %v1069_v18  ;;  %1812 = vst.msk [vmem:[%s3044_s28 + $0x68] sm:$0xff] %vm1090_vm4, %v1070_v23 }
 0x422   : > { %2487 = vmatmul.mubr.msk.bf16.gmra.mrb[80].mxu0 %vm1090_vm4, %v3121_v24 }
 0x423   : > { %2536 = vmatprep.mubr.msk.bf16.mxu0 %vm2709_vm0, %v2708_v2 }
 0x4c5   : > { %v1150_v28 = vpop.f32.mrb[56].mxu0 }
 0x4c6   : > { %v2464_v29 = vpop.f32.mrb[57].mxu0 }
 0x4c7   : > { %v1153_v30 = vpop.f32.mrb[58].mxu0 }
 0x4c8   : > { %v1205_v31 = vpack.c.bf16 %v1153_v30, %v1150_v28  ;;  %v2465_v32 = vpop.f32.mrb[59].mxu0 }
 0x4ca   : > { %2491 = vmatpush3.bf16.msra.mxu1 %v1205_v31 }
 0x4cb   : > { %2492 = vmatprep.subr.bf16.mxu1 %v2708_v2 }
 0x4cd   : > { %v1158_v12 = vpop.f32.mrb[60].mxu0 }
 0x4ce   : > { %v2468_v33 = vpop.f32.mrb[61].mxu0 }
 0x4cf   : > { %v1161_v34 = vpop.f32.mrb[62].mxu0 }
 0x4d0   : > { %v1206_v35 = vpack.c.bf16 %v1161_v34, %v1158_v12  ;;  %v2469_v37 = vpop.f32.mrb[63].mxu0 }
 0x4d2   : > { %2493 = vmatpush3.bf16.msra.mxu1 %v1206_v35 }
 0x4d3   : > { %2494 = vmatprep.subr.bf16.mxu1 %v2708_v2 }
 0x4d5   : > { %v1166_v27 = vpop.f32.mrb[64].mxu0 }
 0x4d6   : > { %v2472_v38 = vpop.f32.mrb[65].mxu0 }
 0x4d7   : > { %v1169_v39 = vpop.f32.mrb[66].mxu0 }
 0x4d8   : > { %v1207_v40 = vpack.c.bf16 %v1169_v39, %v1166_v27  ;;  %v2473_v41 = vpop.f32.mrb[67].mxu0 }
 0x4da   : > { %2495 = vmatpush3.bf16.msra.mxu1 %v1207_v40 }
 0x4db   : > { %2496 = vmatprep.subr.bf16.mxu1 %v2708_v2 }
 0x4dd   : > { %v1174_v42 = vpop.f32.mrb[68].mxu0 }
 0x4de   : > { %v2476_v43 = vpop.f32.mrb[69].mxu0 }
 0x4df   : > { %v1177_v45 = vpop.f32.mrb[70].mxu0 }
 0x4e0   : > { %v1208_v46 = vpack.c.bf16 %v1177_v45, %v1174_v42  ;;  %v2477_v47 = vpop.f32.mrb[71].mxu0 }
 0x4e2   : > { %2497 = vmatpush3.bf16.msra.mxu1 %v1208_v46 }
 0x4e3   : > { %2498 = vmatprep.subr.bf16.mxu1 %v2708_v2 }
 0x4e5   : > { %v1182_v48 = vpop.f32.mrb[72].mxu0 }
 0x4e6   : > { %v2480_v51 = vpop.f32.mrb[73].mxu0 }
 0x4e7   : > { %v1185_v52 = vpop.f32.mrb[74].mxu0 }
 0x4e8   : > { %v1209_v54 = vpack.c.bf16 %v1185_v52, %v1182_v48  ;;  %v2481_v55 = vpop.f32.mrb[75].mxu0 }
 0x4ea   : > { %2499 = vmatpush3.bf16.msra.mxu1 %v1209_v54 }
 0x4eb   : > { %2500 = vmatprep.subr.bf16.mxu1 %v2708_v2 }
 0x4ed   : > { %v1190_v57 = vpop.f32.mrb[76].mxu0 }
 0x4ee   : > { %v2484_v58 = vpop.f32.mrb[77].mxu0 }
 0x4ef   : > { %v1193_v59 = vpop.f32.mrb[78].mxu0  ;;  %v1551_v58 = vld [vmem:[%s3291_s25] sm:$0xff] }
 0x4f0   : > { %v1210_v60 = vpack.c.bf16 %v1193_v59, %v1190_v57  ;;  %v2485_v61 = vpop.f32.mrb[79].mxu0  ;;  %v1552_v59 = vld [vmem:[%s3291_s25 + $0x8] sm:$0xff] }
 0x4f2   : > { %2501 = vmatpush3.bf16.msra.mxu1 %v1210_v60 }
 0x4f3   : > { %2502 = vmatprep.subr.bf16.mxu1 %v2708_v2 }
 0x4f5   : > { %v1198_v63 = vpop.f32.mrb[80].mxu0 }
 0x4f6   : > { %v2488_v0 = vpop.f32.mrb[81].mxu0 }
 0x4f7   : > { %v1201_v1 = vpop.f32.mrb[82].mxu0  ;;  %v1565_v0 = vpack.c.bf16 %v1552_v59, %v1551_v58 }
 0x4f8   : > { %v1211_v3 = vpack.c.bf16 %v1201_v1, %v1198_v63  ;;  %v2489_v4 = vpop.f32.mrb[83].mxu0 }
 0x4f9   : > { %v1554_v4 = vld [vmem:[%s3291_s25 + $0x18] sm:$0xff] }
 0x4fa   : > { %2503 = vmatpush3.bf16.msra.mxu1 %v1211_v3  ;;  %v1553_v3 = vld [vmem:[%s3291_s25 + $0x10] sm:$0xff] }
 0x4fb   : > { %2564 = vmatprep.subr.bf16.mxu1 %v2708_v2 }
 0x4fd   : > { %2505 = vmatmul.mubr.msk.bf16.vlgmr.msra.gmra.mrb[56].mxu1 %vm555_vm1, %v2891_v7  ;;  %v3214_v7 = vld [vmem:[%s3559_s8] ss:$0 sm:$0xff] }
 0x4fe   : > { %2508 = vmatprep.mubr.msk.bf16.mxu1 %vm2709_vm0, %v2708_v2  ;;  %2565 = vmatpush3.bf16.msra.mxu1 %v2696_v5 }
 0x4ff   : > { %2566 = vmatprep.subr.bf16.mxu1 %v2708_v2 }
 0x502   : > { %2567 = vmatpush3.bf16.msra.mxu1 %v1460_v8 }
 0x503   : > { %2638 = vmatprep.subr.bf16.mxu1 %v2708_v2 }
 0x505   : > { %2509 = vmatmul.mubr.msk.bf16.gmra.mrb[60].mxu1 %vm555_vm1, %v2900_v10 }
 0x506   : > { %2512 = vmatprep.mubr.msk.bf16.mxu1 %vm2709_vm0, %v2708_v2 }
 0x50d   : > { %2513 = vmatmul.mubr.msk.bf16.gmra.mrb[64].mxu1 %vm555_vm1, %v2908_v13 }
 0x50e   : > { %2516 = vmatprep.mubr.msk.bf16.mxu1 %vm2709_vm0, %v2708_v2 }
 0x515   : > { %2517 = vmatmul.mubr.msk.bf16.gmra.mrb[68].mxu1 %vm555_vm1, %v2916_v16 }
 0x516   : > { %2520 = vmatprep.mubr.msk.bf16.mxu1 %vm2709_vm0, %v2708_v2 }
 0x51d   : > { %2521 = vmatmul.mubr.msk.bf16.gmra.mrb[72].mxu1 %vm555_vm1, %v2924_v19 }
 0x51e   : > { %2524 = vmatprep.mubr.msk.bf16.mxu1 %vm2709_vm0, %v2708_v2 }
 0x525   : > { %2525 = vmatmul.mubr.msk.bf16.gmra.mrb[76].mxu1 %vm555_vm1, %v2932_v22 }
 0x526   : > { %2528 = vmatprep.mubr.msk.bf16.mxu1 %vm2709_vm0, %v2708_v2 }
 0x52d   : > { %2529 = vmatmul.mubr.msk.bf16.gmra.mrb[80].mxu1 %vm555_vm1, %v2940_v25 }
 0x52e   : > { %2568 = vmatprep.mubr.msk.bf16.mxu1 %vm2709_vm0, %v2708_v2 }
 0x535   : > { %2569 = vmatmul.mubr.msk.bf16.vlgmr.msra.gmra.mrb[84].mxu1 %vm1090_vm4, %v3049_v26 }
 0x536   : > { %2572 = vmatprep.mubr.msk.bf16.mxu1 %vm2709_vm0, %v2708_v2  ;;  %2639 = vmatpush3.bf16.msra.mxu1 %v2696_v5 }
 0x537   : > { %2640 = vmatprep.subr.bf16.mxu1 %v2708_v2 }
 0x53a   : > { %2641 = vmatpush3.bf16.msra.mxu1 %v1460_v8 }
 0x53d   : > { %2573 = vmatmul.mubr.msk.bf16.gmra.mrb[88].mxu1 %vm1090_vm4, %v3061_v36 }
 0x53e   : > { %2576 = vmatprep.mubr.msk.bf16.mxu1 %vm2709_vm0, %v2708_v2 }
 0x545   : > { %2577 = vmatmul.mubr.msk.bf16.gmra.mrb[92].mxu1 %vm1090_vm4, %v3073_v44 }
 0x546   : > { %2580 = vmatprep.mubr.msk.bf16.mxu1 %vm2709_vm0, %v2708_v2 }
 0x54d   : > { %2581 = vmatmul.mubr.msk.bf16.gmra.mrb[96].mxu1 %vm1090_vm4, %v3085_v53 }
 0x54e   : > { %2584 = vmatprep.mubr.msk.bf16.mxu1 %vm2709_vm0, %v2708_v2 }
 0x555   : > { %2585 = vmatmul.mubr.msk.bf16.gmra.mrb[100].mxu1 %vm1090_vm4, %v3097_v62 }
 0x556   : > { %2588 = vmatprep.mubr.msk.bf16.mxu1 %vm2709_vm0, %v2708_v2 }
 0x55d   : > { %2589 = vmatmul.mubr.msk.bf16.gmra.mrb[104].mxu1 %vm1090_vm4, %v3109_v9 }
 0x55e   : > { %2592 = vmatprep.mubr.msk.bf16.mxu1 %vm2709_vm0, %v2708_v2 }
 0x565   : > { %2593 = vmatmul.mubr.msk.bf16.gmra.mrb[108].mxu1 %vm1090_vm4, %v3121_v24 }
 0x566   : > { %2642 = vmatprep.mubr.msk.bf16.mxu1 %vm2709_vm0, %v2708_v2 }
 0x5d0   : > { %v1253_v10 = vpop.f32.mrb[56].mxu1 }
 0x5d1   : > { %v1254_v13 = vadd.f32 %v3214_v7, %v1253_v10  ;;  %v2506_v16 = vpop.f32.mrb[57].mxu1 }
 0x5d2   : > { %v1256_v19 = vpop.f32.mrb[58].mxu1  ;;  %v1556_v16 = vld [vmem:[%s3291_s25 + $0x28] sm:$0xff] }
 0x5d3   : > { %v1257_v22 = vadd.f32 %v3214_v7, %v1256_v19  ;;  %v2507_v25 = vpop.f32.mrb[59].mxu1  ;;  %1814 = vst.msk [vmem:[%s3044_s28] sm:$0xff] %vm1813_vm5, %v1254_v13 }
 0x5d5   : > { %v1308_v11 = vpack.c.bf16 %v1257_v22, %v1254_v13  ;;  %1815 = vst.msk [vmem:[%s3044_s28 + $0x8] sm:$0xff] %vm1813_vm5, %v1257_v22  ;;  %v1555_v13 = vld [vmem:[%s3291_s25 + $0x20] sm:$0xff] }
 0x5d7   : > { %2537 = vmatmul.mubr.msk.bf16.vlgmr.msra.gmra.mrb[84].mxu0 %vm1090_vm4, %v1308_v11  ;;  %v1567_v11 = vpack.c.bf16 %v1556_v16, %v1555_v13 }
 0x5d8   : > { %2597 = vmatpush3.bf16.msra.mxu0 %v3049_v26  ;;  %v1261_v14 = vpop.f32.mrb[60].mxu1  ;;  %2540 = vmatprep.mubr.msk.bf16.mxu0 %vm2709_vm0, %v2708_v2 }
 0x5d9   : > { %v1262_v15 = vadd.f32 %v3214_v7, %v1261_v14  ;;  %v2510_v17 = vpop.f32.mrb[61].mxu1  ;;  %2598 = vmatprep.subr.bf16.mxu0 %v2708_v2 }
 0x5da   : > { %v1264_v18 = vpop.f32.mrb[62].mxu1  ;;  %v1558_v17 = vld [vmem:[%s3291_s25 + $0x38] sm:$0xff] }
 0x5db   : > { %v1265_v20 = vadd.f32 %v3214_v7, %v1264_v18  ;;  %v2511_v21 = vpop.f32.mrb[63].mxu1  ;;  %1816 = vst.msk [vmem:[%s3044_s28 + $0x10] sm:$0xff] %vm1813_vm5, %v1262_v15 }
 0x5dc   : > { %2599 = vmatpush3.bf16.msra.mxu0 %v3061_v36 }
 0x5dd   : > { %v1309_v23 = vpack.c.bf16 %v1265_v20, %v1262_v15  ;;  %2600 = vmatprep.subr.bf16.mxu0 %v2708_v2  ;;  %1817 = vst.msk [vmem:[%s3044_s28 + $0x18] sm:$0xff] %vm1813_vm5, %v1265_v20  ;;  %v1557_v15 = vld [vmem:[%s3291_s25 + $0x30] sm:$0xff] }
 0x5df   : > { %2541 = vmatmul.mubr.msk.bf16.gmra.mrb[88].mxu0 %vm1090_vm4, %v1309_v23  ;;  %v1568_v23 = vpack.c.bf16 %v1558_v17, %v1557_v15 }
 0x5e0   : > { %2601 = vmatpush3.bf16.msra.mxu0 %v3073_v44  ;;  %v1269_v26 = vpop.f32.mrb[64].mxu1  ;;  %2544 = vmatprep.mubr.msk.bf16.mxu0 %vm2709_vm0, %v2708_v2 }
 0x5e1   : > { %v1270_v28 = vadd.f32 %v3214_v7, %v1269_v26  ;;  %v2514_v29 = vpop.f32.mrb[65].mxu1  ;;  %2602 = vmatprep.subr.bf16.mxu0 %v2708_v2 }
 0x5e2   : > { %v1272_v36 = vpop.f32.mrb[66].mxu1  ;;  %v1560_v29 = vld [vmem:[%s3291_s25 + $0x48] sm:$0xff] }
 0x5e3   : > { %v1273_v30 = vadd.f32 %v3214_v7, %v1272_v36  ;;  %v2515_v31 = vpop.f32.mrb[67].mxu1  ;;  %1818 = vst.msk [vmem:[%s3044_s28 + $0x20] sm:$0xff] %vm1813_vm5, %v1270_v28 }
 0x5e4   : > { %2603 = vmatpush3.bf16.msra.mxu0 %v3085_v53 }
 0x5e5   : > { %v1310_v32 = vpack.c.bf16 %v1273_v30, %v1270_v28  ;;  %2604 = vmatprep.subr.bf16.mxu0 %v2708_v2  ;;  %1819 = vst.msk [vmem:[%s3044_s28 + $0x28] sm:$0xff] %vm1813_vm5, %v1273_v30  ;;  %v1559_v28 = vld [vmem:[%s3291_s25 + $0x40] sm:$0xff] }
 0x5e7   : > { %2545 = vmatmul.mubr.msk.bf16.gmra.mrb[92].mxu0 %vm1090_vm4, %v1310_v32  ;;  %v1569_v32 = vpack.c.bf16 %v1560_v29, %v1559_v28 }
 0x5e8   : > { %2605 = vmatpush3.bf16.msra.mxu0 %v3097_v62  ;;  %v1277_v44 = vpop.f32.mrb[68].mxu1  ;;  %2548 = vmatprep.mubr.msk.bf16.mxu0 %vm2709_vm0, %v2708_v2 }
 0x5e9   : > { %v1278_v12 = vadd.f32 %v3214_v7, %v1277_v44  ;;  %v2518_v33 = vpop.f32.mrb[69].mxu1  ;;  %2606 = vmatprep.subr.bf16.mxu0 %v2708_v2 }
 0x5ea   : > { %v1280_v53 = vpop.f32.mrb[70].mxu1  ;;  %v1562_v33 = vld [vmem:[%s3291_s25 + $0x58] sm:$0xff] }
 0x5eb   : > { %v1281_v34 = vadd.f32 %v3214_v7, %v1280_v53  ;;  %v2519_v35 = vpop.f32.mrb[71].mxu1  ;;  %1820 = vst.msk [vmem:[%s3044_s28 + $0x30] sm:$0xff] %vm1813_vm5, %v1278_v12 }
 0x5ec   : > { %2607 = vmatpush3.bf16.msra.mxu0 %v3109_v9 }
 0x5ed   : > { %v1311_v62 = vpack.c.bf16 %v1281_v34, %v1278_v12  ;;  %2608 = vmatprep.subr.bf16.mxu0 %v2708_v2  ;;  %1821 = vst.msk [vmem:[%s3044_s28 + $0x38] sm:$0xff] %vm1813_vm5, %v1281_v34  ;;  %v1561_v12 = vld [vmem:[%s3291_s25 + $0x50] sm:$0xff] }
 0x5ef   : > { %2549 = vmatmul.mubr.msk.bf16.gmra.mrb[96].mxu0 %vm1090_vm4, %v1311_v62  ;;  %v1570_v62 = vpack.c.bf16 %v1562_v33, %v1561_v12 }
 0x5f0   : > { %2609 = vmatpush3.bf16.msra.mxu0 %v3121_v24  ;;  %v1285_v37 = vpop.f32.mrb[72].mxu1  ;;  %2552 = vmatprep.mubr.msk.bf16.mxu0 %vm2709_vm0, %v2708_v2 }
 0x5f1   : > { %v1286_v27 = vadd.f32 %v3214_v7, %v1285_v37  ;;  %v2522_v38 = vpop.f32.mrb[73].mxu1 }
 0x5f2   : > { %v1288_v39 = vpop.f32.mrb[74].mxu1  ;;  %v1564_v38 = vld [vmem:[%s3291_s25 + $0x68] sm:$0xff] }
 0x5f3   : > { %v1289_v9 = vadd.f32 %v3214_v7, %v1288_v39  ;;  %v2523_v40 = vpop.f32.mrb[75].mxu1  ;;  %1822 = vst.msk [vmem:[%s3044_s28 + $0x40] sm:$0xff] %vm1813_vm5, %v1286_v27 }
 0x5f5   : > { %v1312_v41 = vpack.c.bf16 %v1289_v9, %v1286_v27  ;;  %1823 = vst.msk [vmem:[%s3044_s28 + $0x48] sm:$0xff] %vm1813_vm5, %v1289_v9  ;;  %v1563_v27 = vld [vmem:[%s3291_s25 + $0x60] sm:$0xff] }
 0x5f7   : > { %2553 = vmatmul.mubr.msk.bf16.gmra.mrb[100].mxu0 %vm1090_vm4, %v1312_v41  ;;  %v1571_v41 = vpack.c.bf16 %v1564_v38, %v1563_v27 }
 0x5f8   : > { %v1293_v24 = vpop.f32.mrb[76].mxu1  ;;  %2556 = vmatprep.mubr.msk.bf16.mxu0 %vm2709_vm0, %v2708_v2 }
 0x5f9   : > { %v1294_v42 = vadd.f32 %v3214_v7, %v1293_v24  ;;  %v2526_v43 = vpop.f32.mrb[77].mxu1  ;;  %v3359_v24 = vld [vmem:[#allocation2] ss:$0 sm:$0xff] }
 0x5fa   : > { %v1296_v45 = vpop.f32.mrb[78].mxu1 }
 0x5fb   : > { %v1297_v46 = vadd.f32 %v3214_v7, %v1296_v45  ;;  %v2527_v47 = vpop.f32.mrb[79].mxu1  ;;  %1824 = vst.msk [vmem:[%s3044_s28 + $0x50] sm:$0xff] %vm1813_vm5, %v1294_v42 }
 0x5fd   : > { %v1313_v48 = vpack.c.bf16 %v1297_v46, %v1294_v42  ;;  %1825 = vst.msk [vmem:[%s3044_s28 + $0x58] sm:$0xff] %vm1813_vm5, %v1297_v46 }
 0x5ff   : > { %2557 = vmatmul.mubr.msk.bf16.gmra.mrb[104].mxu0 %vm1090_vm4, %v1313_v48 }
 0x600   : > { %v1301_v49 = vpop.f32.mrb[80].mxu1  ;;  %2560 = vmatprep.mubr.msk.bf16.mxu0 %vm2709_vm0, %v2708_v2 }
 0x601   : > { %v1302_v50 = vadd.f32 %v3214_v7, %v1301_v49  ;;  %v2530_v51 = vpop.f32.mrb[81].mxu1 }
 0x602   : > { %v1304_v52 = vpop.f32.mrb[82].mxu1 }
 0x603   : > { %v1305_v54 = vadd.f32 %v3214_v7, %v1304_v52  ;;  %v2531_v55 = vpop.f32.mrb[83].mxu1  ;;  %1826 = vst.msk [vmem:[%s3044_s28 + $0x60] sm:$0xff] %vm1813_vm5, %v1302_v50  ;;  %v1566_v7 = vpack.c.bf16 %v1554_v4, %v1553_v3 }
 0x605   : > { %v1314_v56 = vpack.c.bf16 %v1305_v54, %v1302_v50  ;;  %1827 = vst.msk [vmem:[%s3044_s28 + $0x68] sm:$0xff] %vm1813_vm5, %v1305_v54 }
 0x607   : > { %2561 = vmatmul.mubr.msk.bf16.gmra.mrb[108].mxu0 %vm1090_vm4, %v1314_v56 }
 0x608   : > { %v3296_v57 = vpop.f32.mrb[84].mxu1  ;;  %2610 = vmatprep.mubr.msk.bf16.mxu0 %vm2709_vm0, %v2708_v2 }
 0x609   : > { %v2570_v60 = vpop.f32.mrb[85].mxu1 }
 0x60a   : > { %v3302_v61 = vpop.f32.mrb[86].mxu1 }
 0x60b   : > { %v2571_v63 = vpop.f32.mrb[87].mxu1 }
 0x60f   : > { %2611 = vmatmul.mubr.msk.bf16.vlgmr.msra.gmra.mrb[112].mxu0 %vm555_vm1, %v1565_v0 }
 0x610   : > { %v3305_v1 = vpop.f32.mrb[88].mxu1  ;;  %2614 = vmatprep.mubr.msk.bf16.mxu0 %vm2709_vm0, %v2708_v2 }
 0x611   : > { %v2574_v5 = vpop.f32.mrb[89].mxu1 }
 0x612   : > { %v3311_v6 = vpop.f32.mrb[90].mxu1 }
 0x613   : > { %v2575_v8 = vpop.f32.mrb[91].mxu1 }
 0x617   : > { %2615 = vmatmul.mubr.msk.bf16.gmra.mrb[116].mxu0 %vm555_vm1, %v1566_v7 }
 0x618   : > { %v3314_v10 = vpop.f32.mrb[92].mxu1  ;;  %2618 = vmatprep.mubr.msk.bf16.mxu0 %vm2709_vm0, %v2708_v2 }
 0x619   : > { %v2578_v19 = vpop.f32.mrb[93].mxu1 }
 0x61a   : > { %v3320_v22 = vpop.f32.mrb[94].mxu1 }
 0x61b   : > { %v2579_v25 = vpop.f32.mrb[95].mxu1 }
 0x61f   : > { %2619 = vmatmul.mubr.msk.bf16.gmra.mrb[120].mxu0 %vm555_vm1, %v1567_v11 }
 0x620   : > { %v3323_v14 = vpop.f32.mrb[96].mxu1  ;;  %2622 = vmatprep.mubr.msk.bf16.mxu0 %vm2709_vm0, %v2708_v2 }
 0x621   : > { %v2582_v18 = vpop.f32.mrb[97].mxu1 }
 0x622   : > { %v3329_v20 = vpop.f32.mrb[98].mxu1 }
 0x623   : > { %v2583_v21 = vpop.f32.mrb[99].mxu1 }
 0x627   : > { %2623 = vmatmul.mubr.msk.bf16.gmra.mrb[124].mxu0 %vm555_vm1, %v1568_v23 }
 0x628   : > { %v3332_v26 = vpop.f32.mrb[100].mxu1  ;;  %2626 = vmatprep.mubr.msk.bf16.mxu0 %vm2709_vm0, %v2708_v2 }
 0x629   : > { %v2586_v36 = vpop.f32.mrb[101].mxu1 }
 0x62a   : > { %v3338_v30 = vpop.f32.mrb[102].mxu1 }
 0x62b   : > { %v2587_v31 = vpop.f32.mrb[103].mxu1 }
 0x62f   : > { %2627 = vmatmul.mubr.msk.bf16.gmra.mrb[128].mxu0 %vm555_vm1, %v1569_v32 }
 0x630   : > { %v3341_v44 = vpop.f32.mrb[104].mxu1  ;;  %2630 = vmatprep.mubr.msk.bf16.mxu0 %vm2709_vm0, %v2708_v2 }
 0x631   : > { %v2590_v53 = vpop.f32.mrb[105].mxu1 }
 0x632   : > { %v3347_v34 = vpop.f32.mrb[106].mxu1 }
 0x633   : > { %v2591_v35 = vpop.f32.mrb[107].mxu1 }
 0x637   : > { %2631 = vmatmul.mubr.msk.bf16.gmra.mrb[132].mxu0 %vm555_vm1, %v1570_v62 }
 0x638   : > { %v3350_v37 = vpop.f32.mrb[108].mxu1  ;;  %2634 = vmatprep.mubr.msk.bf16.mxu0 %vm2709_vm0, %v2708_v2 }
 0x639   : > { %v2594_v39 = vpop.f32.mrb[109].mxu1 }
 0x63a   : > { %v3356_v9 = vpop.f32.mrb[110].mxu1 }
 0x63b   : > { %v2595_v40 = vpop.f32.mrb[111].mxu1 }
 0x63f   : > { %2635 = vmatmul.mubr.msk.bf16.gmra.mrb[136].mxu0 %vm555_vm1, %v1571_v41 }
 0x6aa   : > { %v1392_v42 = vpop.f32.mrb[84].mxu0 }
 0x6ab   : > { %v3362_v43 = vadd.f32 %v3359_v24, %v1392_v42  ;;  %v2538_v45 = vpop.f32.mrb[85].mxu0 }
 0x6ac   : > { %v1395_v46 = vpop.f32.mrb[86].mxu0 }
 0x6ad   : > { %v3365_v47 = vadd.f32 %v3359_v24, %v1395_v46  ;;  %v2539_v48 = vpop.f32.mrb[87].mxu0  ;;  %v1828_v49 = vadd.f32 %v3296_v57, %v3362_v43 }
 0x6af   : > { %1856 = vrot.lane.b32.xlu0 %v1828_v49, %s2710_s16  ;;  %v1829_v50 = vadd.f32 %v3302_v61, %v3365_v47 }
 0x6b2   : > { %v1400_v51 = vpop.f32.mrb[88].mxu0 }
 0x6b3   : > { %v3373_v52 = vadd.f32 %v3359_v24, %v1400_v51  ;;  %v2542_v54 = vpop.f32.mrb[89].mxu0  ;;  %1858 = vrot.lane.b32.xlu0 %v1829_v50, %s2710_s16 }
 0x6b4   : > { %v1403_v55 = vpop.f32.mrb[90].mxu0 }
 0x6b5   : > { %v3377_v56 = vadd.f32 %v3359_v24, %v1403_v55  ;;  %v2543_v58 = vpop.f32.mrb[91].mxu0  ;;  %v1830_v57 = vadd.f32 %v3305_v1, %v3373_v52 }
 0x6b7   : > { %1860 = vrot.lane.b32.xlu1 %v1830_v57, %s2710_s16  ;;  %v1831_v59 = vadd.f32 %v3311_v6, %v3377_v56 }
 0x6ba   : > { %v1408_v60 = vpop.f32.mrb[92].mxu0 }
 0x6bb   : > { %v3385_v61 = vadd.f32 %v3359_v24, %v1408_v60  ;;  %v2546_v63 = vpop.f32.mrb[93].mxu0  ;;  %1862 = vrot.lane.b32.xlu1 %v1831_v59, %s2710_s16 }
 0x6bc   : > { %v1411_v0 = vpop.f32.mrb[94].mxu0 }
 0x6bd   : > { %v1832_v3 = vadd.f32 %v3314_v10, %v3385_v61  ;;  %v3391_v4 = vadd.f32 %v3359_v24, %v1411_v0  ;;  %v2547_v1 = vpop.f32.mrb[95].mxu0 }
 0x6bf   : > { %v1833_v5 = vadd.f32 %v3320_v22, %v3391_v4  ;;  %1864 = vrot.lane.b32.xlu0 %v1832_v3, %s2710_s16 }
 0x6c1   : > { %1866 = vrot.lane.b32.xlu1 %v1833_v5, %s2710_s16 }
 0x6c2   : > { %v1416_v6 = vpop.f32.mrb[96].mxu0 }
 0x6c3   : > { %v3398_v8 = vadd.f32 %v3359_v24, %v1416_v6  ;;  %v2550_v7 = vpop.f32.mrb[97].mxu0 }
 0x6c4   : > { %v1419_v13 = vpop.f32.mrb[98].mxu0 }
 0x6c5   : > { %v1834_v10 = vadd.f32 %v3323_v14, %v3398_v8  ;;  %v3403_v16 = vadd.f32 %v3359_v24, %v1419_v13  ;;  %v2551_v19 = vpop.f32.mrb[99].mxu0 }
 0x6c7   : > { %v1835_v22 = vadd.f32 %v3329_v20, %v3403_v16  ;;  %1868 = vrot.lane.b32.xlu0 %v1834_v10, %s2710_s16 }
 0x6c9   : > { %1870 = vrot.lane.b32.xlu1 %v1835_v22, %s2710_s16 }
 0x6ca   : > { %v1424_v25 = vpop.f32.mrb[100].mxu0 }
 0x6cb   : > { %v3410_v11 = vadd.f32 %v3359_v24, %v1424_v25  ;;  %v2554_v15 = vpop.f32.mrb[101].mxu0 }
 0x6cc   : > { %v1427_v17 = vpop.f32.mrb[102].mxu0 }
 0x6cd   : > { %v1836_v14 = vadd.f32 %v3332_v26, %v3410_v11  ;;  %v3415_v18 = vadd.f32 %v3359_v24, %v1427_v17  ;;  %v2555_v21 = vpop.f32.mrb[103].mxu0 }
 0x6cf   : > { %v1837_v20 = vadd.f32 %v3338_v30, %v3415_v18  ;;  %1872 = vrot.lane.b32.xlu0 %v1836_v14, %s2710_s16 }
 0x6d1   : > { %1874 = vrot.lane.b32.xlu1 %v1837_v20, %s2710_s16 }
 0x6d2   : > { %v1432_v23 = vpop.f32.mrb[104].mxu0 }
 0x6d3   : > { %v3422_v28 = vadd.f32 %v3359_v24, %v1432_v23  ;;  %v2558_v29 = vpop.f32.mrb[105].mxu0 }
 0x6d4   : > { %v1435_v36 = vpop.f32.mrb[106].mxu0 }
 0x6d5   : > { %v1838_v26 = vadd.f32 %v3341_v44, %v3422_v28  ;;  %v3427_v31 = vadd.f32 %v3359_v24, %v1435_v36  ;;  %v2559_v32 = vpop.f32.mrb[107].mxu0 }
 0x6d7   : > { %v1839_v30 = vadd.f32 %v3347_v34, %v3427_v31  ;;  %1876 = vrot.lane.b32.xlu0 %v1838_v26, %s2710_s16 }
 0x6d9   : > { %1878 = vrot.lane.b32.xlu1 %v1839_v30, %s2710_s16 }
 0x6da   : > { %v1440_v12 = vpop.f32.mrb[108].mxu0 }
 0x6db   : > { %v3434_v33 = vadd.f32 %v3359_v24, %v1440_v12  ;;  %v2562_v53 = vpop.f32.mrb[109].mxu0 }
 0x6dc   : > { %v1443_v35 = vpop.f32.mrb[110].mxu0 }
 0x6dd   : > { %v1840_v44 = vadd.f32 %v3350_v37, %v3434_v33  ;;  %v3439_v62 = vadd.f32 %v3359_v24, %v1443_v35  ;;  %v2563_v27 = vpop.f32.mrb[111].mxu0 }
 0x6df   : > { %v1841_v34 = vadd.f32 %v3356_v9, %v3439_v62  ;;  %1880 = vrot.lane.b32.xlu0 %v1840_v44, %s2710_s16 }
 0x6e1   : > { %1882 = vrot.lane.b32.xlu1 %v1841_v34, %s2710_s16 }
 0x6e2   : > { %v1627_v38 = vpop.f32.mrb[112].mxu0 }
 0x6e3   : > { %v2612_v39 = vpop.f32.mrb[113].mxu0 }
 0x6e4   : > { %v1630_v40 = vpop.f32.mrb[114].mxu0 }
 0x6e5   : > { %v1682_v41 = vpack.c.bf16 %v1630_v40, %v1627_v38  ;;  %v2613_v42 = vpop.f32.mrb[115].mxu0 }
 0x6e7   : > { %2643 = vmatmul.mubr.msk.bf16.vlgmr.msra.gmra.mrb[112].mxu1 %vm1090_vm4, %v1682_v41 }
 0x6e8   : > { %2646 = vmatprep.mubr.msk.bf16.mxu1 %vm2709_vm0, %v2708_v2 }
 0x6ea   : > { %v1635_v37 = vpop.f32.mrb[116].mxu0 }
 0x6eb   : > { %v2616_v24 = vpop.f32.mrb[117].mxu0 }
 0x6ec   : > { %v1638_v45 = vpop.f32.mrb[118].mxu0 }
 0x6ed   : > { %v1683_v46 = vpack.c.bf16 %v1638_v45, %v1635_v37  ;;  %v2617_v48 = vpop.f32.mrb[119].mxu0 }
 0x6ef   : > { %2647 = vmatmul.mubr.msk.bf16.gmra.mrb[116].mxu1 %vm1090_vm4, %v1683_v46 }
 0x6f0   : > { %2650 = vmatprep.mubr.msk.bf16.mxu1 %vm2709_vm0, %v2708_v2 }
 0x6f2   : > { %v1643_v9 = vpop.f32.mrb[120].mxu0 }
 0x6f3   : > { %v2620_v49 = vpop.f32.mrb[121].mxu0 }
 0x6f4   : > { %v1646_v50 = vpop.f32.mrb[122].mxu0 }
 0x6f5   : > { %v1684_v51 = vpack.c.bf16 %v1646_v50, %v1643_v9  ;;  %v2621_v54 = vpop.f32.mrb[123].mxu0 }
 0x6f7   : > { %2651 = vmatmul.mubr.msk.bf16.gmra.mrb[120].mxu1 %vm1090_vm4, %v1684_v51 }
 0x6f8   : > { %2654 = vmatprep.mubr.msk.bf16.mxu1 %vm2709_vm0, %v2708_v2 }
 0x6fa   : > { %v1651_v55 = vpop.f32.mrb[124].mxu0 }
 0x6fb   : > { %v2624_v58 = vpop.f32.mrb[125].mxu0 }
 0x6fc   : > { %v1654_v57 = vpop.f32.mrb[126].mxu0 }
 0x6fd   : > { %v1685_v59 = vpack.c.bf16 %v1654_v57, %v1651_v55  ;;  %v2625_v60 = vpop.f32.mrb[127].mxu0 }
 0x6ff   : > { %2655 = vmatmul.mubr.msk.bf16.gmra.mrb[124].mxu1 %vm1090_vm4, %v1685_v59 }
 0x700   : > { %2658 = vmatprep.mubr.msk.bf16.mxu1 %vm2709_vm0, %v2708_v2 }
 0x702   : > { %v1659_v63 = vpop.f32.mrb[128].mxu0 }
 0x703   : > { %v2628_v0 = vpop.f32.mrb[129].mxu0 }
 0x704   : > { %v1662_v3 = vpop.f32.mrb[130].mxu0 }
 0x705   : > { %v1686_v1 = vpack.c.bf16 %v1662_v3, %v1659_v63  ;;  %v2629_v5 = vpop.f32.mrb[131].mxu0 }
 0x707   : > { %2659 = vmatmul.mubr.msk.bf16.gmra.mrb[128].mxu1 %vm1090_vm4, %v1686_v1 }
 0x708   : > { %2662 = vmatprep.mubr.msk.bf16.mxu1 %vm2709_vm0, %v2708_v2 }
 0x70a   : > { %v1667_v6 = vpop.f32.mrb[132].mxu0 }
 0x70b   : > { %v2632_v7 = vpop.f32.mrb[133].mxu0 }
 0x70c   : > { %v1670_v13 = vpop.f32.mrb[134].mxu0 }
 0x70d   : > { %v1687_v10 = vpack.c.bf16 %v1670_v13, %v1667_v6  ;;  %v2633_v19 = vpop.f32.mrb[135].mxu0 }
 0x70f   : > { %2663 = vmatmul.mubr.msk.bf16.gmra.mrb[132].mxu1 %vm1090_vm4, %v1687_v10 }
 0x710   : > { %2666 = vmatprep.mubr.msk.bf16.mxu1 %vm2709_vm0, %v2708_v2 }
 0x712   : > { %v1675_v22 = vpop.f32.mrb[136].mxu0 }
 0x713   : > { %v2636_v25 = vpop.f32.mrb[137].mxu0 }
 0x714   : > { %v1678_v15 = vpop.f32.mrb[138].mxu0 }
 0x715   : > { %v1688_v17 = vpack.c.bf16 %v1678_v15, %v1675_v22  ;;  %v2637_v14 = vpop.f32.mrb[139].mxu0 }
 0x717   : > { %2667 = vmatmul.mubr.msk.bf16.gmra.mrb[136].mxu1 %vm1090_vm4, %v1688_v17 }
 0x721   : > { %v1857_v21 = vpop.permute.xlu0 %1856 }
 0x722   : > { %1899 = vst.msk [vmem:[%s3044_s28] sm:$0xff] %vm1898_vm6, %v1857_v21 }
 0x725   : > { %v1859_v20 = vpop.permute.xlu0 %1858 }
 0x726   : > { %1900 = vst.msk [vmem:[%s3044_s28 + $0x8] sm:$0xff] %vm1898_vm6, %v1859_v20 }
 0x729   : > { %v1861_v2 = vpop.permute.xlu1 %1860 }
 0x72a   : > { %1901 = vst.msk [vmem:[%s3044_s28 + $0x10] sm:$0xff] %vm1898_vm6, %v1861_v2 }
 0x72d   : > { %v1863_v23 = vpop.permute.xlu1 %1862 }
 0x72e   : > { %1902 = vst.msk [vmem:[%s3044_s28 + $0x18] sm:$0xff] %vm1898_vm6, %v1863_v23 }
 0x731   : > { %v1865_v29 = vpop.permute.xlu0 %1864 }
 0x732   : > { %1903 = vst.msk [vmem:[%s3044_s28 + $0x20] sm:$0xff] %vm1898_vm6, %v1865_v29 }
 0x733   : > { %v1867_v36 = vpop.permute.xlu1 %1866 }
 0x734   : > { %1904 = vst.msk [vmem:[%s3044_s28 + $0x28] sm:$0xff] %vm1898_vm6, %v1867_v36 }
 0x739   : > { %v1869_v26 = vpop.permute.xlu0 %1868 }
 0x73a   : > { %1905 = vst.msk [vmem:[%s3044_s28 + $0x30] sm:$0xff] %vm1898_vm6, %v1869_v26 }
 0x73b   : > { %v1871_v32 = vpop.permute.xlu1 %1870 }
 0x73c   : > { %1906 = vst.msk [vmem:[%s3044_s28 + $0x38] sm:$0xff] %vm1898_vm6, %v1871_v32 }
 0x741   : > { %v1873_v30 = vpop.permute.xlu0 %1872 }
 0x742   : > { %1907 = vst.msk [vmem:[%s3044_s28 + $0x40] sm:$0xff] %vm1898_vm6, %v1873_v30 }
 0x743   : > { %v1875_v12 = vpop.permute.xlu1 %1874 }
 0x744   : > { %1908 = vst.msk [vmem:[%s3044_s28 + $0x48] sm:$0xff] %vm1898_vm6, %v1875_v12 }
 0x749   : > { %v1877_v53 = vpop.permute.xlu0 %1876 }
 0x74a   : > { %1909 = vst.msk [vmem:[%s3044_s28 + $0x50] sm:$0xff] %vm1898_vm6, %v1877_v53 }
 0x74b   : > { %v1879_v35 = vpop.permute.xlu1 %1878 }
 0x74c   : > { %1910 = vst.msk [vmem:[%s3044_s28 + $0x58] sm:$0xff] %vm1898_vm6, %v1879_v35 }
 0x751   : > { %v1881_v44 = vpop.permute.xlu0 %1880 }
 0x752   : > { %1911 = vst.msk [vmem:[%s3044_s28 + $0x60] sm:$0xff] %vm1898_vm6, %v1881_v44 }
 0x753   : > { %v1883_v27 = vpop.permute.xlu1 %1882 }
 0x754   : > { %1912 = vst.msk [vmem:[%s3044_s28 + $0x68] sm:$0xff] %vm1898_vm6, %v1883_v27 }
 0x7ba   : > { %v1744_v34 = vpop.f32.mrb[112].mxu1 }
 0x7bb   : > { %v1913_v38 = vadd.f32 %v1744_v34, %v3362_v43  ;;  %v2644_v39 = vpop.f32.mrb[113].mxu1 }
 0x7bc   : > { %v1747_v40 = vpop.f32.mrb[114].mxu1 }
 0x7bd   : > { %v1914_v41 = vadd.f32 %v1747_v40, %v3365_v47  ;;  %1941 = vrot.lane.b32.xlu0 %v1913_v38, %s2711_s26  ;;  %v2645_v42 = vpop.f32.mrb[115].mxu1 }
 0x7bf   : > { %1943 = vrot.lane.b32.xlu1 %v1914_v41, %s2711_s26 }
 0x7c2   : > { %v1752_v37 = vpop.f32.mrb[116].mxu1 }
 0x7c3   : > { %v1915_v24 = vadd.f32 %v1752_v37, %v3373_v52  ;;  %v2648_v45 = vpop.f32.mrb[117].mxu1 }
 0x7c4   : > { %v1755_v46 = vpop.f32.mrb[118].mxu1 }
 0x7c5   : > { %v1916_v48 = vadd.f32 %v1755_v46, %v3377_v56  ;;  %1945 = vrot.lane.b32.xlu0 %v1915_v24, %s2711_s26  ;;  %v2649_v43 = vpop.f32.mrb[119].mxu1 }
 0x7c7   : > { %1947 = vrot.lane.b32.xlu1 %v1916_v48, %s2711_s26 }
 0x7ca   : > { %v1760_v9 = vpop.f32.mrb[120].mxu1 }
 0x7cb   : > { %v1917_v47 = vadd.f32 %v1760_v9, %v3385_v61  ;;  %v2652_v49 = vpop.f32.mrb[121].mxu1 }
 0x7cc   : > { %v1763_v50 = vpop.f32.mrb[122].mxu1 }
 0x7cd   : > { %v1918_v51 = vadd.f32 %v1763_v50, %v3391_v4  ;;  %1949 = vrot.lane.b32.xlu0 %v1917_v47, %s2711_s26  ;;  %v2653_v54 = vpop.f32.mrb[123].mxu1 }
 0x7cf   : > { %1951 = vrot.lane.b32.xlu1 %v1918_v51, %s2711_s26 }
 0x7d2   : > { %v1768_v52 = vpop.f32.mrb[124].mxu1 }
 0x7d3   : > { %v1919_v56 = vadd.f32 %v1768_v52, %v3398_v8  ;;  %v2656_v55 = vpop.f32.mrb[125].mxu1 }
 0x7d4   : > { %v1771_v58 = vpop.f32.mrb[126].mxu1 }
 0x7d5   : > { %v1920_v57 = vadd.f32 %v1771_v58, %v3403_v16  ;;  %1953 = vrot.lane.b32.xlu0 %v1919_v56, %s2711_s26  ;;  %v2657_v59 = vpop.f32.mrb[127].mxu1 }
 0x7d7   : > { %1955 = vrot.lane.b32.xlu1 %v1920_v57, %s2711_s26 }
 0x7da   : > { %v1776_v61 = vpop.f32.mrb[128].mxu1 }
 0x7db   : > { %v1921_v4 = vadd.f32 %v1776_v61, %v3410_v11  ;;  %v2660_v60 = vpop.f32.mrb[129].mxu1 }
 0x7dc   : > { %v1779_v63 = vpop.f32.mrb[130].mxu1 }
 0x7dd   : > { %v1922_v0 = vadd.f32 %v1779_v63, %v3415_v18  ;;  %1957 = vrot.lane.b32.xlu0 %v1921_v4, %s2711_s26  ;;  %v2661_v3 = vpop.f32.mrb[131].mxu1 }
 0x7df   : > { %1959 = vrot.lane.b32.xlu1 %v1922_v0, %s2711_s26 }
 0x7e2   : > { %v1784_v8 = vpop.f32.mrb[132].mxu1 }
 0x7e3   : > { %v1923_v16 = vadd.f32 %v1784_v8, %v3422_v28  ;;  %v2664_v1 = vpop.f32.mrb[133].mxu1 }
 0x7e4   : > { %v1787_v5 = vpop.f32.mrb[134].mxu1 }
 0x7e5   : > { %v1924_v6 = vadd.f32 %v1787_v5, %v3427_v31  ;;  %1961 = vrot.lane.b32.xlu0 %v1923_v16, %s2711_s26  ;;  %v2665_v11 = vpop.f32.mrb[135].mxu1 }
 0x7e7   : > { %1963 = vrot.lane.b32.xlu1 %v1924_v6, %s2711_s26 }
 0x7ea   : > { %v1792_v18 = vpop.f32.mrb[136].mxu1 }
 0x7eb   : > { %v1925_v7 = vadd.f32 %v1792_v18, %v3434_v33  ;;  %v2668_v13 = vpop.f32.mrb[137].mxu1 }
 0x7ec   : > { %v1795_v10 = vpop.f32.mrb[138].mxu1 }
 0x7ed   : > { %v1926_v28 = vadd.f32 %v1795_v10, %v3439_v62  ;;  %1965 = vrot.lane.b32.xlu0 %v1925_v7, %s2711_s26  ;;  %v2669_v31 = vpop.f32.mrb[139].mxu1 }
 0x7ef   : > { %1967 = vrot.lane.b32.xlu1 %v1926_v28, %s2711_s26 }
 0x82f   : > { %v1942_v19 = vpop.permute.xlu0 %1941 }
 0x830   : > { %1984 = vst.msk [vmem:[%s3044_s28] sm:$0xff] %vm1983_vm7, %v1942_v19 }
 0x831   : > { %v1944_v22 = vpop.permute.xlu1 %1943 }
 0x832   : > { %1985 = vst.msk [vmem:[%s3044_s28 + $0x8] sm:$0xff] %vm1983_vm7, %v1944_v22 }
 0x837   : > { %v1946_v33 = vpop.permute.xlu0 %1945 }
 0x838   : > { %1986 = vst.msk [vmem:[%s3044_s28 + $0x10] sm:$0xff] %vm1983_vm7, %v1946_v33 }
 0x839   : > { %v1948_v62 = vpop.permute.xlu1 %1947 }
 0x83a   : > { %1987 = vst.msk [vmem:[%s3044_s28 + $0x18] sm:$0xff] %vm1983_vm7, %v1948_v62 }
 0x83f   : > { %v1950_v25 = vpop.permute.xlu0 %1949 }
 0x840   : > { %1988 = vst.msk [vmem:[%s3044_s28 + $0x20] sm:$0xff] %vm1983_vm7, %v1950_v25 }
 0x841   : > { %v1952_v15 = vpop.permute.xlu1 %1951 }
 0x842   : > { %1989 = vst.msk [vmem:[%s3044_s28 + $0x28] sm:$0xff] %vm1983_vm7, %v1952_v15 }
 0x847   : > { %v1954_v17 = vpop.permute.xlu0 %1953 }
 0x848   : > { %1990 = vst.msk [vmem:[%s3044_s28 + $0x30] sm:$0xff] %vm1983_vm7, %v1954_v17 }
 0x849   : > { %v1956_v14 = vpop.permute.xlu1 %1955 }
 0x84a   : > { %1991 = vst.msk [vmem:[%s3044_s28 + $0x38] sm:$0xff] %vm1983_vm7, %v1956_v14 }
 0x84f   : > { %v1958_v21 = vpop.permute.xlu0 %1957 }
 0x850   : > { %1992 = vst.msk [vmem:[%s3044_s28 + $0x40] sm:$0xff] %vm1983_vm7, %v1958_v21 }
 0x851   : > { %v1960_v20 = vpop.permute.xlu1 %1959 }
 0x852   : > { %1993 = vst.msk [vmem:[%s3044_s28 + $0x48] sm:$0xff] %vm1983_vm7, %v1960_v20 }
 0x857   : > { %v1962_v2 = vpop.permute.xlu0 %1961 }
 0x858   : > { %1994 = vst.msk [vmem:[%s3044_s28 + $0x50] sm:$0xff] %vm1983_vm7, %v1962_v2 }
 0x859   : > { %v1964_v23 = vpop.permute.xlu1 %1963 }
 0x85a   : > { %1995 = vst.msk [vmem:[%s3044_s28 + $0x58] sm:$0xff] %vm1983_vm7, %v1964_v23 }
 0x85f   : > { %v1966_v29 = vpop.permute.xlu0 %1965 }
 0x860   : > { %1996 = vst.msk [vmem:[%s3044_s28 + $0x60] sm:$0xff] %vm1983_vm7, %v1966_v29 }
 0x861   : > { %v1968_v36 = vpop.permute.xlu1 %1967 }
 0x862   : > { %1997 = vst.msk [vmem:[%s3044_s28 + $0x68] sm:$0xff] %vm1983_vm7, %v1968_v36 }
 0x863 PF: > { %s24_s23 = sadd.s32 1, %s2706_s23  }
 0x864   : > { %p21_p4 = scmp.ge.s32.totalorder %s24_s23, 6  }
 0x866   :  { %23 = sbr.rel (!%p21_p4) target bundleno = 3 (0x3), region = 104 }

// kernel: lg_gnn_forward.4
= control target key start
LH: loop header
LB: loop body
LE: loop exit
PB: predicated region body
PF: predicated region fallthrough
CT: control target
= control target key end

     0   :  { %s810_s15 = smov 0   ;;  %s1029_s0 = inlined_call_operand.vmem [shape: f32[4,101,101], index: 0, kind: input, shape index: {}]   ;;  %s1030_s1 = inlined_call_operand.vmem [shape: f32[4,101,20], index: 1, kind: input, shape index: {}]   ;;  %s1031_s2 = inlined_call_operand.vmem [shape: bf16[20,20], index: 2, kind: input, shape index: {}]   ;;  %s1032_s3 = inlined_call_operand.vmem [shape: f32[1,20], index: 3, kind: input, shape index: {}]   ;;  %s1033_s4 = inlined_call_operand.vmem [shape: f32[4,101,20], index: 4, kind: output, shape index: {}]  }
   0x1 LB: > { %s622_s16 = sadd.s32 4294967295, %s780_s15   ;;  %p626_p0 = scmp.ge.s32.totalorder %s780_s15, 1  ;;  %s780_s15 = sphi %s810_s15, %s14_s15  }
   0x2   : > { %p172_p1 = scmp.lt.s32.totalorder %s780_s15, 5 }
   0x4   : > { %p173_p2 = pnand %p626_p0, %p172_p1 }
   0x5   : > { %v772_v0 = vld [vmem:[%s1031_s2] sm:$0xff] (!%p173_p2)   ;;  %v782_v1 = vmov (!%p173_p2), 0.0   ;;  %v773_v2 = vld [vmem:[%s1031_s2 + $0x8] ss:$0 sps:$4 sm:$0x33] (!%p173_p2)   ;;  %vm273_vm0 = vcmask (!%p173_p2), 1041408  }
   0x6   : > { %176 = sbr.rel (%p173_p2) target bundleno = 546 (0x222), region = 36  ;;  %672 = vmatprep.subr.bf16.mxu0 (!%p173_p2), %v782_v1  ;;  %746 = vmatprep.subr.bf16.mxu1 (!%p173_p2), %v782_v1  ;;  %p203_p3 = scmp.lt.s32.totalorder (!%p173_p2), %s622_s16, 3  ;;  %v275_v3 = vsel (!%p173_p2), %vm273_vm0, %v773_v2, 0  ;;  %vm783_vm1 = vmmov (!%p173_p2), 0   ;;  %vm251_vm2 = vcmask (!%p173_p2), 162816   ;;  %v784_v54 = vmov (!%p173_p2), 65535  }
   0x7   : > { %673 = vmatpush3.bf16.msra.mxu0 (!%p173_p2), %v772_v0  ;;  %676 = vmatprep.mubr.msk.bf16.mxu0 (!%p173_p2), %vm783_vm1, %v782_v1  ;;  %v422_v55 = vsel (!%p173_p2), %vm273_vm0, 4294967295, %v784_v54  ;;  %vm421_vm3 = vcmask (!%p173_p2), 1042432   ;;  %vm399_vm4 = vcmask (!%p173_p2), 826368   ;;  %vm553_vm5 = vcmask (!%p173_p2), 159744  }
   0x8   : > { %674 = vmatprep.subr.bf16.mxu0 (!%p173_p2), %v782_v1  ;;  %722 = vmatprep.mubr.msk.bf16.mxu1 (!%p173_p2), %vm783_vm1, %v782_v1  ;;  %v423_v57 = vsel (!%p173_p2), %vm421_vm3, %v422_v55, 0 }
   0xb   : > { %675 = vmatpush3.bf16.msra.mxu0 (!%p173_p2), %v275_v3 }
   0xc   : > { %704 = vmatprep.subr.bf16.mxu0 (!%p173_p2), %v782_v1 }
   0xd   : > { %s1035_s16 = smov (!%p203_p3, %s622_s16), 3 }
   0xe   : > { %s832_s21 = smul.u32 104, %s1035_s16 }
  0x10   : > { %s839_s24 = scalar_lea.vmem %s1030_s1, %s832_s21  ;;  %s930_s27 = scalar_lea.vmem %s1029_s0, %s832_s21 }
  0x11   : > { %v842_v4 = vld [vmem:[%s839_s24] sm:$0xff]  ;;  %v845_v5 = vld [vmem:[%s839_s24 + $0x8] sm:$0xff]  ;;  %v853_v7 = vld [vmem:[%s839_s24 + $0x10] sm:$0xff]  ;;  %s977_s6 = scalar_lea.vmem %s1033_s4, %s832_s21 }
  0x12   : > { %v232_v6 = vpack.c.bf16 %v845_v5, %v842_v4  ;;  %v856_v8 = vld [vmem:[%s839_s24 + $0x18] sm:$0xff]  ;;  %v864_v10 = vld [vmem:[%s839_s24 + $0x20] sm:$0xff]  ;;  %v867_v11 = vld [vmem:[%s839_s24 + $0x28] sm:$0xff] }
  0x13   : > { %v233_v9 = vpack.c.bf16 %v856_v8, %v853_v7  ;;  %v234_v12 = vpack.c.bf16 %v867_v11, %v864_v10  ;;  %v875_v13 = vld [vmem:[%s839_s24 + $0x30] sm:$0xff]  ;;  %v878_v14 = vld [vmem:[%s839_s24 + $0x38] sm:$0xff]  ;;  %v886_v16 = vld [vmem:[%s839_s24 + $0x40] sm:$0xff] }
  0x14   : > { %677 = vmatmul.mubr.msk.bf16.vlgmr.msra.gmra.mrb[0].mxu0 %vm251_vm2, %v232_v6  ;;  %v235_v15 = vpack.c.bf16 %v878_v14, %v875_v13  ;;  %v889_v17 = vld [vmem:[%s839_s24 + $0x48] sm:$0xff]  ;;  %v897_v19 = vld [vmem:[%s839_s24 + $0x50] sm:$0xff]  ;;  %v900_v20 = vld [vmem:[%s839_s24 + $0x58] sm:$0xff] }
  0x15   : > { %680 = vmatprep.mubr.msk.bf16.mxu0 %vm783_vm1, %v782_v1  ;;  %v236_v18 = vpack.c.bf16 %v889_v17, %v886_v16  ;;  %v237_v21 = vpack.c.bf16 %v900_v20, %v897_v19  ;;  %v908_v22 = vld [vmem:[%s839_s24 + $0x60] sm:$0x1f]  ;;  %v367_v58 = vld [vmem:[%s930_s27 + $0x10] sm:$0xff]  ;;  %v368_v61 = vld [vmem:[%s930_s27 + $0x18] sm:$0xff] }
  0x16   : > { %v238_v23 = vpack.c.bf16 %v908_v22, %v908_v22  ;;  %v365_v62 = vld [vmem:[%s930_s27] sm:$0xff]  ;;  %v366_v63 = vld [vmem:[%s930_s27 + $0x8] sm:$0xff]  ;;  %v379_v6 = vpack.c.bf16 %v368_v61, %v367_v58 }
  0x1c   : > { %681 = vmatmul.mubr.msk.bf16.gmra.mrb[4].mxu0 %vm251_vm2, %v233_v9  ;;  %v378_v9 = vpack.c.bf16 %v366_v63, %v365_v62 }
  0x1d   : > { %684 = vmatprep.mubr.msk.bf16.mxu0 %vm783_vm1, %v782_v1 }
  0x24   : > { %685 = vmatmul.mubr.msk.bf16.gmra.mrb[8].mxu0 %vm251_vm2, %v234_v12  ;;  %v369_v12 = vld [vmem:[%s930_s27 + $0x20] sm:$0xff] }
  0x25   : > { %688 = vmatprep.mubr.msk.bf16.mxu0 %vm783_vm1, %v782_v1 }
  0x2c   : > { %689 = vmatmul.mubr.msk.bf16.gmra.mrb[12].mxu0 %vm251_vm2, %v235_v15  ;;  %v370_v15 = vld [vmem:[%s930_s27 + $0x28] sm:$0xff] }
  0x2d   : > { %692 = vmatprep.mubr.msk.bf16.mxu0 %vm783_vm1, %v782_v1 }
  0x34   : > { %693 = vmatmul.mubr.msk.bf16.gmra.mrb[16].mxu0 %vm251_vm2, %v236_v18  ;;  %v380_v18 = vpack.c.bf16 %v370_v15, %v369_v12 }
  0x35   : > { %696 = vmatprep.mubr.msk.bf16.mxu0 %vm783_vm1, %v782_v1 }
  0x3c   : > { %697 = vmatmul.mubr.msk.bf16.gmra.mrb[20].mxu0 %vm251_vm2, %v237_v21  ;;  %v371_v21 = vld [vmem:[%s930_s27 + $0x30] sm:$0xff] }
  0x3d   : > { %700 = vmatprep.mubr.msk.bf16.mxu0 %vm783_vm1, %v782_v1 }
  0x44   : > { %701 = vmatmul.mubr.msk.bf16.gmra.mrb[24].mxu0 %vm251_vm2, %v238_v23  ;;  %v372_v23 = vld [vmem:[%s930_s27 + $0x38] sm:$0xff] }
  0x45   : > { %718 = vmatprep.mubr.msk.bf16.mxu0 %vm783_vm1, %v782_v1 }
  0xe7   : > { %v311_v24 = vpop.f32.mrb[0].mxu0 }
  0xe8   : > { %v678_v25 = vpop.f32.mrb[1].mxu0 }
  0xe9   : > { %v314_v26 = vpop.f32.mrb[2].mxu0  ;;  %v373_v25 = vld [vmem:[%s930_s27 + $0x40] sm:$0xff] }
  0xea   : > { %v385_v27 = vpack.c.bf16 %v314_v26, %v311_v24  ;;  %v679_v28 = vpop.f32.mrb[3].mxu0  ;;  %v381_v24 = vpack.c.bf16 %v372_v23, %v371_v21  ;;  %v374_v26 = vld [vmem:[%s930_s27 + $0x48] sm:$0xff] }
  0xeb   : > { %v375_v28 = vld [vmem:[%s930_s27 + $0x50] sm:$0xff] }
  0xec   : > { %705 = vmatpush3.bf16.msra.mxu0 %v385_v27  ;;  %753 = vmatpush3.bf16.msra.mxu1 %v385_v27  ;;  %v382_v27 = vpack.c.bf16 %v374_v26, %v373_v25 }
  0xed   : > { %706 = vmatprep.subr.bf16.mxu0 %v782_v1  ;;  %747 = vmatprep.subr.bf16.mxu1 %v782_v1 }
  0xef   : > { %v319_v29 = vpop.f32.mrb[4].mxu0 }
  0xf0   : > { %v682_v30 = vpop.f32.mrb[5].mxu0 }
  0xf1   : > { %v322_v31 = vpop.f32.mrb[6].mxu0 }
  0xf2   : > { %v386_v32 = vpack.c.bf16 %v322_v31, %v319_v29  ;;  %v683_v33 = vpop.f32.mrb[7].mxu0  ;;  %v376_v29 = vld [vmem:[%s930_s27 + $0x58] sm:$0xff]  ;;  %v377_v31 = vld [vmem:[%s930_s27 + $0x60] sm:$0x1f] }
  0xf3   : > { %v383_v30 = vpack.c.bf16 %v376_v29, %v375_v28  ;;  %v967_v33 = vld [vmem:[%s1032_s3] ss:$0 sm:$0xff] }
  0xf4   : > { %707 = vmatpush3.bf16.msra.mxu0 %v386_v32  ;;  %754 = vmatpush3.bf16.msra.mxu1 %v386_v32  ;;  %v384_v32 = vpack.c.bf16 %v377_v31, %v377_v31 }
  0xf5   : > { %708 = vmatprep.subr.bf16.mxu0 %v782_v1  ;;  %748 = vmatprep.subr.bf16.mxu1 %v782_v1 }
  0xf7   : > { %v327_v34 = vpop.f32.mrb[8].mxu0 }
  0xf8   : > { %v686_v35 = vpop.f32.mrb[9].mxu0 }
  0xf9   : > { %v330_v36 = vpop.f32.mrb[10].mxu0 }
  0xfa   : > { %v387_v37 = vpack.c.bf16 %v330_v36, %v327_v34  ;;  %v687_v38 = vpop.f32.mrb[11].mxu0 }
  0xfc   : > { %709 = vmatpush3.bf16.msra.mxu0 %v387_v37  ;;  %755 = vmatpush3.bf16.msra.mxu1 %v387_v37 }
  0xfd   : > { %710 = vmatprep.subr.bf16.mxu0 %v782_v1  ;;  %749 = vmatprep.subr.bf16.mxu1 %v782_v1 }
  0xff   : > { %v335_v39 = vpop.f32.mrb[12].mxu0 }
 0x100   : > { %v690_v40 = vpop.f32.mrb[13].mxu0 }
 0x101   : > { %v338_v41 = vpop.f32.mrb[14].mxu0 }
 0x102   : > { %v388_v42 = vpack.c.bf16 %v338_v41, %v335_v39  ;;  %v691_v43 = vpop.f32.mrb[15].mxu0 }
 0x104   : > { %711 = vmatpush3.bf16.msra.mxu0 %v388_v42  ;;  %756 = vmatpush3.bf16.msra.mxu1 %v388_v42 }
 0x105   : > { %712 = vmatprep.subr.bf16.mxu0 %v782_v1  ;;  %750 = vmatprep.subr.bf16.mxu1 %v782_v1 }
 0x107   : > { %v343_v44 = vpop.f32.mrb[16].mxu0 }
 0x108   : > { %v694_v45 = vpop.f32.mrb[17].mxu0 }
 0x109   : > { %v346_v46 = vpop.f32.mrb[18].mxu0 }
 0x10a   : > { %v389_v47 = vpack.c.bf16 %v346_v46, %v343_v44  ;;  %v695_v48 = vpop.f32.mrb[19].mxu0 }
 0x10c   : > { %713 = vmatpush3.bf16.msra.mxu0 %v389_v47  ;;  %757 = vmatpush3.bf16.msra.mxu1 %v389_v47 }
 0x10d   : > { %714 = vmatprep.subr.bf16.mxu0 %v782_v1  ;;  %751 = vmatprep.subr.bf16.mxu1 %v782_v1 }
 0x10f   : > { %v351_v49 = vpop.f32.mrb[20].mxu0 }
 0x110   : > { %v698_v50 = vpop.f32.mrb[21].mxu0 }
 0x111   : > { %v354_v51 = vpop.f32.mrb[22].mxu0 }
 0x112   : > { %v390_v52 = vpack.c.bf16 %v354_v51, %v351_v49  ;;  %v699_v53 = vpop.f32.mrb[23].mxu0 }
 0x114   : > { %715 = vmatpush3.bf16.msra.mxu0 %v390_v52  ;;  %758 = vmatpush3.bf16.msra.mxu1 %v390_v52 }
 0x115   : > { %716 = vmatprep.subr.bf16.mxu0 %v782_v1  ;;  %752 = vmatprep.subr.bf16.mxu1 %v782_v1 }
 0x117   : > { %v359_v56 = vpop.f32.mrb[24].mxu0 }
 0x118   : > { %v391_v59 = vpack.c.bf16 %v359_v56, %v359_v56  ;;  %v702_v60 = vpop.f32.mrb[25].mxu0 }
 0x119   : > { %v362_v0 = vpop.f32.mrb[26].mxu0 }
 0x11a   : > { %v425_v2 = vand.u32 %v423_v57, %v391_v59  ;;  %v703_v3 = vpop.f32.mrb[27].mxu0 }
 0x11c   : > { %717 = vmatpush3.bf16.msra.mxu0 %v425_v2  ;;  %759 = vmatpush3.bf16.msra.mxu1 %v425_v2 }
 0x11f   : > { %723 = vmatmul.mubr.msk.bf16.vlgmr.msra.gmra.mrb[0].mxu1 %vm399_vm4, %v379_v6  ;;  %719 = vmatmul.mubr.msk.bf16.vlgmr.msra.gmra.mrb[28].mxu0 %vm399_vm4, %v378_v9 }
 0x120   : > { %726 = vmatprep.mubr.msk.bf16.mxu1 %vm783_vm1, %v782_v1 }
 0x127   : > { %727 = vmatmul.mubr.msk.bf16.gmra.mrb[4].mxu1 %vm399_vm4, %v380_v18 }
 0x128   : > { %730 = vmatprep.mubr.msk.bf16.mxu1 %vm783_vm1, %v782_v1 }
 0x12f   : > { %731 = vmatmul.mubr.msk.bf16.gmra.mrb[8].mxu1 %vm399_vm4, %v381_v24 }
 0x130   : > { %734 = vmatprep.mubr.msk.bf16.mxu1 %vm783_vm1, %v782_v1 }
 0x137   : > { %735 = vmatmul.mubr.msk.bf16.gmra.mrb[12].mxu1 %vm399_vm4, %v382_v27 }
 0x138   : > { %738 = vmatprep.mubr.msk.bf16.mxu1 %vm783_vm1, %v782_v1 }
 0x13f   : > { %739 = vmatmul.mubr.msk.bf16.gmra.mrb[16].mxu1 %vm399_vm4, %v383_v30 }
 0x140   : > { %742 = vmatprep.mubr.msk.bf16.mxu1 %vm783_vm1, %v782_v1 }
 0x147   : > { %743 = vmatmul.mubr.msk.bf16.gmra.mrb[20].mxu1 %vm399_vm4, %v384_v32 }
 0x1f2   : > { %v469_v34 = vpop.f32.mrb[0].mxu1  ;;  %v461_v35 = vpop.f32.mrb[28].mxu0 }
 0x1f3   : > { %v470_v36 = vadd.f32 %v967_v33, %v469_v34  ;;  %v724_v37 = vpop.f32.mrb[1].mxu1  ;;  %v462_v38 = vadd.f32 %v967_v33, %v461_v35  ;;  %v720_v39 = vpop.f32.mrb[29].mxu0 }
 0x1f4   : > { %v472_v40 = vpop.f32.mrb[2].mxu1  ;;  %v464_v1 = vpop.f32.mrb[30].mxu0 }
 0x1f5   : > { %v517_v41 = vmax.f32 %v470_v36, 0.0  ;;  %v473_v42 = vadd.f32 %v967_v33, %v472_v40  ;;  %v725_v43 = vpop.f32.mrb[3].mxu1  ;;  %v515_v44 = vmax.f32 %v462_v38, 0.0  ;;  %v465_v45 = vadd.f32 %v967_v33, %v464_v1  ;;  %v721_v46 = vpop.f32.mrb[31].mxu0 }
 0x1f7   : > { %v530_v47 = vadd.f32 %v517_v41, %v853_v7  ;;  %v518_v48 = vmax.f32 %v473_v42, 0.0  ;;  %v528_v49 = vadd.f32 %v515_v44, %v842_v4  ;;  %v516_v50 = vmax.f32 %v465_v45, 0.0 }
 0x1f9   : > { %543 = vst.msk [vmem:[%s977_s6 + $0x10] sm:$0xff] %vm251_vm2, %v530_v47  ;;  %v531_v51 = vadd.f32 %v518_v48, %v856_v8  ;;  %541 = vst.msk [vmem:[%s977_s6] sm:$0xff] %vm251_vm2, %v528_v49  ;;  %v529_v52 = vadd.f32 %v516_v50, %v845_v5 }
 0x1fa   : > { %v477_v53 = vpop.f32.mrb[4].mxu1 }
 0x1fb   : > { %544 = vst.msk [vmem:[%s977_s6 + $0x18] sm:$0xff] %vm251_vm2, %v531_v51  ;;  %v478_v54 = vadd.f32 %v967_v33, %v477_v53  ;;  %v728_v7 = vpop.f32.mrb[5].mxu1  ;;  %542 = vst.msk [vmem:[%s977_s6 + $0x8] sm:$0xff] %vm251_vm2, %v529_v52 }
 0x1fc   : > { %v480_v4 = vpop.f32.mrb[6].mxu1 }
 0x1fd   : > { %v519_v55 = vmax.f32 %v478_v54, 0.0  ;;  %v481_v56 = vadd.f32 %v967_v33, %v480_v4  ;;  %v729_v57 = vpop.f32.mrb[7].mxu1 }
 0x1ff   : > { %v532_v8 = vadd.f32 %v519_v55, %v864_v10  ;;  %v520_v58 = vmax.f32 %v481_v56, 0.0 }
 0x201   : > { %545 = vst.msk [vmem:[%s977_s6 + $0x20] sm:$0xff] %vm251_vm2, %v532_v8  ;;  %v533_v5 = vadd.f32 %v520_v58, %v867_v11 }
 0x202   : > { %v485_v59 = vpop.f32.mrb[8].mxu1 }
 0x203   : > { %546 = vst.msk [vmem:[%s977_s6 + $0x28] sm:$0xff] %vm251_vm2, %v533_v5  ;;  %v486_v60 = vadd.f32 %v967_v33, %v485_v59  ;;  %v732_v61 = vpop.f32.mrb[9].mxu1 }
 0x204   : > { %v488_v62 = vpop.f32.mrb[10].mxu1 }
 0x205   : > { %v521_v63 = vmax.f32 %v486_v60, 0.0  ;;  %v489_v0 = vadd.f32 %v967_v33, %v488_v62  ;;  %v733_v2 = vpop.f32.mrb[11].mxu1 }
 0x207   : > { %v534_v10 = vadd.f32 %v521_v63, %v875_v13  ;;  %v522_v3 = vmax.f32 %v489_v0, 0.0 }
 0x209   : > { %547 = vst.msk [vmem:[%s977_s6 + $0x30] sm:$0xff] %vm251_vm2, %v534_v10  ;;  %v535_v11 = vadd.f32 %v522_v3, %v878_v14 }
 0x20a   : > { %v493_v6 = vpop.f32.mrb[12].mxu1 }
 0x20b   : > { %548 = vst.msk [vmem:[%s977_s6 + $0x38] sm:$0xff] %vm251_vm2, %v535_v11  ;;  %v494_v9 = vadd.f32 %v967_v33, %v493_v6  ;;  %v736_v12 = vpop.f32.mrb[13].mxu1 }
 0x20c   : > { %v496_v15 = vpop.f32.mrb[14].mxu1 }
 0x20d   : > { %v523_v18 = vmax.f32 %v494_v9, 0.0  ;;  %v497_v21 = vadd.f32 %v967_v33, %v496_v15  ;;  %v737_v23 = vpop.f32.mrb[15].mxu1 }
 0x20f   : > { %v536_v13 = vadd.f32 %v523_v18, %v886_v16  ;;  %v524_v24 = vmax.f32 %v497_v21, 0.0 }
 0x211   : > { %549 = vst.msk [vmem:[%s977_s6 + $0x40] sm:$0xff] %vm251_vm2, %v536_v13  ;;  %v537_v14 = vadd.f32 %v524_v24, %v889_v17 }
 0x212   : > { %v501_v25 = vpop.f32.mrb[16].mxu1 }
 0x213   : > { %550 = vst.msk [vmem:[%s977_s6 + $0x48] sm:$0xff] %vm251_vm2, %v537_v14  ;;  %v502_v26 = vadd.f32 %v967_v33, %v501_v25  ;;  %v740_v27 = vpop.f32.mrb[17].mxu1 }
 0x214   : > { %v504_v28 = vpop.f32.mrb[18].mxu1 }
 0x215   : > { %v525_v29 = vmax.f32 %v502_v26, 0.0  ;;  %v505_v30 = vadd.f32 %v967_v33, %v504_v28  ;;  %v741_v31 = vpop.f32.mrb[19].mxu1 }
 0x217   : > { %v538_v16 = vadd.f32 %v525_v29, %v897_v19  ;;  %v526_v32 = vmax.f32 %v505_v30, 0.0 }
 0x219   : > { %551 = vst.msk [vmem:[%s977_s6 + $0x50] sm:$0xff] %vm251_vm2, %v538_v16  ;;  %v539_v34 = vadd.f32 %v526_v32, %v900_v20 }
 0x21a   : > { %v509_v17 = vpop.f32.mrb[20].mxu1 }
 0x21b   : > { %552 = vst.msk [vmem:[%s977_s6 + $0x58] sm:$0xff] %vm251_vm2, %v539_v34  ;;  %v510_v35 = vadd.f32 %v967_v33, %v509_v17  ;;  %v744_v36 = vpop.f32.mrb[21].mxu1 }
 0x21c   : > { %v512_v37 = vpop.f32.mrb[22].mxu1 }
 0x21d   : > { %v527_v38 = vmax.f32 %v510_v35, 0.0  ;;  %v745_v39 = vpop.f32.mrb[23].mxu1 }
 0x21f   : > { %v540_v40 = vadd.f32 %v527_v38, %v908_v22 }
 0x221   : > { %554 = vst.msk [vmem:[%s977_s6 + $0x60] sm:$0x1f] %vm553_vm5, %v540_v40 }
 0x222 PF: > { %s14_s15 = sadd.s32 1, %s780_s15  }
 0x223   : > { %p11_p4 = scmp.ge.s32.totalorder %s14_s15, 6  }
 0x225   :  { %13 = sbr.rel (!%p11_p4) target bundleno = 1 (0x1), region = 69 }

// kernel: lg_gnn_forward.5
= control target key start
LH: loop header
LB: loop body
LE: loop exit
PB: predicated region body
PF: predicated region fallthrough
CT: control target
= control target key end

     0   :  { %vm111_vm0 = vcmask 1041408   ;;  %v7345_v2 = vmov 0   ;;  %vm107_vm1 = vcmask 31744   ;;  %vm960_vm2 = vcmask 818176   ;;  %s7347_s21 = smov 72   ;;  %s7351_s18 = smov 40   ;;  %s9220_s1 = inlined_call_operand.vmem [shape: f32[4,2020], index: 1, kind: input, shape index: {}]   ;;  %s9221_s0 = inlined_call_operand.vmem [shape: f32[4,4], index: 0, kind: input, shape index: {}]   ;;  %s9222_s2 = inlined_call_operand.vmem [shape: bf16[6060,20], index: 2, kind: input, shape index: {}]   ;;  %s9223_s3 = inlined_call_operand.vmem [shape: f32[1,20], index: 3, kind: input, shape index: {}]   ;;  %s9224_s4 = inlined_call_operand.vmem [shape: f32[1,20], index: 4, kind: input, shape index: {}]   ;;  %s9225_s5 = inlined_call_operand.vmem [shape: bf16[60,20], index: 5, kind: input, shape index: {}]   ;;  %s9226_s6 = inlined_call_operand.vmem [shape: f32[1,20], index: 6, kind: input, shape index: {}]   ;;  %s9227_s7 = inlined_call_operand.vmem [shape: f32[1,20], index: 7, kind: input, shape index: {}]   ;;  %s9228_s8 = inlined_call_operand.vmem [shape: bf16[60,20], index: 8, kind: input, shape index: {}]   ;;  %s9229_s9 = inlined_call_operand.vmem [shape: f32[1,20], index: 9, kind: input, shape index: {}]   ;;  %s9230_s10 = inlined_call_operand.vmem [shape: f32[1,20], index: 10, kind: input, shape index: {}]   ;;  %s9231_s14 = inlined_call_operand.vmem [shape: f32[1,4], index: 14, kind: input, shape index: {}]   ;;  %s9232_s11 = inlined_call_operand.vmem [shape: bf16[60,20], index: 11, kind: input, shape index: {}]   ;;  %s9233_s15 = inlined_call_operand.vmem [shape: bf16[20,2], index: 15, kind: input, shape index: {}]   ;;  %s9234_s12 = inlined_call_operand.vmem [shape: f32[1,20], index: 12, kind: input, shape index: {}]   ;;  %s9235_s13 = inlined_call_operand.vmem [shape: f32[1,20], index: 13, kind: input, shape index: {}]   ;;  %s9236_s16 = inlined_call_operand.vmem [shape: f32[1,2], index: 16, kind: input, shape index: {}]   ;;  %s9237_s17 = inlined_call_operand.vmem [shape: f32[4,2], index: 17, kind: output, shape index: {}]  }
   0x1   :  { %9239 = sst [smem:[#allocation2_spill]] %s9220_s1  ;;  %192 = vmatprep.mubr.bf16.mxu0 %v7345_v2  ;;  %233 = vmatprep.mubr.bf16.mxu1 %v7345_v2  ;;  %s7346_s1 = smov 100   ;;  %vm1041_vm3 = vcmask 588800   ;;  %vm4140_vm4 = vcmask 359424   ;;  %vm4144_vm5 = vcmask 1045504   ;;  %vm7349_vm6 = vmmov 0  }
   0x2   :  { %9240 = sst [smem:[#allocation3_spill]] %s9221_s0  ;;  %s9241_s26 = sld [smem:[#allocation2_spill]]  ;;  %6932 = vset.pattern.permute.xlu0 %v7345_v2  ;;  %vm5223_vm7 = vcmask 162816   ;;  %vm5225_vm8 = vcmask 326656   ;;  %vm5259_vm9 = vcmask 490496   ;;  %vm5814_vm10 = vcmask 11264  }
   0x3   :  { %s9242_s20 = sld [smem:[#allocation3_spill]] }
   0x8   :  { %v59_v0 = vld [vmem:[%s9241_s26] sm:$0xff]  ;;  %v60_v1 = vld [vmem:[%s9241_s26 + $0x8] sm:$0xff]  ;;  %v61_v7 = vld [vmem:[%s9241_s26 + $0x10] sm:$0xff] }
   0x9   :  { %v7453_v3 = vcombine.high %v59_v0, %v59_v0  ;;  %v7455_v4 = vcombine.high %v60_v1, %v60_v1  ;;  %v7457_v5 = vpack.c.bf16 %v59_v0, %v59_v0  ;;  %v7459_v6 = vpack.c.bf16 %v60_v1, %v60_v1  ;;  %v62_v8 = vld [vmem:[%s9241_s26 + $0x18] sm:$0xff]  ;;  %v57_v9 = vld [vmem:[%s9242_s20] sm:$0xf]  ;;  %v64_v14 = vld [vmem:[%s9241_s26 + $0x28] sm:$0xff] }
   0xa   :  { %v7471_v10 = vcombine.high %v61_v7, %v61_v7  ;;  %v7473_v11 = vcombine.high %v62_v8, %v62_v8  ;;  %v7475_v12 = vpack.c.bf16 %v61_v7, %v61_v7  ;;  %v63_v13 = vld [vmem:[%s9241_s26 + $0x20] sm:$0xff]  ;;  %v7503_v21 = vpack.c.bf16 %v62_v8, %v62_v8  ;;  %v65_v29 = vld [vmem:[%s9241_s26 + $0x30] sm:$0xff]  ;;  %v66_v30 = vld [vmem:[%s9241_s26 + $0x38] sm:$0xff] }
   0xb   :  { %v7485_v15 = vpack.c.bf16 %v7453_v3, %v7453_v3  ;;  %v7489_v16 = vpack.c.bf16 %v7455_v4, %v7455_v4  ;;  %v113_v17 = vsel %vm111_vm0, %v7457_v5, 0  ;;  %v119_v18 = vsel %vm111_vm0, %v7459_v6, 0 }
   0xc   :  { %v7497_v19 = vpack.c.bf16 %v7471_v10, %v7471_v10  ;;  %v7501_v20 = vpack.c.bf16 %v7473_v11, %v7473_v11  ;;  %v7509_v22 = vpack.c.bf16 %v57_v9, %v57_v9  ;;  %v7511_v23 = vcombine.high %v63_v13, %v63_v13 }
   0xd   :  { %5820 = vmatprep.subr.msk.bf16.mxu0 %vm111_vm0, %v7485_v15  ;;  %5822 = vmatprep.subr.msk.bf16.mxu1 %vm111_vm0, %v7489_v16  ;;  %v7513_v24 = vcombine.high %v64_v14, %v64_v14  ;;  %v125_v25 = vsel %vm111_vm0, %v7475_v12, 0  ;;  %v131_v26 = vsel %vm111_vm0, %v7503_v21, 0  ;;  %v7543_v31 = vpack.c.bf16 %v63_v13, %v63_v13 }
   0xe   :  { %161 = vmatpush1.bf16.msra.mxu0 %v113_v17  ;;  %202 = vmatpush1.bf16.msra.mxu1 %v119_v18  ;;  %v7525_v27 = vpack.c.bf16 %v7511_v23, %v7511_v23  ;;  %v7545_v32 = vpack.c.bf16 %v64_v14, %v64_v14  ;;  %v7551_v33 = vcombine.high %v65_v29, %v65_v29 }
   0xf   :  { %5824 = vmatprep.subr.msk.bf16.mxu0 %vm111_vm0, %v7497_v19  ;;  %5826 = vmatprep.subr.msk.bf16.mxu1 %vm111_vm0, %v7501_v20  ;;  %v7529_v28 = vpack.c.bf16 %v7513_v24, %v7513_v24  ;;  %v7553_v34 = vcombine.high %v66_v30, %v66_v30  ;;  %v137_v35 = vsel %vm111_vm0, %v7543_v31, 0  ;;  %v7571_v39 = vpack.c.bf16 %v65_v29, %v65_v29 }
  0x10   :  { %v143_v36 = vsel %vm111_vm0, %v7545_v32, 0  ;;  %v7561_v37 = vpack.c.bf16 %v7551_v33, %v7551_v33  ;;  %v7573_v40 = vpack.c.bf16 %v66_v30, %v66_v30 }
  0x11   :  { %5821 = vmatmul.mubr.msk.bf16.vlgmr.msra.gmra.mrb[0].mxu0 %vm107_vm1, %v7509_v22  ;;  %5823 = vmatmul.mubr.msk.bf16.vlgmr.msra.gmra.mrb[0].mxu1 %vm107_vm1, %v7509_v22  ;;  %v106_v38 = vpack.c.bf16 %v7553_v34, %v7553_v34  ;;  %v149_v41 = vsel %vm111_vm0, %v7571_v39, 0 }
  0x12   :  { %243 = vmatpush1.bf16.msra.mxu0 %v125_v25  ;;  %284 = vmatpush1.bf16.msra.mxu1 %v131_v26  ;;  %v155_v42 = vsel %vm111_vm0, %v7573_v40, 0 }
  0x13   :  { %274 = vmatprep.mubr.bf16.mxu0 %v7345_v2  ;;  %315 = vmatprep.mubr.bf16.mxu1 %v7345_v2 }
  0x14   :  { %5828 = vmatprep.subr.msk.bf16.mxu0 %vm111_vm0, %v7525_v27  ;;  %5830 = vmatprep.subr.msk.bf16.mxu1 %vm111_vm0, %v7529_v28 }
  0x19   :  { %5825 = vmatmul.mubr.msk.bf16.vlgmr.msra.gmra.mrb[4].mxu0 %vm107_vm1, %v7509_v22  ;;  %5827 = vmatmul.mubr.msk.bf16.vlgmr.msra.gmra.mrb[4].mxu1 %vm107_vm1, %v7509_v22 }
  0x1a   :  { %325 = vmatpush1.bf16.msra.mxu0 %v137_v35  ;;  %366 = vmatpush1.bf16.msra.mxu1 %v143_v36 }
  0x1b   :  { %356 = vmatprep.mubr.bf16.mxu0 %v7345_v2  ;;  %397 = vmatprep.mubr.bf16.mxu1 %v7345_v2 }
  0x1c   :  { %5832 = vmatprep.subr.msk.bf16.mxu0 %vm111_vm0, %v7561_v37  ;;  %5834 = vmatprep.subr.msk.bf16.mxu1 %vm111_vm0, %v106_v38 }
  0x21   :  { %5829 = vmatmul.mubr.msk.bf16.vlgmr.msra.gmra.mrb[8].mxu0 %vm107_vm1, %v7509_v22  ;;  %5831 = vmatmul.mubr.msk.bf16.vlgmr.msra.gmra.mrb[8].mxu1 %vm107_vm1, %v7509_v22 }
  0x22   :  { %407 = vmatpush1.bf16.msra.mxu0 %v149_v41  ;;  %448 = vmatpush1.bf16.msra.mxu1 %v155_v42 }
  0x23   :  { %438 = vmatprep.mubr.bf16.mxu0 %v7345_v2  ;;  %479 = vmatprep.mubr.bf16.mxu1 %v7345_v2 }
  0x29   :  { %5833 = vmatmul.mubr.msk.bf16.vlgmr.msra.gmra.mrb[12].mxu0 %vm107_vm1, %v7509_v22  ;;  %5835 = vmatmul.mubr.msk.bf16.vlgmr.msra.gmra.mrb[12].mxu1 %vm107_vm1, %v7509_v22 }
  0x2a   :  { %584 = vmatprep.mubr.bf16.mxu0 %v7345_v2  ;;  %625 = vmatprep.mubr.bf16.mxu1 %v7345_v2 }
  0xe4   :  { %v194_v43 = vpop.f32.mrb[0].mxu0  ;;  %v235_v44 = vpop.f32.mrb[0].mxu1 }
  0xe5   :  { %v488_v45 = vpack.c.bf16 %v194_v43, %v194_v43  ;;  %v490_v46 = vpack.c.bf16 %v235_v44, %v235_v44  ;;  %932 = vrot.lane.b32.xlu1 %v235_v44, %s7346_s1  ;;  %928 = vrot.lane.b32.xlu0 %v194_v43, %s7346_s1  ;;  %v196_v47 = vpop.f32.mrb[1].mxu0  ;;  %v237_v48 = vpop.f32.mrb[1].mxu1 }
  0xe6   :  { %v489_v49 = vpack.c.bf16 %v196_v47, %v196_v47  ;;  %v198_v50 = vpop.f32.mrb[2].mxu0  ;;  %v491_v51 = vpack.c.bf16 %v237_v48, %v237_v48  ;;  %v239_v52 = vpop.f32.mrb[2].mxu1 }
  0xe7   :  { %v199_v53 = vpop.f32.mrb[3].mxu0  ;;  %v505_v54 = vsel %vm111_vm0, %v488_v45, 0  ;;  %v511_v55 = vsel %vm111_vm0, %v490_v46, 0  ;;  %v240_v56 = vpop.f32.mrb[3].mxu1 }
  0xe8   :  { %5836 = vmatprep.subr.msk.bf16.mxu0 %vm111_vm0, %v489_v49  ;;  %5838 = vmatprep.subr.msk.bf16.mxu1 %vm111_vm0, %v491_v51 }
  0xe9   :  { %930 = vrot.lane.b32.xlu1 %v196_v47, %s7346_s1  ;;  %553 = vmatpush1.bf16.msra.mxu0 %v505_v54 }
  0xea   :  { %594 = vmatpush1.bf16.msra.mxu1 %v511_v55 }
  0xec   :  { %v276_v57 = vpop.f32.mrb[4].mxu0  ;;  %5837 = vmatmul.mubr.msk.bf16.vlgmr.msra.gmra.mrb[16].mxu0 %vm107_vm1, %v7509_v22  ;;  %v317_v58 = vpop.f32.mrb[4].mxu1 }
  0xed   :  { %v6892_v59 = vpack.i.bf16 %v276_v57, %v237_v48  ;;  %v492_v60 = vpack.c.bf16 %v276_v57, %v276_v57  ;;  %v278_v61 = vpop.f32.mrb[5].mxu0  ;;  %v494_v62 = vpack.c.bf16 %v317_v58, %v317_v58  ;;  %5839 = vmatmul.mubr.msk.bf16.vlgmr.msra.gmra.mrb[16].mxu1 %vm107_vm1, %v7509_v22  ;;  %v319_v63 = vpop.f32.mrb[5].mxu1  ;;  %666 = vmatprep.mubr.bf16.mxu0 %v7345_v2 }
  0xee   :  { %v493_v0 = vpack.c.bf16 %v278_v61, %v278_v61  ;;  %v495_v1 = vpack.c.bf16 %v319_v63, %v319_v63  ;;  %v280_v7 = vpop.f32.mrb[6].mxu0  ;;  %v321_v8 = vpop.f32.mrb[6].mxu1  ;;  %707 = vmatprep.mubr.bf16.mxu1 %v7345_v2  ;;  %940 = vrot.lane.b32.xlu1 %v317_v58, %s7346_s1  ;;  %v6944_v58 = vld [vmem:[%s9222_s2 + $0x40] sm:$0xff]  }
  0xef   :  { %v517_v9 = vsel %vm111_vm0, %v492_v60, 0  ;;  %v523_v13 = vsel %vm111_vm0, %v494_v62, 0  ;;  %v281_v14 = vpop.f32.mrb[7].mxu0  ;;  %v322_v17 = vpop.f32.mrb[7].mxu1  ;;  %6893 = vrot.lane.b32.xlu0 %v6892_v59, %s7346_s1  ;;  %v6945_v59 = vld [vmem:[%s9222_s2 + $0xc0] sm:$0xff]  }
  0xf0   :  { %5840 = vmatprep.subr.msk.bf16.mxu0 %vm111_vm0, %v493_v0  ;;  %5842 = vmatprep.subr.msk.bf16.mxu1 %vm111_vm0, %v495_v1  ;;  %v6946_v0 = vld [vmem:[%s9222_s2] sm:$0xff]   ;;  %v6950_v14 = vld [vmem:[%s9222_s2 + $0x8] sm:$0xff]  }
  0xf1   :  { %635 = vmatpush1.bf16.msra.mxu0 %v517_v9  ;;  %676 = vmatpush1.bf16.msra.mxu1 %v523_v13  ;;  %v6947_v8 = vld [vmem:[%s9222_s2 + $0x80] sm:$0xff]   ;;  %v6948_v9 = vld [vmem:[%s9222_s2 + $0x48] sm:$0xff]  }
  0xf2   :  { %v6949_v13 = vld [vmem:[%s9222_s2 + $0xc8] sm:$0xff]  }
  0xf3   :  { %v6951_v17 = vld [vmem:[%s9222_s2 + $0x88] sm:$0xff]  }
  0xf4   :  { %5841 = vmatmul.mubr.msk.bf16.vlgmr.msra.gmra.mrb[20].mxu0 %vm107_vm1, %v7509_v22  ;;  %v358_v18 = vpop.f32.mrb[8].mxu0  ;;  %v399_v25 = vpop.f32.mrb[8].mxu1 }
  0xf5   :  { %v6897_v26 = vpack.i.bf16 %v358_v18, %v319_v63  ;;  %v496_v29 = vpack.c.bf16 %v358_v18, %v358_v18  ;;  %v498_v30 = vpack.c.bf16 %v399_v25, %v399_v25  ;;  %5843 = vmatmul.mubr.msk.bf16.vlgmr.msra.gmra.mrb[20].mxu1 %vm107_vm1, %v7509_v22  ;;  %v360_v35 = vpop.f32.mrb[9].mxu0  ;;  %v401_v36 = vpop.f32.mrb[9].mxu1  ;;  %748 = vmatprep.mubr.bf16.mxu0 %v7345_v2  ;;  %v6952_v18 = vld [vmem:[%s9222_s2 + $0x50] sm:$0xff]  }
  0xf6   :  { %v497_v38 = vpack.c.bf16 %v360_v35, %v360_v35  ;;  %v499_v41 = vpack.c.bf16 %v401_v36, %v401_v36  ;;  %v362_v42 = vpop.f32.mrb[10].mxu0  ;;  %v403_v43 = vpop.f32.mrb[10].mxu1  ;;  %789 = vmatprep.mubr.bf16.mxu1 %v7345_v2 }
  0xf7   :  { %v529_v44 = vsel %vm111_vm0, %v496_v29, 0  ;;  %v535_v45 = vsel %vm111_vm0, %v498_v30, 0  ;;  %v363_v46 = vpop.f32.mrb[11].mxu0  ;;  %v404_v47 = vpop.f32.mrb[11].mxu1  ;;  %6898 = vrot.lane.b32.xlu0 %v6897_v26, %s7346_s1  ;;  %v6954_v26 = vld [vmem:[%s9222_s2 + $0x10] sm:$0xff]   ;;  %v6956_v30 = vld [vmem:[%s9222_s2 + $0x58] sm:$0xff]  }
  0xf8   :  { %5846 = vmatprep.subr.msk.bf16.mxu1 %vm111_vm0, %v499_v41  ;;  %5844 = vmatprep.subr.msk.bf16.mxu0 %vm111_vm0, %v497_v38  ;;  %v6955_v29 = vld [vmem:[%s9222_s2 + $0x90] sm:$0xff]   ;;  %v6961_v38 = vld [vmem:[%s9222_s2 + $0xe0] sm:$0xff]   ;;  %v6964_v43 = vld [vmem:[%s9222_s2 + $0x68] sm:$0xff]  }
  0xf9   :  { %717 = vmatpush1.bf16.msra.mxu0 %v529_v44  ;;  %758 = vmatpush1.bf16.msra.mxu1 %v535_v45  ;;  %v6962_v41 = vld [vmem:[%s9222_s2 + $0x20] sm:$0xff]   ;;  %v6965_v44 = vld [vmem:[%s9222_s2 + $0xe8] sm:$0xff]   ;;  %v6968_v47 = vld [vmem:[%s9222_s2 + $0x70] sm:$0xff]  }
  0xfa   :  { %v6963_v42 = vld [vmem:[%s9222_s2 + $0xa0] sm:$0xff]   ;;  %v6966_v45 = vld [vmem:[%s9222_s2 + $0x28] sm:$0xff]  }
  0xfb   :  { %938 = vrot.lane.b32.xlu0 %v278_v61, %s7346_s1  ;;  %v6967_v46 = vld [vmem:[%s9222_s2 + $0xa8] sm:$0xff]  }
  0xfc   :  { %v440_v48 = vpop.f32.mrb[12].mxu0  ;;  %v481_v49 = vpop.f32.mrb[12].mxu1  ;;  %5845 = vmatmul.mubr.msk.bf16.vlgmr.msra.gmra.mrb[24].mxu0 %vm107_vm1, %v7509_v22 }
  0xfd   :  { %v6902_v50 = vpack.i.bf16 %v440_v48, %v401_v36  ;;  %v500_v51 = vpack.c.bf16 %v440_v48, %v440_v48  ;;  %v502_v52 = vpack.c.bf16 %v481_v49, %v481_v49  ;;  %v483_v53 = vpop.f32.mrb[13].mxu1  ;;  %5847 = vmatmul.mubr.msk.bf16.vlgmr.msra.gmra.mrb[24].mxu1 %vm107_vm1, %v7509_v22  ;;  %v442_v54 = vpop.f32.mrb[13].mxu0  ;;  %830 = vmatprep.mubr.bf16.mxu0 %v7345_v2  ;;  %v6960_v36 = vld [vmem:[%s9222_s2 + $0x60] sm:$0xff]   ;;  %v6969_v48 = vld [vmem:[%s9222_s2 + $0xf0] sm:$0xff]  }
  0xfe   :  { %v6907_v55 = vpack.i.bf16 %v481_v49, %v483_v53  ;;  %v503_v56 = vpack.c.bf16 %v483_v53, %v483_v53  ;;  %v501_v57 = vpack.c.bf16 %v442_v54, %v442_v54  ;;  %871 = vmatprep.mubr.bf16.mxu1 %v7345_v2  ;;  %v485_v60 = vpop.f32.mrb[14].mxu1  ;;  %v444_v61 = vpop.f32.mrb[14].mxu0  ;;  %v6970_v49 = vld [vmem:[%s9222_s2 + $0xb0] sm:$0xff]   ;;  %v6974_v53 = vld [vmem:[%s9222_s2 + $0xb8] sm:$0xff]  }
  0xff   :  { %v547_v62 = vsel %vm111_vm0, %v502_v52, 0  ;;  %v541_v63 = vsel %vm111_vm0, %v500_v51, 0  ;;  %6903 = vrot.lane.b32.xlu1 %v6902_v50, %s7346_s1  ;;  %948 = vrot.lane.b32.xlu0 %v399_v25, %s7346_s1  ;;  %v486_v1 = vpop.f32.mrb[15].mxu1  ;;  %v445_v7 = vpop.f32.mrb[15].mxu0  ;;  %v6953_v25 = vld [vmem:[%s9222_s2 + $0xd0] sm:$0xff]   ;;  %v6972_v51 = vld [vmem:[%s9222_s2 + $0x78] sm:$0xff]  }
 0x100   :  { %5848 = vmatprep.subr.msk.bf16.mxu0 %vm111_vm0, %v501_v57  ;;  %5850 = vmatprep.subr.msk.bf16.mxu1 %vm111_vm0, %v503_v56  ;;  %v6971_v50 = vld [vmem:[%s9222_s2 + $0x30] sm:$0xff]   ;;  %v6973_v52 = vld [vmem:[%s9222_s2 + $0xf8] sm:$0xff]   ;;  %v6977_v56 = vld [vmem:[%s9222_s2 + $0x1c0] sm:$0xff]  }
 0x101   :  { %840 = vmatpush1.bf16.msra.mxu1 %v547_v62  ;;  %799 = vmatpush1.bf16.msra.mxu0 %v541_v63  ;;  %v6978_v57 = vld [vmem:[%s9222_s2 + $0x100] sm:$0xff]   ;;  %v6981_v60 = vld [vmem:[%s9222_s2 + $0x1c8] sm:$0xff]   ;;  %v6984_v63 = vld [vmem:[%s9222_s2 + $0x150] sm:$0xff]  }
 0x102   :  { %6266 = vmatprep.subr.bf16.mxu0 %v6944_v58  ;;  %6288 = vmatprep.subr.bf16.mxu1 %v6945_v59  ;;  %v6979_v58 = vld [vmem:[%s9222_s2 + $0x180] sm:$0xff]   ;;  %v6980_v59 = vld [vmem:[%s9222_s2 + $0x148] sm:$0xff]   ;;  %v6988_v1 = vld [vmem:[%s9222_s2 + $0x158] sm:$0xff]  }
 0x103   :  { %946 = vrot.lane.b32.xlu1 %v360_v35, %s7346_s1  ;;  %6908 = vrot.lane.b32.xlu0 %v6907_v55, %s7346_s1  ;;  %v6959_v35 = vld [vmem:[%s9222_s2 + $0x98] sm:$0xff]   ;;  %v6976_v55 = vld [vmem:[%s9222_s2 + $0x140] sm:$0xff]  }
 0x104   :  { %5849 = vmatmul.mubr.msk.bf16.vlgmr.msra.gmra.mrb[28].mxu0 %vm107_vm1, %v7509_v22  ;;  %v6982_v61 = vld [vmem:[%s9222_s2 + $0x108] sm:$0xff]   ;;  %v6989_v7 = vld [vmem:[%s9222_s2 + $0x1d8] sm:$0xff]  }
 0x105   :  { %5851 = vmatmul.mubr.msk.bf16.vlgmr.msra.gmra.mrb[28].mxu1 %vm107_vm1, %v7509_v22  ;;  %6267 = vmatpush3.bf16.msra.mxu0 %v6946_v0  ;;  %v6983_v62 = vld [vmem:[%s9222_s2 + $0x188] sm:$0xff]   ;;  %v6985_v0 = vld [vmem:[%s9222_s2 + $0x1d0] sm:$0xff]  }
 0x106   :  { %6289 = vmatpush3.bf16.msra.mxu1 %v6947_v8  ;;  %6268 = vmatprep.subr.bf16.mxu0 %v6948_v9  ;;  %v6992_v8 = vld [vmem:[%s9222_s2 + $0x160] sm:$0xff]  }
 0x107   :  { %6290 = vmatprep.subr.bf16.mxu1 %v6949_v13  ;;  %4180 = vmatprep.mubr.bf16.mxu0 %v7485_v15  ;;  %v6957_v15 = vld [vmem:[%s9222_s2 + $0xd8] sm:$0xff]   ;;  %v6993_v9 = vld [vmem:[%s9222_s2 + $0x1e0] sm:$0xff]  }
 0x108   :  { %4220 = vmatprep.mubr.bf16.mxu1 %v7489_v16  ;;  %954 = vrot.lane.b32.xlu0 %v442_v54, %s7346_s1  ;;  %v6958_v16 = vld [vmem:[%s9222_s2 + $0x18] sm:$0xff]   ;;  %v6994_v13 = vld [vmem:[%s9222_s2 + $0x120] sm:$0xff]  }
 0x109   :  { %6269 = vmatpush3.bf16.msra.mxu0 %v6950_v14  ;;  %v6975_v54 = vld [vmem:[%s9222_s2 + $0x38] sm:$0xff]   ;;  %v6995_v14 = vld [vmem:[%s9222_s2 + $0x1a0] sm:$0xff]  }
 0x10a   :  { %6291 = vmatpush3.bf16.msra.mxu1 %v6951_v17  ;;  %6270 = vmatprep.subr.bf16.mxu0 %v6952_v18  ;;  %v6996_v17 = vld [vmem:[%s9222_s2 + $0x168] sm:$0xff]  }
 0x10b   :  { %6292 = vmatprep.subr.bf16.mxu1 %v6953_v25  ;;  %v6997_v18 = vld [vmem:[%s9222_s2 + $0x1e8] sm:$0xff]  }
 0x10c   :  { %v6998_v25 = vld [vmem:[%s9222_s2 + $0x128] sm:$0xff]  }
 0x10d   :  { %6271 = vmatpush3.bf16.msra.mxu0 %v6954_v26  ;;  %v6999_v26 = vld [vmem:[%s9222_s2 + $0x1a8] sm:$0xff]  }
 0x10e   :  { %6293 = vmatpush3.bf16.msra.mxu1 %v6955_v29  ;;  %6272 = vmatprep.subr.bf16.mxu0 %v6956_v30  ;;  %v7000_v29 = vld [vmem:[%s9222_s2 + $0x170] sm:$0xff]  }
 0x10f   :  { %6294 = vmatprep.subr.bf16.mxu1 %v6957_v15  ;;  %v7001_v30 = vld [vmem:[%s9222_s2 + $0x1f0] sm:$0xff]  }
 0x110   :  { %v7002_v15 = vld [vmem:[%s9222_s2 + $0x130] sm:$0xff]  }
 0x111   :  { %6273 = vmatpush3.bf16.msra.mxu0 %v6958_v16  ;;  %v7003_v16 = vld [vmem:[%s9222_s2 + $0x1b0] sm:$0xff]  }
 0x112   :  { %6295 = vmatpush3.bf16.msra.mxu1 %v6959_v35  ;;  %6274 = vmatprep.subr.bf16.mxu0 %v6960_v36  ;;  %v7004_v35 = vld [vmem:[%s9222_s2 + $0x178] sm:$0xff]  }
 0x113   :  { %6296 = vmatprep.subr.bf16.mxu1 %v6961_v38  ;;  %v7005_v36 = vld [vmem:[%s9222_s2 + $0x1f8] sm:$0xff]  }
 0x114   :  { %v7006_v38 = vld [vmem:[%s9222_s2 + $0x138] sm:$0xff]  }
 0x115   :  { %6275 = vmatpush3.bf16.msra.mxu0 %v6962_v41  ;;  %v7007_v41 = vld [vmem:[%s9222_s2 + $0x1b8] sm:$0xff]  }
 0x116   :  { %6297 = vmatpush3.bf16.msra.mxu1 %v6963_v42  ;;  %6276 = vmatprep.subr.bf16.mxu0 %v6964_v43  ;;  %v7008_v42 = vld [vmem:[%s9222_s2 + $0x240] sm:$0xff]  }
 0x117   :  { %6298 = vmatprep.subr.bf16.mxu1 %v6965_v44  ;;  %v7009_v43 = vld [vmem:[%s9222_s2 + $0x2c0] sm:$0xff]  }
 0x118   :  { %v7010_v44 = vld [vmem:[%s9222_s2 + $0x200] sm:$0xff]  }
 0x119   :  { %6277 = vmatpush3.bf16.msra.mxu0 %v6966_v45  ;;  %v7011_v45 = vld [vmem:[%s9222_s2 + $0x280] sm:$0xff]  }
 0x11a   :  { %6299 = vmatpush3.bf16.msra.mxu1 %v6967_v46  ;;  %6278 = vmatprep.subr.bf16.mxu0 %v6968_v47  ;;  %v7012_v46 = vld [vmem:[%s9222_s2 + $0x248] sm:$0xff]  }
 0x11b   :  { %6300 = vmatprep.subr.bf16.mxu1 %v6969_v48  ;;  %v7013_v47 = vld [vmem:[%s9222_s2 + $0x2c8] sm:$0xff]  }
 0x11c   :  { %v7014_v48 = vld [vmem:[%s9222_s2 + $0x208] sm:$0xff]  }
 0x11d   :  { %6279 = vmatpush3.bf16.msra.mxu0 %v6971_v50  ;;  %v7016_v50 = vld [vmem:[%s9222_s2 + $0x250] sm:$0xff]  }
 0x11e   :  { %6301 = vmatpush3.bf16.msra.mxu1 %v6970_v49  ;;  %6280 = vmatprep.subr.bf16.mxu0 %v6972_v51  ;;  %v7015_v49 = vld [vmem:[%s9222_s2 + $0x288] sm:$0xff]   ;;  %v7017_v51 = vld [vmem:[%s9222_s2 + $0x2d0] sm:$0xff]  }
 0x11f   :  { %6302 = vmatprep.subr.bf16.mxu1 %v6973_v52  ;;  %v7020_v52 = vld [vmem:[%s9222_s2 + $0x258] sm:$0xff]  }
 0x121   :  { %6281 = vmatpush3.bf16.msra.mxu0 %v6975_v54  ;;  %v7024_v54 = vld [vmem:[%s9222_s2 + $0x260] sm:$0xff]  }
 0x122   :  { %6303 = vmatpush3.bf16.msra.mxu1 %v6974_v53  ;;  %6310 = vmatprep.subr.bf16.mxu0 %v6976_v55  ;;  %v7021_v53 = vld [vmem:[%s9222_s2 + $0x2d8] sm:$0xff]   ;;  %v7025_v55 = vld [vmem:[%s9222_s2 + $0x2e0] sm:$0xff]  }
 0x123   :  { %6332 = vmatprep.subr.bf16.mxu1 %v6977_v56  ;;  %v7026_v56 = vld [vmem:[%s9222_s2 + $0x220] sm:$0xff]  }
 0x124   :  { %4181 = vmatmul.mubr.bf16.vlgmr.msra.gmra.mrb[32].mxu0 %v7457_v5  ;;  %v6986_v5 = vld [vmem:[%s9222_s2 + $0x110] sm:$0xff]  }
 0x125   :  { %4221 = vmatmul.mubr.bf16.vlgmr.msra.gmra.mrb[32].mxu1 %v7459_v6  ;;  %6311 = vmatpush3.bf16.msra.mxu0 %v6978_v57  ;;  %v6987_v6 = vld [vmem:[%s9222_s2 + $0x190] sm:$0xff]   ;;  %v7027_v57 = vld [vmem:[%s9222_s2 + $0x2a0] sm:$0xff]  }
 0x126   :  { %6333 = vmatpush3.bf16.msra.mxu1 %v6979_v58  ;;  %6312 = vmatprep.subr.bf16.mxu0 %v6980_v59  ;;  %v7028_v58 = vld [vmem:[%s9222_s2 + $0x268] sm:$0xff]  }
 0x127   :  { %6334 = vmatprep.subr.bf16.mxu1 %v6981_v60  ;;  %4260 = vmatprep.mubr.bf16.mxu0 %v7497_v19  ;;  %v6990_v19 = vld [vmem:[%s9222_s2 + $0x118] sm:$0xff]   ;;  %v7029_v59 = vld [vmem:[%s9222_s2 + $0x2e8] sm:$0xff]  }
 0x128   :  { %4300 = vmatprep.mubr.bf16.mxu1 %v7501_v20  ;;  %v6991_v20 = vld [vmem:[%s9222_s2 + $0x198] sm:$0xff]   ;;  %v7030_v60 = vld [vmem:[%s9222_s2 + $0x228] sm:$0xff]  }
 0x129   :  { %6313 = vmatpush3.bf16.msra.mxu0 %v6982_v61  ;;  %v7031_v61 = vld [vmem:[%s9222_s2 + $0x2a8] sm:$0xff]  }
 0x12a   :  { %6335 = vmatpush3.bf16.msra.mxu1 %v6983_v62  ;;  %6314 = vmatprep.subr.bf16.mxu0 %v6984_v63  ;;  %v7032_v62 = vld [vmem:[%s9222_s2 + $0x270] sm:$0xff]  }
 0x12b   :  { %6336 = vmatprep.subr.bf16.mxu1 %v6985_v0  ;;  %v7033_v63 = vld [vmem:[%s9222_s2 + $0x2f0] sm:$0xff]  }
 0x12c   :  { %v7034_v0 = vld [vmem:[%s9222_s2 + $0x230] sm:$0xff]  }
 0x12d   :  { %6315 = vmatpush3.bf16.msra.mxu0 %v6986_v5  ;;  %v7035_v5 = vld [vmem:[%s9222_s2 + $0x2b0] sm:$0xff]  }
 0x12e   :  { %6337 = vmatpush3.bf16.msra.mxu1 %v6987_v6  ;;  %6316 = vmatprep.subr.bf16.mxu0 %v6988_v1  ;;  %v7036_v6 = vld [vmem:[%s9222_s2 + $0x278] sm:$0xff]  }
 0x12f   :  { %6338 = vmatprep.subr.bf16.mxu1 %v6989_v7  ;;  %v7037_v1 = vld [vmem:[%s9222_s2 + $0x2f8] sm:$0xff]  }
 0x130   :  { %v7038_v7 = vld [vmem:[%s9222_s2 + $0x238] sm:$0xff]  }
 0x131   :  { %6317 = vmatpush3.bf16.msra.mxu0 %v6990_v19  ;;  %v7039_v19 = vld [vmem:[%s9222_s2 + $0x2b8] sm:$0xff]  }
 0x132   :  { %6339 = vmatpush3.bf16.msra.mxu1 %v6991_v20  ;;  %6318 = vmatprep.subr.bf16.mxu0 %v6992_v8  ;;  %v7040_v20 = vld [vmem:[%s9222_s2 + $0x340] sm:$0xff]  }
 0x133   :  { %6340 = vmatprep.subr.bf16.mxu1 %v6993_v9  ;;  %v7041_v9 = vld [vmem:[%s9222_s2 + $0x3c0] sm:$0xff]  }
 0x135   :  { %6319 = vmatpush3.bf16.msra.mxu0 %v6994_v13  ;;  %v7042_v13 = vld [vmem:[%s9222_s2 + $0x300] sm:$0xff]  }
 0x136   :  { %6341 = vmatpush3.bf16.msra.mxu1 %v6995_v14  ;;  %6320 = vmatprep.subr.bf16.mxu0 %v6996_v17  ;;  %v7043_v14 = vld [vmem:[%s9222_s2 + $0x380] sm:$0xff]  }
 0x137   :  { %6342 = vmatprep.subr.bf16.mxu1 %v6997_v18  ;;  %v7044_v18 = vld [vmem:[%s9222_s2 + $0x348] sm:$0xff]  }
 0x139   :  { %6321 = vmatpush3.bf16.msra.mxu0 %v6998_v25  ;;  %v7045_v25 = vld [vmem:[%s9222_s2 + $0x3c8] sm:$0xff]  }
 0x13a   :  { %6343 = vmatpush3.bf16.msra.mxu1 %v6999_v26  ;;  %6322 = vmatprep.subr.bf16.mxu0 %v7000_v29  ;;  %v7046_v26 = vld [vmem:[%s9222_s2 + $0x308] sm:$0xff]  }
 0x13b   :  { %6344 = vmatprep.subr.bf16.mxu1 %v7001_v30 }
 0x13d   :  { %6323 = vmatpush3.bf16.msra.mxu0 %v7002_v15  ;;  %v7047_v15 = vld [vmem:[%s9222_s2 + $0x388] sm:$0xff]  }
 0x13e   :  { %6345 = vmatpush3.bf16.msra.mxu1 %v7003_v16  ;;  %6324 = vmatprep.subr.bf16.mxu0 %v7004_v35  ;;  %v7048_v16 = vld [vmem:[%s9222_s2 + $0x350] sm:$0xff]  }
 0x13f   :  { %6346 = vmatprep.subr.bf16.mxu1 %v7005_v36  ;;  %v7049_v35 = vld [vmem:[%s9222_s2 + $0x3d0] sm:$0xff]  }
 0x141   :  { %6325 = vmatpush3.bf16.msra.mxu0 %v7006_v38  ;;  %v7052_v38 = vld [vmem:[%s9222_s2 + $0x358] sm:$0xff]  }
 0x142   :  { %6347 = vmatpush3.bf16.msra.mxu1 %v7007_v41  ;;  %6354 = vmatprep.subr.bf16.mxu0 %v7008_v42  ;;  %v7053_v41 = vld [vmem:[%s9222_s2 + $0x3d8] sm:$0xff]  }
 0x143   :  { %6376 = vmatprep.subr.bf16.mxu1 %v7009_v43  ;;  %v7054_v42 = vld [vmem:[%s9222_s2 + $0x318] sm:$0xff]  }
 0x144   :  { %4261 = vmatmul.mubr.bf16.vlgmr.msra.gmra.mrb[36].mxu0 %v7475_v12  ;;  %v7018_v12 = vld [vmem:[%s9222_s2 + $0x210] sm:$0xff]  }
 0x145   :  { %4301 = vmatmul.mubr.bf16.vlgmr.msra.gmra.mrb[36].mxu1 %v7503_v21  ;;  %6355 = vmatpush3.bf16.msra.mxu0 %v7010_v44  ;;  %v7019_v21 = vld [vmem:[%s9222_s2 + $0x290] sm:$0xff]   ;;  %v7056_v44 = vld [vmem:[%s9222_s2 + $0x360] sm:$0xff]  }
 0x146   :  { %6377 = vmatpush3.bf16.msra.mxu1 %v7011_v45  ;;  %6356 = vmatprep.subr.bf16.mxu0 %v7012_v46  ;;  %v7057_v45 = vld [vmem:[%s9222_s2 + $0x3e0] sm:$0xff]  }
 0x147   :  { %6378 = vmatprep.subr.bf16.mxu1 %v7013_v47  ;;  %4340 = vmatprep.mubr.bf16.mxu0 %v7525_v27  ;;  %v7022_v27 = vld [vmem:[%s9222_s2 + $0x218] sm:$0xff]   ;;  %v7058_v46 = vld [vmem:[%s9222_s2 + $0x320] sm:$0xff]  }
 0x148   :  { %4380 = vmatprep.mubr.bf16.mxu1 %v7529_v28  ;;  %v7023_v28 = vld [vmem:[%s9222_s2 + $0x298] sm:$0xff]   ;;  %v7059_v47 = vld [vmem:[%s9222_s2 + $0x3a0] sm:$0xff]  }
 0x149   :  { %6357 = vmatpush3.bf16.msra.mxu0 %v7014_v48  ;;  %v7060_v48 = vld [vmem:[%s9222_s2 + $0x368] sm:$0xff]  }
 0x14a   :  { %6379 = vmatpush3.bf16.msra.mxu1 %v7015_v49  ;;  %6358 = vmatprep.subr.bf16.mxu0 %v7016_v50  ;;  %v7061_v50 = vld [vmem:[%s9222_s2 + $0x3e8] sm:$0xff]  }
 0x14b   :  { %6380 = vmatprep.subr.bf16.mxu1 %v7017_v51  ;;  %v7062_v51 = vld [vmem:[%s9222_s2 + $0x328] sm:$0xff]  }
 0x14d   :  { %6359 = vmatpush3.bf16.msra.mxu0 %v7018_v12  ;;  %v7063_v12 = vld [vmem:[%s9222_s2 + $0x3a8] sm:$0xff]  }
 0x14e   :  { %6381 = vmatpush3.bf16.msra.mxu1 %v7019_v21  ;;  %6360 = vmatprep.subr.bf16.mxu0 %v7020_v52  ;;  %v7064_v21 = vld [vmem:[%s9222_s2 + $0x370] sm:$0xff]  }
 0x14f   :  { %6382 = vmatprep.subr.bf16.mxu1 %v7021_v53  ;;  %v7065_v53 = vld [vmem:[%s9222_s2 + $0x3f0] sm:$0xff]  }
 0x151   :  { %6361 = vmatpush3.bf16.msra.mxu0 %v7022_v27 }
 0x152   :  { %6383 = vmatpush3.bf16.msra.mxu1 %v7023_v28  ;;  %6362 = vmatprep.subr.bf16.mxu0 %v7024_v54  ;;  %v7066_v54 = vld [vmem:[%s9222_s2 + $0x330] sm:$0xff]  }
 0x153   :  { %6384 = vmatprep.subr.bf16.mxu1 %v7025_v55 }
 0x155   :  { %6363 = vmatpush3.bf16.msra.mxu0 %v7026_v56  ;;  %v7067_v56 = vld [vmem:[%s9222_s2 + $0x3b0] sm:$0xff]  }
 0x156   :  { %6385 = vmatpush3.bf16.msra.mxu1 %v7027_v57  ;;  %6364 = vmatprep.subr.bf16.mxu0 %v7028_v58  ;;  %v7068_v58 = vld [vmem:[%s9222_s2 + $0x378] sm:$0xff]  }
 0x157   :  { %6386 = vmatprep.subr.bf16.mxu1 %v7029_v59  ;;  %v7945_v8 = vpop.permute.xlu0 %928  ;;  %v8043_v55 = vpop.permute.xlu1 %932  ;;  %v7069_v59 = vld [vmem:[%s9222_s2 + $0x3f8] sm:$0xff]  }
 0x158   :  { %v1074_v17 = vsel %vm960_vm2, %v7553_v34, %v7945_v8 }
 0x159   :  { %6365 = vmatpush3.bf16.msra.mxu0 %v7030_v60  ;;  %v1076_v30 = vpack.c.bf16 %v1074_v17, %v1074_v17  ;;  %v7070_v60 = vld [vmem:[%s9222_s2 + $0x338] sm:$0xff]  }
 0x15a   :  { %6387 = vmatpush3.bf16.msra.mxu1 %v7031_v61  ;;  %6366 = vmatprep.subr.bf16.mxu0 %v7032_v62  ;;  %v7071_v61 = vld [vmem:[%s9222_s2 + $0x3b8] sm:$0xff]   ;;  %v7072_v62 = vld [vmem:[%s9222_s2 + $0x440] sm:$0xff]  }
 0x15b   :  { %6388 = vmatprep.subr.bf16.mxu1 %v7033_v63  ;;  %v8070_v63 = vpop.permute.xlu1 %930 }
 0x15d   :  { %6367 = vmatpush3.bf16.msra.mxu0 %v7034_v0  ;;  %v7073_v0 = vld [vmem:[%s9222_s2 + $0x4c0] sm:$0xff]  }
 0x15e   :  { %6389 = vmatpush3.bf16.msra.mxu1 %v7035_v5  ;;  %6368 = vmatprep.subr.bf16.mxu0 %v7036_v6  ;;  %v7074_v5 = vld [vmem:[%s9222_s2 + $0x400] sm:$0xff]  }
 0x15f   :  { %6390 = vmatprep.subr.bf16.mxu1 %v7037_v1 }
 0x161   :  { %6369 = vmatpush3.bf16.msra.mxu0 %v7038_v7  ;;  %v7968_v29 = vpop.permute.xlu0 %6893  ;;  %v7075_v7 = vld [vmem:[%s9222_s2 + $0x480] sm:$0xff]  }
 0x162   :  { %6391 = vmatpush3.bf16.msra.mxu1 %v7039_v19  ;;  %6398 = vmatprep.subr.bf16.mxu0 %v7040_v20  ;;  %v6896_v6 = vunpack.i.h.bf16 %v7968_v29  ;;  %v6895_v1 = vunpack.i.l.bf16 %v7968_v29  ;;  %v962_v19 = vsel %vm960_vm2, %v8070_v63, %v8043_v55  ;;  %v7076_v20 = vld [vmem:[%s9222_s2 + $0x448] sm:$0xff]  }
 0x163   :  { %6420 = vmatprep.subr.bf16.mxu1 %v7041_v9 }
 0x164   :  { %4341 = vmatmul.mubr.bf16.vlgmr.msra.gmra.mrb[40].mxu0 %v7543_v31  ;;  %v7050_v31 = vld [vmem:[%s9222_s2 + $0x310] sm:$0xff]   ;;  %v964_v9 = vsel %vm960_vm2, %v6895_v1, %v6896_v6 }
 0x165   :  { %4381 = vmatmul.mubr.bf16.vlgmr.msra.gmra.mrb[40].mxu1 %v7545_v32  ;;  %6399 = vmatpush3.bf16.msra.mxu0 %v7042_v13  ;;  %v7051_v32 = vld [vmem:[%s9222_s2 + $0x390] sm:$0xff]   ;;  %v1078_v13 = vpack.c.bf16 %v962_v19, %v962_v19  ;;  %v1080_v17 = vpack.c.bf16 %v964_v9, %v964_v9  ;;  %v7110_v9 = vld [vmem:[%s9222_s2 + $0x508] sm:$0xff]  }
 0x166   :  { %6421 = vmatpush3.bf16.msra.mxu1 %v7043_v14  ;;  %4460 = vmatprep.mubr.bf16.mxu1 %v1076_v30  ;;  %v7077_v14 = vld [vmem:[%s9222_s2 + $0x4c8] sm:$0xff]   ;;  %v7083_v30 = vld [vmem:[%s9222_s2 + $0x490] sm:$0xff]  }
 0x167   :  { %6400 = vmatprep.subr.bf16.mxu0 %v7044_v18  ;;  %6422 = vmatprep.subr.bf16.mxu1 %v7045_v25  ;;  %v7078_v18 = vld [vmem:[%s9222_s2 + $0x408] sm:$0xff]  }
 0x168   :  { %4420 = vmatprep.mubr.bf16.mxu0 %v7561_v37  ;;  %v7055_v37 = vld [vmem:[%s9222_s2 + $0x398] sm:$0xff]   ;;  %v7079_v25 = vld [vmem:[%s9222_s2 + $0x488] sm:$0xff]  }
 0x169   :  { %6401 = vmatpush3.bf16.msra.mxu0 %v7046_v26  ;;  %v7988_v36 = vpop.permute.xlu0 %6898  ;;  %v7082_v26 = vld [vmem:[%s9222_s2 + $0x410] sm:$0xff]  }
 0x16a   :  { %6423 = vmatpush3.bf16.msra.mxu1 %v7047_v15  ;;  %6402 = vmatprep.subr.bf16.mxu0 %v7048_v16  ;;  %v7084_v15 = vld [vmem:[%s9222_s2 + $0x458] sm:$0xff]  }
 0x16b   :  { %6424 = vmatprep.subr.bf16.mxu1 %v7049_v35  ;;  %v7085_v16 = vld [vmem:[%s9222_s2 + $0x4d8] sm:$0xff]  }
 0x16c   :  { %v7086_v35 = vld [vmem:[%s9222_s2 + $0x418] sm:$0xff]  }
 0x16d   :  { %6403 = vmatpush3.bf16.msra.mxu0 %v7050_v31  ;;  %v8002_v43 = vpop.permute.xlu0 %938  ;;  %v7087_v31 = vld [vmem:[%s9222_s2 + $0x498] sm:$0xff]  }
 0x16e   :  { %6425 = vmatpush3.bf16.msra.mxu1 %v7051_v32  ;;  %6404 = vmatprep.subr.bf16.mxu0 %v7052_v38  ;;  %v7088_v32 = vld [vmem:[%s9222_s2 + $0x460] sm:$0xff]  }
 0x16f   :  { %6426 = vmatprep.subr.bf16.mxu1 %v7053_v41  ;;  %v7089_v38 = vld [vmem:[%s9222_s2 + $0x4e0] sm:$0xff]  }
 0x170   :  { %v7090_v41 = vld [vmem:[%s9222_s2 + $0x420] sm:$0xff]  }
 0x171   :  { %6405 = vmatpush3.bf16.msra.mxu0 %v7054_v42  ;;  %v8019_v49 = vpop.permute.xlu0 %948  ;;  %v7091_v42 = vld [vmem:[%s9222_s2 + $0x4a0] sm:$0xff]  }
 0x172   :  { %6427 = vmatpush3.bf16.msra.mxu1 %v7055_v37  ;;  %6406 = vmatprep.subr.bf16.mxu0 %v7056_v44  ;;  %v7092_v37 = vld [vmem:[%s9222_s2 + $0x468] sm:$0xff]  }
 0x173   :  { %6428 = vmatprep.subr.bf16.mxu1 %v7057_v45  ;;  %v7093_v44 = vld [vmem:[%s9222_s2 + $0x4e8] sm:$0xff]  }
 0x174   :  { %v7094_v45 = vld [vmem:[%s9222_s2 + $0x428] sm:$0xff]  }
 0x175   :  { %6407 = vmatpush3.bf16.msra.mxu0 %v7058_v46  ;;  %v8033_v52 = vpop.permute.xlu0 %6908  ;;  %v7095_v46 = vld [vmem:[%s9222_s2 + $0x4a8] sm:$0xff]  }
 0x176   :  { %6429 = vmatpush3.bf16.msra.mxu1 %v7059_v47  ;;  %6408 = vmatprep.subr.bf16.mxu0 %v7060_v48  ;;  %v6911_v27 = vunpack.i.h.bf16 %v8033_v52  ;;  %v6910_v28 = vunpack.i.l.bf16 %v8033_v52  ;;  %v7096_v47 = vld [vmem:[%s9222_s2 + $0x470] sm:$0xff]  }
 0x177   :  { %6430 = vmatprep.subr.bf16.mxu1 %v7061_v50  ;;  %v7097_v48 = vld [vmem:[%s9222_s2 + $0x4f0] sm:$0xff]  }
 0x178   :  { %v8053_v57 = vsel %vm960_vm2, %v6911_v27, %v6910_v28  ;;  %v7099_v50 = vld [vmem:[%s9222_s2 + $0x430] sm:$0xff]  }
 0x179   :  { %6409 = vmatpush3.bf16.msra.mxu0 %v7062_v51  ;;  %v7098_v51 = vld [vmem:[%s9222_s2 + $0x4b0] sm:$0xff]  }
 0x17a   :  { %6431 = vmatpush3.bf16.msra.mxu1 %v7063_v12  ;;  %6410 = vmatprep.subr.bf16.mxu0 %v7064_v21  ;;  %v7100_v12 = vld [vmem:[%s9222_s2 + $0x478] sm:$0xff]  }
 0x17b   :  { %6432 = vmatprep.subr.bf16.mxu1 %v7065_v53  ;;  %v7101_v21 = vld [vmem:[%s9222_s2 + $0x4f8] sm:$0xff]  }
 0x17c   :  { %v7102_v53 = vld [vmem:[%s9222_s2 + $0x4b8] sm:$0xff]  }
 0x17d   :  { %6411 = vmatpush3.bf16.msra.mxu0 %v7066_v54  ;;  %v7103_v54 = vld [vmem:[%s9222_s2 + $0x438] sm:$0xff]  }
 0x17e   :  { %6433 = vmatpush3.bf16.msra.mxu1 %v7067_v56  ;;  %6412 = vmatprep.subr.bf16.mxu0 %v7068_v58  ;;  %v8177_v56 = vpop.permute.xlu1 %940  ;;  %v7104_v58 = vld [vmem:[%s9222_s2 + $0x540] sm:$0xff]  }
 0x17f   :  { %6434 = vmatprep.subr.bf16.mxu1 %v7069_v59  ;;  %v7105_v59 = vld [vmem:[%s9222_s2 + $0x5c0] sm:$0xff]  }
 0x181   :  { %6413 = vmatpush3.bf16.msra.mxu0 %v7070_v60  ;;  %v961_v60 = vsel %vm960_vm2, %v7945_v8, %v8070_v63  ;;  %v966_v8 = vsel %vm960_vm2, %v8002_v43, %v8177_v56  ;;  %v7108_v63 = vld [vmem:[%s9222_s2 + $0x548] sm:$0xff]  }
 0x182   :  { %6435 = vmatpush3.bf16.msra.mxu1 %v7071_v61  ;;  %6442 = vmatprep.subr.bf16.mxu0 %v7072_v62  ;;  %v7106_v61 = vld [vmem:[%s9222_s2 + $0x500] sm:$0xff]   ;;  %v963_v62 = vsel %vm960_vm2, %v8043_v55, %v6895_v1  ;;  %v1077_v19 = vpack.c.bf16 %v961_v60, %v961_v60  ;;  %v7109_v1 = vld [vmem:[%s9222_s2 + $0x5c8] sm:$0xff]   ;;  %v965_v60 = vsel %vm960_vm2, %v6896_v6, %v8002_v43 }
 0x183   :  { %6464 = vmatprep.subr.bf16.mxu1 %v7073_v0  ;;  %v6901_v0 = vunpack.i.h.bf16 %v7988_v36  ;;  %v7138_v6 = vld [vmem:[%s9222_s2 + $0x600] sm:$0xff]  }
 0x184   :  { %4421 = vmatmul.mubr.bf16.vlgmr.msra.gmra.mrb[44].mxu0 %v7571_v39  ;;  %v7080_v39 = vld [vmem:[%s9222_s2 + $0x450] sm:$0xff]  }
 0x185   :  { %4461 = vmatmul.mubr.bf16.vlgmr.msra.gmra.mrb[44].mxu1 %v7573_v40  ;;  %6443 = vmatpush3.bf16.msra.mxu0 %v7074_v5  ;;  %v7081_v40 = vld [vmem:[%s9222_s2 + $0x4d0] sm:$0xff]   ;;  %v6900_v5 = vunpack.i.l.bf16 %v7988_v36 }
 0x186   :  { %4500 = vmatprep.mubr.bf16.mxu0 %v1078_v13  ;;  %6465 = vmatpush3.bf16.msra.mxu1 %v7075_v7  ;;  %v7107_v7 = vld [vmem:[%s9222_s2 + $0x580] sm:$0xff]   ;;  %v1082_v13 = vpack.c.bf16 %v966_v8, %v966_v8 }
 0x187   :  { %4540 = vmatprep.mubr.bf16.mxu1 %v1080_v17  ;;  %6444 = vmatprep.subr.bf16.mxu0 %v7076_v20  ;;  %v968_v55 = vsel %vm960_vm2, %v6900_v5, %v6901_v0  ;;  %v1079_v20 = vpack.c.bf16 %v963_v62, %v963_v62  ;;  %v7112_v17 = vld [vmem:[%s9222_s2 + $0x550] sm:$0xff]   ;;  %v7137_v62 = vld [vmem:[%s9222_s2 + $0x6c0] sm:$0xff]  }
 0x188   :  { %6466 = vmatprep.subr.bf16.mxu1 %v7077_v14  ;;  %v7111_v14 = vld [vmem:[%s9222_s2 + $0x588] sm:$0xff]  }
 0x189   :  { %6445 = vmatpush3.bf16.msra.mxu0 %v7078_v18  ;;  %v1084_v18 = vpack.c.bf16 %v968_v55, %v968_v55 }
 0x18a   :  { %6467 = vmatpush3.bf16.msra.mxu1 %v7079_v25  ;;  %6446 = vmatprep.subr.bf16.mxu0 %v7080_v39  ;;  %v7113_v25 = vld [vmem:[%s9222_s2 + $0x5d0] sm:$0xff]  }
 0x18b   :  { %6468 = vmatprep.subr.bf16.mxu1 %v7081_v40  ;;  %v7114_v39 = vld [vmem:[%s9222_s2 + $0x510] sm:$0xff]  }
 0x18c   :  { %v7115_v40 = vld [vmem:[%s9222_s2 + $0x590] sm:$0xff]  }
 0x18d   :  { %6447 = vmatpush3.bf16.msra.mxu0 %v7082_v26  ;;  %v7116_v26 = vld [vmem:[%s9222_s2 + $0x558] sm:$0xff]  }
 0x18e   :  { %6469 = vmatpush3.bf16.msra.mxu1 %v7083_v30  ;;  %6448 = vmatprep.subr.bf16.mxu0 %v7084_v15  ;;  %v7117_v30 = vld [vmem:[%s9222_s2 + $0x5d8] sm:$0xff]  }
 0x18f   :  { %6470 = vmatprep.subr.bf16.mxu1 %v7085_v16  ;;  %v7118_v15 = vld [vmem:[%s9222_s2 + $0x518] sm:$0xff]  }
 0x190   :  { %v7119_v16 = vld [vmem:[%s9222_s2 + $0x598] sm:$0xff]  }
 0x191   :  { %6449 = vmatpush3.bf16.msra.mxu0 %v7086_v35  ;;  %v7120_v35 = vld [vmem:[%s9222_s2 + $0x560] sm:$0xff]  }
 0x192   :  { %6471 = vmatpush3.bf16.msra.mxu1 %v7087_v31  ;;  %6450 = vmatprep.subr.bf16.mxu0 %v7088_v32  ;;  %v7121_v31 = vld [vmem:[%s9222_s2 + $0x5e0] sm:$0xff]  }
 0x193   :  { %6472 = vmatprep.subr.bf16.mxu1 %v7089_v38  ;;  %v7122_v32 = vld [vmem:[%s9222_s2 + $0x520] sm:$0xff]  }
 0x194   :  { %v7123_v38 = vld [vmem:[%s9222_s2 + $0x5a0] sm:$0xff]  }
 0x195   :  { %6451 = vmatpush3.bf16.msra.mxu0 %v7090_v41  ;;  %v7124_v41 = vld [vmem:[%s9222_s2 + $0x568] sm:$0xff]  }
 0x196   :  { %6473 = vmatpush3.bf16.msra.mxu1 %v7091_v42  ;;  %6452 = vmatprep.subr.bf16.mxu0 %v7092_v37  ;;  %v7125_v42 = vld [vmem:[%s9222_s2 + $0x5e8] sm:$0xff]  }
 0x197   :  { %6474 = vmatprep.subr.bf16.mxu1 %v7093_v44  ;;  %v7126_v37 = vld [vmem:[%s9222_s2 + $0x528] sm:$0xff]  }
 0x198   :  { %v7127_v44 = vld [vmem:[%s9222_s2 + $0x5a8] sm:$0xff]  }
 0x199   :  { %6453 = vmatpush3.bf16.msra.mxu0 %v7094_v45  ;;  %v7128_v45 = vld [vmem:[%s9222_s2 + $0x570] sm:$0xff]  }
 0x19a   :  { %6475 = vmatpush3.bf16.msra.mxu1 %v7095_v46  ;;  %6454 = vmatprep.subr.bf16.mxu0 %v7096_v47  ;;  %v7129_v46 = vld [vmem:[%s9222_s2 + $0x5f0] sm:$0xff]   ;;  %v8274_v47 = vpop.permute.xlu1 %6903 }
 0x19b   :  { %6476 = vmatprep.subr.bf16.mxu1 %v7097_v48  ;;  %v7130_v48 = vld [vmem:[%s9222_s2 + $0x530] sm:$0xff]   ;;  %v6905_v8 = vunpack.i.l.bf16 %v8274_v47 }
 0x19d   :  { %6455 = vmatpush3.bf16.msra.mxu0 %v7099_v50  ;;  %v7131_v50 = vld [vmem:[%s9222_s2 + $0x5b0] sm:$0xff]  }
 0x19e   :  { %6477 = vmatpush3.bf16.msra.mxu1 %v7098_v51  ;;  %6456 = vmatprep.subr.bf16.mxu0 %v7100_v12  ;;  %v7132_v51 = vld [vmem:[%s9222_s2 + $0x578] sm:$0xff]  }
 0x19f   :  { %6478 = vmatprep.subr.bf16.mxu1 %v7101_v21  ;;  %v7133_v12 = vld [vmem:[%s9222_s2 + $0x5f8] sm:$0xff]  }
 0x1a0   :  { %v7134_v21 = vld [vmem:[%s9222_s2 + $0x538] sm:$0xff]  }
 0x1a1   :  { %6457 = vmatpush3.bf16.msra.mxu0 %v7103_v54  ;;  %v7136_v54 = vld [vmem:[%s9222_s2 + $0x640] sm:$0xff]  }
 0x1a2   :  { %6479 = vmatpush3.bf16.msra.mxu1 %v7102_v53  ;;  %6486 = vmatprep.subr.bf16.mxu0 %v7104_v58  ;;  %v7135_v53 = vld [vmem:[%s9222_s2 + $0x5b8] sm:$0xff]   ;;  %v6906_v58 = vunpack.i.h.bf16 %v8274_v47  ;;  %v7196_v47 = vld [vmem:[%s9222_s2 + $0x848] sm:$0xff]  }
 0x1a3   :  { %6508 = vmatprep.subr.bf16.mxu1 %v7105_v59  ;;  %v8298_v59 = vpop.permute.xlu1 %946 }
 0x1a4   :  { %4501 = vmatmul.mubr.bf16.vlgmr.msra.gmra.mrb[48].mxu0 %v1077_v19  ;;  %v970_v29 = vsel %vm960_vm2, %v8298_v59, %v8019_v49 }
 0x1a5   :  { %4541 = vmatmul.mubr.bf16.vlgmr.msra.gmra.mrb[48].mxu1 %v1079_v20  ;;  %6487 = vmatpush3.bf16.msra.mxu0 %v7106_v61 }
 0x1a6   :  { %4580 = vmatprep.mubr.bf16.mxu0 %v1082_v13  ;;  %6509 = vmatpush3.bf16.msra.mxu1 %v7107_v7  ;;  %v967_v7 = vsel %vm960_vm2, %v8177_v56, %v6900_v5  ;;  %v7337_v56 = vld [vmem:[%s9241_s26] sm:$0xff] }
 0x1a7   :  { %4620 = vmatprep.mubr.bf16.mxu1 %v1084_v18  ;;  %6488 = vmatprep.subr.bf16.mxu0 %v7108_v63 }
 0x1a8   :  { %6510 = vmatprep.subr.bf16.mxu1 %v7109_v1 }
 0x1a9   :  { %6489 = vmatpush3.bf16.msra.mxu0 %v7110_v9  ;;  %v1081_v9 = vpack.c.bf16 %v965_v60, %v965_v60 }
 0x1aa   :  { %6511 = vmatpush3.bf16.msra.mxu1 %v7111_v14  ;;  %6490 = vmatprep.subr.bf16.mxu0 %v7112_v17  ;;  %v7139_v14 = vld [vmem:[%s9222_s2 + $0x680] sm:$0xff]   ;;  %v972_v17 = vsel %vm960_vm2, %v6905_v8, %v6906_v58 }
 0x1ab   :  { %6512 = vmatprep.subr.bf16.mxu1 %v7113_v25  ;;  %v1083_v25 = vpack.c.bf16 %v967_v7, %v967_v7 }
 0x1ad   :  { %6491 = vmatpush3.bf16.msra.mxu0 %v7114_v39  ;;  %v7140_v39 = vld [vmem:[%s9222_s2 + $0x648] sm:$0xff]  }
 0x1ae   :  { %6513 = vmatpush3.bf16.msra.mxu1 %v7115_v40  ;;  %6492 = vmatprep.subr.bf16.mxu0 %v7116_v26  ;;  %v1086_v26 = vpack.c.bf16 %v970_v29, %v970_v29  ;;  %v7150_v29 = vld [vmem:[%s9222_s2 + $0x618] sm:$0xff]  }
 0x1af   :  { %6514 = vmatprep.subr.bf16.mxu1 %v7117_v30  ;;  %v7338_v30 = vld [vmem:[%s9241_s26 + $0x8] sm:$0xff] }
 0x1b1   :  { %6493 = vmatpush3.bf16.msra.mxu0 %v7118_v15 }
 0x1b2   :  { %6515 = vmatpush3.bf16.msra.mxu1 %v7119_v16  ;;  %6494 = vmatprep.subr.bf16.mxu0 %v7120_v35  ;;  %v7141_v35 = vld [vmem:[%s9222_s2 + $0x6c8] sm:$0xff]  }
 0x1b3   :  { %6516 = vmatprep.subr.bf16.mxu1 %v7121_v31  ;;  %v1088_v31 = vpack.c.bf16 %v972_v17, %v972_v17 }
 0x1b5   :  { %6495 = vmatpush3.bf16.msra.mxu0 %v7122_v32  ;;  %v7142_v32 = vld [vmem:[%s9222_s2 + $0x608] sm:$0xff]  }
 0x1b6   :  { %6517 = vmatpush3.bf16.msra.mxu1 %v7123_v38  ;;  %6496 = vmatprep.subr.bf16.mxu0 %v7124_v41  ;;  %v7143_v38 = vld [vmem:[%s9222_s2 + $0x688] sm:$0xff]   ;;  %v7144_v41 = vld [vmem:[%s9222_s2 + $0x650] sm:$0xff]  }
 0x1b7   :  { %6518 = vmatprep.subr.bf16.mxu1 %v7125_v42 }
 0x1b9   :  { %6497 = vmatpush3.bf16.msra.mxu0 %v7126_v37  ;;  %v7145_v37 = vld [vmem:[%s9222_s2 + $0x6d0] sm:$0xff]  }
 0x1ba   :  { %6519 = vmatpush3.bf16.msra.mxu1 %v7127_v44  ;;  %6498 = vmatprep.subr.bf16.mxu0 %v7128_v45 }
 0x1bb   :  { %6520 = vmatprep.subr.bf16.mxu1 %v7129_v46 }
 0x1bd   :  { %6499 = vmatpush3.bf16.msra.mxu0 %v7130_v48 }
 0x1be   :  { %6521 = vmatpush3.bf16.msra.mxu1 %v7131_v50  ;;  %6500 = vmatprep.subr.bf16.mxu0 %v7132_v51  ;;  %v7146_v50 = vld [vmem:[%s9222_s2 + $0x610] sm:$0xff]  }
 0x1bf   :  { %v586_v61 = vpop.f32.mrb[16].mxu0  ;;  %6522 = vmatprep.subr.bf16.mxu1 %v7133_v12 }
 0x1c0   :  { %v880_v63 = vmul.f32 2.0, %v586_v61  ;;  %v588_v19 = vpop.f32.mrb[17].mxu0  ;;  %v627_v55 = vpop.f32.mrb[16].mxu1 }
 0x1c1   :  { %v590_v43 = vpop.f32.mrb[18].mxu0  ;;  %6501 = vmatpush3.bf16.msra.mxu0 %v7134_v21  ;;  %v882_v1 = vmul.f32 2.0, %v627_v55  ;;  %v629_v20 = vpop.f32.mrb[17].mxu1  ;;  %v7339_v21 = vld [vmem:[%s9241_s26 + $0x10] sm:$0xff] }
 0x1c2   :  { %v896_v5 = vsub.f32 %v880_v63, %v7337_v56  ;;  %6523 = vmatpush3.bf16.msra.mxu1 %v7135_v53  ;;  %v591_v13 = vpop.f32.mrb[19].mxu0  ;;  %6530 = vmatprep.subr.bf16.mxu0 %v7136_v54  ;;  %v631_v18 = vpop.f32.mrb[18].mxu1  ;;  %v883_v16 = vmul.f32 2.0, %v629_v20  ;;  %v7148_v54 = vld [vmem:[%s9222_s2 + $0x658] sm:$0xff]   ;;  %v881_v63 = vmul.f32 2.0, %v588_v19  ;;  %v7153_v19 = vld [vmem:[%s9222_s2 + $0x6e0] sm:$0xff]  }
 0x1c3   :  { %6552 = vmatprep.subr.bf16.mxu1 %v7137_v62  ;;  %v632_v40 = vpop.f32.mrb[19].mxu1  ;;  %v898_v15 = vsub.f32 %v882_v1, %v7338_v30  ;;  %v7149_v62 = vld [vmem:[%s9222_s2 + $0x6d8] sm:$0xff]   ;;  %v7152_v1 = vld [vmem:[%s9222_s2 + $0x660] sm:$0xff]   ;;  %v7157_v30 = vld [vmem:[%s9222_s2 + $0x6e8] sm:$0xff]  }
 0x1c4   :  { %4581 = vmatmul.mubr.bf16.vlgmr.msra.gmra.mrb[52].mxu0 %v1081_v9  ;;  %1009 = vrot.lane.b32.xlu1 %v896_v5, %s7347_s21  ;;  %v899_v44 = vsub.f32 %v883_v16, %v7455_v4  ;;  %v7147_v4 = vld [vmem:[%s9222_s2 + $0x690] sm:$0xff]   ;;  %v897_v9 = vsub.f32 %v881_v63, %v7453_v3  ;;  %v7154_v18 = vld [vmem:[%s9222_s2 + $0x620] sm:$0xff]   ;;  %v7165_v63 = vld [vmem:[%s9222_s2 + $0x6f8] sm:$0xff]  }
 0x1c5   :  { %4621 = vmatmul.mubr.bf16.vlgmr.msra.gmra.mrb[52].mxu1 %v1083_v25  ;;  %6531 = vmatpush3.bf16.msra.mxu0 %v7138_v6  ;;  %v7151_v6 = vld [vmem:[%s9222_s2 + $0x698] sm:$0xff]   ;;  %v7340_v3 = vld [vmem:[%s9241_s26 + $0x20] sm:$0xff] }
 0x1c6   :  { %4660 = vmatprep.mubr.bf16.mxu0 %v1086_v26  ;;  %6553 = vmatpush3.bf16.msra.mxu1 %v7139_v14  ;;  %v7156_v26 = vld [vmem:[%s9222_s2 + $0x668] sm:$0xff]  }
 0x1c7   :  { %4700 = vmatprep.mubr.bf16.mxu1 %v1088_v31  ;;  %v668_v42 = vpop.f32.mrb[20].mxu0  ;;  %6532 = vmatprep.subr.bf16.mxu0 %v7140_v39 }
 0x1c8   :  { %v884_v45 = vmul.f32 2.0, %v668_v42  ;;  %6554 = vmatprep.subr.bf16.mxu1 %v7141_v35  ;;  %1013 = vrot.lane.b32.xlu0 %v898_v15, %s7347_s21  ;;  %v670_v46 = vpop.f32.mrb[21].mxu0  ;;  %v709_v48 = vpop.f32.mrb[20].mxu1  ;;  %v7159_v42 = vld [vmem:[%s9222_s2 + $0x6a8] sm:$0xff]  }
 0x1c9   :  { %6533 = vmatpush3.bf16.msra.mxu0 %v7142_v32  ;;  %v672_v51 = vpop.f32.mrb[22].mxu0  ;;  %v711_v12 = vpop.f32.mrb[21].mxu1  ;;  %v886_v56 = vmul.f32 2.0, %v709_v48  ;;  %v885_v35 = vmul.f32 2.0, %v670_v46  ;;  %v7341_v32 = vld [vmem:[%s9241_s26 + $0x18] sm:$0xff]  ;;  %v7161_v48 = vld [vmem:[%s9222_s2 + $0x6f0] sm:$0xff]  }
 0x1ca   :  { %v900_v53 = vsub.f32 %v884_v45, %v7339_v21  ;;  %6555 = vmatpush3.bf16.msra.mxu1 %v7143_v38  ;;  %6534 = vmatprep.subr.bf16.mxu0 %v7144_v41  ;;  %v673_v60 = vpop.f32.mrb[23].mxu0  ;;  %v713_v61 = vpop.f32.mrb[22].mxu1  ;;  %v887_v43 = vmul.f32 2.0, %v711_v12  ;;  %v7158_v41 = vld [vmem:[%s9222_s2 + $0x628] sm:$0xff]   ;;  %v7160_v45 = vld [vmem:[%s9222_s2 + $0x670] sm:$0xff]  }
 0x1cb   :  { %6556 = vmatprep.subr.bf16.mxu1 %v7145_v37  ;;  %v714_v7 = vpop.f32.mrb[23].mxu1  ;;  %v902_v38 = vsub.f32 %v886_v56, %v7341_v32  ;;  %v901_v46 = vsub.f32 %v885_v35, %v7471_v10  ;;  %v7162_v10 = vld [vmem:[%s9222_s2 + $0x630] sm:$0xff]   ;;  %v7186_v35 = vld [vmem:[%s9222_s2 + $0x7c8] sm:$0xff]  }
 0x1cc   :  { %v6912_v55 = vpack.i.bf16 %v900_v53, %v899_v44  ;;  %v903_v5 = vsub.f32 %v887_v43, %v7473_v11  ;;  %v7155_v11 = vld [vmem:[%s9222_s2 + $0x6a0] sm:$0xff]   ;;  %v7188_v32 = vld [vmem:[%s9222_s2 + $0x7d0] sm:$0xff]  }
 0x1cd   :  { %6535 = vmatpush3.bf16.msra.mxu0 %v7146_v50 }
 0x1ce   :  { %6557 = vmatpush3.bf16.msra.mxu1 %v7147_v4  ;;  %6913 = vrot.lane.b32.xlu1 %v6912_v55, %s7347_s21  ;;  %v7342_v55 = vld [vmem:[%s9241_s26 + $0x30] sm:$0xff] }
 0x1cf   :  { %6536 = vmatprep.subr.bf16.mxu0 %v7148_v54  ;;  %6558 = vmatprep.subr.bf16.mxu1 %v7149_v62  ;;  %v750_v20 = vpop.f32.mrb[24].mxu0  ;;  %v7163_v54 = vld [vmem:[%s9222_s2 + $0x6b0] sm:$0xff]  }
 0x1d0   :  { %v888_v13 = vmul.f32 2.0, %v750_v20  ;;  %v752_v14 = vpop.f32.mrb[25].mxu0  ;;  %v791_v17 = vpop.f32.mrb[24].mxu1  ;;  %v7343_v20 = vld [vmem:[%s9241_s26 + $0x38] sm:$0xff] }
 0x1d1   :  { %6537 = vmatpush3.bf16.msra.mxu0 %v7150_v29  ;;  %v754_v25 = vpop.f32.mrb[26].mxu0  ;;  %v793_v39 = vpop.f32.mrb[25].mxu1  ;;  %v890_v51 = vmul.f32 2.0, %v791_v17 }
 0x1d2   :  { %6559 = vmatpush3.bf16.msra.mxu1 %v7151_v6  ;;  %1011 = vrot.lane.b32.xlu1 %v897_v9, %s7347_s21  ;;  %v904_v40 = vsub.f32 %v888_v13, %v7340_v3  ;;  %v755_v15 = vpop.f32.mrb[27].mxu0  ;;  %v795_v16 = vpop.f32.mrb[26].mxu1  ;;  %v891_v44 = vmul.f32 2.0, %v793_v39  ;;  %v7344_v13 = vld [vmem:[%s9241_s26 + $0x28] sm:$0xff]  ;;  %v7168_v25 = vld [vmem:[%s9222_s2 + $0x740] sm:$0xff]  }
 0x1d3   :  { %6538 = vmatprep.subr.bf16.mxu0 %v7152_v1  ;;  %6560 = vmatprep.subr.bf16.mxu1 %v7153_v19  ;;  %v796_v31 = vpop.f32.mrb[27].mxu1  ;;  %v889_v1 = vmul.f32 2.0, %v752_v14  ;;  %v906_v17 = vsub.f32 %v890_v51, %v7344_v13  ;;  %v7184_v3 = vld [vmem:[%s9222_s2 + $0x7c0] sm:$0xff]   ;;  %v7178_v51 = vld [vmem:[%s9222_s2 + $0x768] sm:$0xff]  }
 0x1d4   :  { %v6917_v37 = vpack.i.bf16 %v904_v40, %v903_v5  ;;  %v907_v12 = vsub.f32 %v891_v44, %v7513_v24  ;;  %v7164_v24 = vld [vmem:[%s9222_s2 + $0x678] sm:$0xff]   ;;  %v969_v40 = vsel %vm960_vm2, %v6901_v0, %v8298_v59  ;;  %v7169_v15 = vld [vmem:[%s9222_s2 + $0x700] sm:$0xff]   ;;  %v7187_v31 = vld [vmem:[%s9222_s2 + $0x788] sm:$0xff]  }
 0x1d5   :  { %6539 = vmatpush3.bf16.msra.mxu0 %v7154_v18  ;;  %v7166_v5 = vld [vmem:[%s9222_s2 + $0x638] sm:$0xff]   ;;  %v1085_v36 = vpack.c.bf16 %v969_v40, %v969_v40  ;;  %v7185_v0 = vld [vmem:[%s9222_s2 + $0x780] sm:$0xff]  }
 0x1d6   :  { %6561 = vmatpush3.bf16.msra.mxu1 %v7155_v11  ;;  %6540 = vmatprep.subr.bf16.mxu0 %v7156_v26  ;;  %v905_v11 = vsub.f32 %v889_v1, %v7511_v23  ;;  %v971_v26 = vsel %vm960_vm2, %v8019_v49, %v6905_v8  ;;  %v7170_v49 = vld [vmem:[%s9222_s2 + $0x748] sm:$0xff]   ;;  %v7190_v44 = vld [vmem:[%s9222_s2 + $0x7d8] sm:$0xff]   ;;  %v7192_v13 = vld [vmem:[%s9222_s2 + $0x840] sm:$0xff]  }
 0x1d7   :  { %6562 = vmatprep.subr.bf16.mxu1 %v7157_v30  ;;  %6918 = vrot.lane.b32.xlu0 %v6917_v37, %s7347_s21  ;;  %v832_v50 = vpop.f32.mrb[28].mxu0  ;;  %v8463_v30 = vpop.permute.xlu0 %954  ;;  %v1087_v59 = vpack.c.bf16 %v971_v26, %v971_v26  ;;  %v7175_v37 = vld [vmem:[%s9222_s2 + $0x718] sm:$0xff]   ;;  %v7208_v26 = vld [vmem:[%s9222_s2 + $0x860] sm:$0xff]  }
 0x1d8   :  { %1021 = vrot.lane.b32.xlu1 %v902_v38, %s7347_s21  ;;  %v892_v21 = vmul.f32 2.0, %v832_v50  ;;  %v834_v53 = vpop.f32.mrb[29].mxu0  ;;  %v873_v4 = vpop.f32.mrb[28].mxu1  ;;  %v974_v23 = vsel %vm960_vm2, %v8463_v30, %v6911_v27  ;;  %v7171_v27 = vld [vmem:[%s9222_s2 + $0x708] sm:$0xff]   ;;  %v7173_v38 = vld [vmem:[%s9222_s2 + $0x710] sm:$0xff]   ;;  %v7194_v50 = vld [vmem:[%s9222_s2 + $0x7e0] sm:$0xff]  }
 0x1d9   :  { %6541 = vmatpush3.bf16.msra.mxu0 %v7158_v41  ;;  %v893_v60 = vmul.f32 2.0, %v834_v53  ;;  %v894_v61 = vmul.f32 2.0, %v873_v4  ;;  %v875_v62 = vpop.f32.mrb[29].mxu1  ;;  %v836_v7 = vpop.f32.mrb[30].mxu0  ;;  %v1090_v16 = vpack.c.bf16 %v974_v23, %v974_v23  ;;  %v7174_v41 = vld [vmem:[%s9222_s2 + $0x758] sm:$0xff]   ;;  %v7198_v53 = vld [vmem:[%s9222_s2 + $0x7e8] sm:$0xff]  }
 0x1da   :  { %6563 = vmatpush3.bf16.msra.mxu1 %v7159_v42  ;;  %6542 = vmatprep.subr.bf16.mxu0 %v7160_v45  ;;  %v908_v29 = vsub.f32 %v892_v21, %v7342_v55  ;;  %v877_v43 = vpop.f32.mrb[30].mxu1  ;;  %v837_v6 = vpop.f32.mrb[31].mxu0  ;;  %v895_v39 = vmul.f32 2.0, %v875_v62  ;;  %v7189_v42 = vld [vmem:[%s9222_s2 + $0x790] sm:$0xff]   ;;  %v7176_v45 = vld [vmem:[%s9222_s2 + $0x760] sm:$0xff]   ;;  %v7179_v21 = vld [vmem:[%s9222_s2 + $0x728] sm:$0xff]  }
 0x1db   :  { %6564 = vmatprep.subr.bf16.mxu1 %v7161_v48  ;;  %1019 = vrot.lane.b32.xlu0 %v901_v46, %s7347_s21  ;;  %v909_v19 = vsub.f32 %v893_v60, %v7551_v33  ;;  %v910_v9 = vsub.f32 %v894_v61, %v7343_v20  ;;  %v878_v56 = vpop.f32.mrb[31].mxu1  ;;  %v7167_v33 = vld [vmem:[%s9222_s2 + $0x6b8] sm:$0xff]   ;;  %v7177_v48 = vld [vmem:[%s9222_s2 + $0x720] sm:$0xff]   ;;  %v7180_v4 = vld [vmem:[%s9222_s2 + $0x770] sm:$0xff]  }
 0x1dc   :  { %v6922_v18 = vpack.i.bf16 %v908_v29, %v907_v12  ;;  %v911_v8 = vsub.f32 %v895_v39, %v7553_v34  ;;  %v7172_v34 = vld [vmem:[%s9222_s2 + $0x750] sm:$0xff]   ;;  %v7191_v46 = vld [vmem:[%s9222_s2 + $0x798] sm:$0xff]   ;;  %v7195_v12 = vld [vmem:[%s9222_s2 + $0x7a0] sm:$0xff]  }
 0x1dd   :  { %6543 = vmatpush3.bf16.msra.mxu0 %v7162_v10  ;;  %v6927_v14 = vpack.i.bf16 %v910_v9, %v909_v19  ;;  %v7202_v62 = vld [vmem:[%s9222_s2 + $0x7f0] sm:$0xff]   ;;  %v7182_v29 = vld [vmem:[%s9222_s2 + $0x778] sm:$0xff]   ;;  %v7213_v23 = vld [vmem:[%s9222_s2 + $0x828] sm:$0xff]  }
 0x1de   :  { %6565 = vmatpush3.bf16.msra.mxu1 %v7163_v54  ;;  %6544 = vmatprep.subr.bf16.mxu0 %v7164_v24  ;;  %v7199_v54 = vld [vmem:[%s9222_s2 + $0x7a8] sm:$0xff]   ;;  %v7181_v7 = vld [vmem:[%s9222_s2 + $0x730] sm:$0xff]   ;;  %v7206_v56 = vld [vmem:[%s9222_s2 + $0x7f8] sm:$0xff]  }
 0x1df   :  { %6566 = vmatprep.subr.bf16.mxu1 %v7165_v63  ;;  %6923 = vrot.lane.b32.xlu1 %v6922_v18, %s7347_s21  ;;  %v7203_v20 = vld [vmem:[%s9222_s2 + $0x7b0] sm:$0xff]   ;;  %v7207_v18 = vld [vmem:[%s9222_s2 + $0x7b8] sm:$0xff]  }
 0x1e0   :  { %1029 = vrot.lane.b32.xlu0 %v906_v17, %s7347_s21  ;;  %v973_v17 = vsel %vm960_vm2, %v6906_v58, %v8463_v30  ;;  %v7197_v58 = vld [vmem:[%s9222_s2 + $0x808] sm:$0xff]   ;;  %v7200_v39 = vld [vmem:[%s9222_s2 + $0x850] sm:$0xff]   ;;  %v7204_v40 = vld [vmem:[%s9222_s2 + $0x858] sm:$0xff]  }
 0x1e1   :  { %6545 = vmatpush3.bf16.msra.mxu0 %v7166_v5  ;;  %v7183_v5 = vld [vmem:[%s9222_s2 + $0x738] sm:$0xff]   ;;  %v7209_v30 = vld [vmem:[%s9222_s2 + $0x820] sm:$0xff]  }
 0x1e2   :  { %6567 = vmatpush3.bf16.msra.mxu1 %v7167_v33  ;;  %6574 = vmatprep.subr.bf16.mxu0 %v7168_v25  ;;  %v7210_v33 = vld [vmem:[%s9222_s2 + $0x8c0] sm:$0xff]   ;;  %v1089_v25 = vpack.c.bf16 %v973_v17, %v973_v17 }
 0x1e3   :  { %1027 = vrot.lane.b32.xlu1 %v905_v11, %s7347_s21  ;;  %6596 = vmatprep.subr.bf16.mxu1 %v7184_v3  ;;  %v7201_v3 = vld [vmem:[%s9222_s2 + $0x810] sm:$0xff]   ;;  %v7205_v11 = vld [vmem:[%s9222_s2 + $0x818] sm:$0xff]  }
 0x1e4   :  { %4661 = vmatmul.mubr.bf16.vlgmr.msra.gmra.mrb[56].mxu0 %v1085_v36  ;;  %6928 = vrot.lane.b32.xlu0 %v6927_v14, %s7347_s21  ;;  %v7193_v14 = vld [vmem:[%s9222_s2 + $0x800] sm:$0xff]   ;;  %v7216_v36 = vld [vmem:[%s9222_s2 + $0x870] sm:$0xff]  }
 0x1e5   :  { %4701 = vmatmul.mubr.bf16.vlgmr.msra.gmra.mrb[56].mxu1 %v1087_v59  ;;  %6575 = vmatpush3.bf16.msra.mxu0 %v7169_v15  ;;  %v7212_v15 = vld [vmem:[%s9222_s2 + $0x868] sm:$0xff]  }
 0x1e6   :  { %4740 = vmatprep.mubr.bf16.mxu0 %v1090_v16  ;;  %6576 = vmatprep.subr.bf16.mxu0 %v7170_v49 }
 0x1e7   :  { %1039 = vrot.lane.b32.xlu1 %v911_v8, %s7347_s21  ;;  %6597 = vmatpush3.bf16.msra.mxu1 %v7185_v0 }
 0x1e8   :  { %6598 = vmatprep.subr.bf16.mxu1 %v7186_v35  ;;  %v7217_v35 = vld [vmem:[%s9222_s2 + $0x830] sm:$0xff]  }
 0x1e9   :  { %6577 = vmatpush3.bf16.msra.mxu0 %v7171_v27 }
 0x1ea   :  { %6578 = vmatprep.subr.bf16.mxu0 %v7172_v34 }
 0x1eb   :  { %6599 = vmatpush3.bf16.msra.mxu1 %v7187_v31 }
 0x1ec   :  { %6600 = vmatprep.subr.bf16.mxu1 %v7188_v32 }
 0x1ed   :  { %6579 = vmatpush3.bf16.msra.mxu0 %v7173_v38  ;;  %v7220_v38 = vld [vmem:[%s9222_s2 + $0x878] sm:$0xff]  }
 0x1ee   :  { %6580 = vmatprep.subr.bf16.mxu0 %v7174_v41 }
 0x1ef   :  { %6601 = vmatpush3.bf16.msra.mxu1 %v7189_v42 }
 0x1f0   :  { %6602 = vmatprep.subr.bf16.mxu1 %v7190_v44  ;;  %v7221_v44 = vld [vmem:[%s9222_s2 + $0x838] sm:$0xff]  }
 0x1f1   :  { %6581 = vmatpush3.bf16.msra.mxu0 %v7175_v37 }
 0x1f2   :  { %6582 = vmatprep.subr.bf16.mxu0 %v7176_v45  ;;  %v7224_v45 = vld [vmem:[%s9222_s2 + $0x940] sm:$0xff]  }
 0x1f3   :  { %6603 = vmatpush3.bf16.msra.mxu1 %v7191_v46 }
 0x1f4   :  { %6604 = vmatprep.subr.bf16.mxu1 %v7194_v50 }
 0x1f5   :  { %6583 = vmatpush3.bf16.msra.mxu0 %v7177_v48 }
 0x1f6   :  { %6584 = vmatprep.subr.bf16.mxu0 %v7178_v51 }
 0x1f7   :  { %v6282_v10 = vpop.f32.mrb[32].mxu0  ;;  %6605 = vmatpush3.bf16.msra.mxu1 %v7195_v12 }
 0x1f8   :  { %v6304_v60 = vpop.f32.mrb[32].mxu1  ;;  %v6283_v61 = vpop.f32.mrb[33].mxu0  ;;  %6606 = vmatprep.subr.bf16.mxu1 %v7198_v53  ;;  %v7211_v53 = vld [vmem:[%s9222_s2 + $0x880] sm:$0xff]  }
 0x1f9   :  { %6585 = vmatpush3.bf16.msra.mxu0 %v7179_v21  ;;  %v6284_v24 = vadd.f32 %v6283_v61, %v6282_v10  ;;  %v6305_v63 = vpop.f32.mrb[33].mxu1  ;;  %v6285_v55 = vpop.f32.mrb[34].mxu0 }
 0x1fa   :  { %6586 = vmatprep.subr.bf16.mxu0 %v7180_v4  ;;  %v6306_v43 = vadd.f32 %v6305_v63, %v6304_v60  ;;  %v6307_v6 = vpop.f32.mrb[34].mxu1  ;;  %v6286_v1 = vpop.f32.mrb[35].mxu0  ;;  %v1091_v4 = vpack.c.bf16 %v8053_v57, %v8053_v57  ;;  %v7214_v60 = vld [vmem:[%s9222_s2 + $0x8c8] sm:$0xff]   ;;  %v7218_v55 = vld [vmem:[%s9222_s2 + $0x8d0] sm:$0xff]  }
 0x1fb   :  { %v6308_v19 = vpop.f32.mrb[35].mxu1  ;;  %6607 = vmatpush3.bf16.msra.mxu1 %v7199_v54 }
 0x1fc   :  { %v4223_v9 = vadd.f32 %v6306_v43, %v6284_v24  ;;  %6608 = vmatprep.subr.bf16.mxu1 %v7202_v62  ;;  %v7215_v24 = vld [vmem:[%s9222_s2 + $0x888] sm:$0xff]   ;;  %v7219_v43 = vld [vmem:[%s9222_s2 + $0x890] sm:$0xff]   ;;  %v7222_v19 = vld [vmem:[%s9222_s2 + $0x8d8] sm:$0xff]  }
 0x1fd   :  { %6587 = vmatpush3.bf16.msra.mxu0 %v7181_v7 }
 0x1fe   :  { %6588 = vmatprep.subr.bf16.mxu0 %v7182_v29 }
 0x1ff   :  { %6609 = vmatpush3.bf16.msra.mxu1 %v7203_v20 }
 0x200   :  { %6610 = vmatprep.subr.bf16.mxu1 %v7206_v56 }
 0x201   :  { %6589 = vmatpush3.bf16.msra.mxu0 %v7183_v5  ;;  %v7223_v5 = vld [vmem:[%s9222_s2 + $0x898] sm:$0xff]  }
 0x202   :  { %6618 = vmatprep.subr.bf16.mxu0 %v7192_v13 }
 0x203   :  { %6611 = vmatpush3.bf16.msra.mxu1 %v7207_v18 }
 0x204   :  { %4741 = vmatmul.mubr.bf16.vlgmr.msra.gmra.mrb[60].mxu0 %v1089_v25  ;;  %6640 = vmatprep.subr.bf16.mxu1 %v7210_v33  ;;  %v7226_v33 = vld [vmem:[%s9222_s2 + $0x8e0] sm:$0xff]  }
 0x205   :  { %6619 = vmatpush3.bf16.msra.mxu0 %v7193_v14 }
 0x206   :  { %6620 = vmatprep.subr.bf16.mxu0 %v7196_v47  ;;  %v7225_v47 = vld [vmem:[%s9222_s2 + $0x900] sm:$0xff]  }
 0x209   :  { %6621 = vmatpush3.bf16.msra.mxu0 %v7197_v58  ;;  %v7228_v58 = vld [vmem:[%s9222_s2 + $0x948] sm:$0xff]  }
 0x20a   :  { %6622 = vmatprep.subr.bf16.mxu0 %v7200_v39  ;;  %v7227_v39 = vld [vmem:[%s9222_s2 + $0x8a0] sm:$0xff]  }
 0x20d   :  { %6623 = vmatpush3.bf16.msra.mxu0 %v7201_v3  ;;  %v7230_v3 = vld [vmem:[%s9222_s2 + $0x8e8] sm:$0xff]  }
 0x20e   :  { %6624 = vmatprep.subr.bf16.mxu0 %v7204_v40 }
 0x211   :  { %6625 = vmatpush3.bf16.msra.mxu0 %v7205_v11  ;;  %v7229_v11 = vld [vmem:[%s9222_s2 + $0x908] sm:$0xff]  }
 0x212   :  { %6626 = vmatprep.subr.bf16.mxu0 %v7208_v26  ;;  %v7232_v26 = vld [vmem:[%s9222_s2 + $0x950] sm:$0xff]  }
 0x215   :  { %6627 = vmatpush3.bf16.msra.mxu0 %v7209_v30 }
 0x216   :  { %6628 = vmatprep.subr.bf16.mxu0 %v7212_v15  ;;  %v7231_v15 = vld [vmem:[%s9222_s2 + $0x8a8] sm:$0xff]  }
 0x217   :  { %v6326_v49 = vpop.f32.mrb[36].mxu0 }
 0x218   :  { %v6327_v0 = vpop.f32.mrb[37].mxu0  ;;  %v6348_v59 = vpop.f32.mrb[36].mxu1 }
 0x219   :  { %v6328_v8 = vadd.f32 %v6327_v0, %v6326_v49  ;;  %v6349_v16 = vpop.f32.mrb[37].mxu1  ;;  %v6329_v27 = vpop.f32.mrb[38].mxu0  ;;  %6629 = vmatpush3.bf16.msra.mxu0 %v7213_v23  ;;  %v7234_v23 = vld [vmem:[%s9222_s2 + $0x8f0] sm:$0xff]  }
 0x21a   :  { %v6350_v34 = vadd.f32 %v6349_v16, %v6348_v59  ;;  %v6330_v31 = vpop.f32.mrb[39].mxu0  ;;  %v6351_v32 = vpop.f32.mrb[38].mxu1  ;;  %6630 = vmatprep.subr.bf16.mxu0 %v7216_v36  ;;  %v7233_v49 = vld [vmem:[%s9222_s2 + $0x910] sm:$0xff]   ;;  %v7238_v27 = vld [vmem:[%s9222_s2 + $0x8f8] sm:$0xff]  }
 0x21b   :  { %v4263_v41 = vadd.f32 %v6328_v8, %v4223_v9  ;;  %v6352_v42 = vpop.f32.mrb[39].mxu1  ;;  %v7236_v8 = vld [vmem:[%s9222_s2 + $0x958] sm:$0xff]   ;;  %v7235_v16 = vld [vmem:[%s9222_s2 + $0x8b0] sm:$0xff]   ;;  %v7240_v32 = vld [vmem:[%s9222_s2 + $0x960] sm:$0xff]  }
 0x21d   :  { %v4303_v37 = vadd.f32 %v6350_v34, %v4263_v41  ;;  %6631 = vmatpush3.bf16.msra.mxu0 %v7217_v35  ;;  %v7237_v35 = vld [vmem:[%s9222_s2 + $0x918] sm:$0xff]   ;;  %v7242_v41 = vld [vmem:[%s9222_s2 + $0x9c0] sm:$0xff]  }
 0x21e   :  { %6632 = vmatprep.subr.bf16.mxu0 %v7220_v38  ;;  %v7239_v38 = vld [vmem:[%s9222_s2 + $0x8b8] sm:$0xff]  }
 0x221   :  { %6633 = vmatpush3.bf16.msra.mxu0 %v7221_v44  ;;  %v7241_v44 = vld [vmem:[%s9222_s2 + $0x920] sm:$0xff]  }
 0x222   :  { %6662 = vmatprep.subr.bf16.mxu0 %v7224_v45 }
 0x236   :  { %v1010_v46 = vpop.permute.xlu1 %1009 }
 0x237   :  { %v1075_v48 = vsel %vm1041_vm3, %v6910_v28, %v1010_v46  ;;  %v6370_v50 = vpop.f32.mrb[40].mxu0 }
 0x238   :  { %v1092_v51 = vpack.c.bf16 %v1075_v48, %v1075_v48  ;;  %v6371_v12 = vpop.f32.mrb[41].mxu0  ;;  %v6392_v21 = vpop.f32.mrb[40].mxu1 }
 0x239   :  { %v6372_v10 = vadd.f32 %v6371_v12, %v6370_v50  ;;  %v6393_v54 = vpop.f32.mrb[41].mxu1  ;;  %v6373_v52 = vpop.f32.mrb[42].mxu0  ;;  %v7243_v12 = vld [vmem:[%s9222_s2 + $0x980] sm:$0xff]  }
 0x23a   :  { %v6394_v61 = vadd.f32 %v6393_v54, %v6392_v21  ;;  %4780 = vmatprep.mubr.bf16.mxu1 %v1092_v51  ;;  %v6374_v28 = vpop.f32.mrb[43].mxu0  ;;  %v6395_v7 = vpop.f32.mrb[42].mxu1  ;;  %v7246_v54 = vld [vmem:[%s9222_s2 + $0x9c8] sm:$0xff]  }
 0x23b   :  { %v4343_v62 = vadd.f32 %v6372_v10, %v4303_v37  ;;  %4781 = vmatmul.mubr.bf16.vlgmr.msra.gmra.mrb[60].mxu1 %v1091_v4  ;;  %v6396_v63 = vpop.f32.mrb[43].mxu1  ;;  %v1014_v20 = vpop.permute.xlu0 %1013 }
 0x23c   :  { %6641 = vmatpush3.bf16.msra.mxu1 %v7211_v53 }
 0x23d   :  { %v8636_v57 = vadd.f32 %v6394_v61, %v4343_v62  ;;  %6642 = vmatprep.subr.bf16.mxu1 %v7214_v60  ;;  %v7245_v61 = vld [vmem:[%s9222_s2 + $0x928] sm:$0xff]  }
 0x240   :  { %6643 = vmatpush3.bf16.msra.mxu1 %v7215_v24  ;;  %v8641_v29 = vpop.permute.xlu1 %6913  ;;  %v7248_v24 = vld [vmem:[%s9222_s2 + $0x970] sm:$0xff]  }
 0x241   :  { %v6916_v6 = vunpack.i.h.bf16 %v8641_v29  ;;  %v6915_v1 = vunpack.i.l.bf16 %v8641_v29  ;;  %6644 = vmatprep.subr.bf16.mxu1 %v7218_v55  ;;  %v7247_v55 = vld [vmem:[%s9222_s2 + $0x988] sm:$0xff]  }
 0x242   :  { %v7260_v29 = vld [vmem:[%s9222_s2 + $0xa48] sm:$0xff]  }
 0x243   :  { %v1045_v9 = vsel %vm1041_vm3, %v6915_v1, %v6916_v6  ;;  %v1044_v37 = vsel %vm1041_vm3, %v1014_v20, %v6915_v1  ;;  %v7249_v1 = vld [vmem:[%s9222_s2 + $0x930] sm:$0xff]  }
 0x244   :  { %6645 = vmatpush3.bf16.msra.mxu1 %v7219_v43  ;;  %v1012_v56 = vpop.permute.xlu1 %1011  ;;  %v1096_v13 = vpack.c.bf16 %v1045_v9, %v1045_v9  ;;  %v1095_v53 = vpack.c.bf16 %v1044_v37, %v1044_v37  ;;  %v7273_v37 = vld [vmem:[%s9222_s2 + $0xa20] sm:$0xff]  }
 0x245   :  { %v1042_v17 = vsel %vm1041_vm3, %v1010_v46, %v1012_v56  ;;  %v1043_v18 = vsel %vm1041_vm3, %v1012_v56, %v1014_v20  ;;  %6646 = vmatprep.subr.bf16.mxu1 %v7222_v19  ;;  %v7244_v46 = vld [vmem:[%s9222_s2 + $0x968] sm:$0xff]   ;;  %v7252_v19 = vld [vmem:[%s9222_s2 + $0x978] sm:$0xff]   ;;  %v7251_v20 = vld [vmem:[%s9222_s2 + $0x990] sm:$0xff]  }
 0x246   :  { %v1093_v14 = vpack.c.bf16 %v1042_v17, %v1042_v17  ;;  %v1094_v25 = vpack.c.bf16 %v1043_v18, %v1043_v18  ;;  %4860 = vmatprep.mubr.bf16.mxu1 %v1096_v13  ;;  %v7253_v13 = vld [vmem:[%s9222_s2 + $0x938] sm:$0xff]   ;;  %v7256_v17 = vld [vmem:[%s9222_s2 + $0xa40] sm:$0xff]  }
 0x248   :  { %6647 = vmatpush3.bf16.msra.mxu1 %v7223_v5  ;;  %4820 = vmatprep.mubr.bf16.mxu0 %v1094_v25  ;;  %v7254_v5 = vld [vmem:[%s9222_s2 + $0x9d8] sm:$0xff]   ;;  %v7258_v25 = vld [vmem:[%s9222_s2 + $0x9e0] sm:$0xff]  }
 0x249   :  { %4821 = vmatmul.mubr.bf16.vlgmr.msra.gmra.mrb[64].mxu0 %v1093_v14  ;;  %6648 = vmatprep.subr.bf16.mxu1 %v7226_v33  ;;  %v8674_v40 = vpop.permute.xlu0 %6918  ;;  %v7255_v14 = vld [vmem:[%s9222_s2 + $0x998] sm:$0xff]  }
 0x24a   :  { %6663 = vmatpush3.bf16.msra.mxu0 %v7225_v47  ;;  %v8682_v30 = vpop.permute.xlu1 %1021  ;;  %v6921_v34 = vunpack.i.h.bf16 %v8674_v40  ;;  %v6920_v31 = vunpack.i.l.bf16 %v8674_v40  ;;  %v7257_v47 = vld [vmem:[%s9222_s2 + $0xa00] sm:$0xff]   ;;  %v7292_v40 = vld [vmem:[%s9222_s2 + $0xb48] sm:$0xff]  }
 0x24b   :  { %6664 = vmatprep.subr.bf16.mxu0 %v7228_v58 }
 0x24c   :  { %6649 = vmatpush3.bf16.msra.mxu1 %v7227_v39  ;;  %v1049_v42 = vsel %vm1041_vm3, %v6920_v31, %v6921_v34 }
 0x24d   :  { %6650 = vmatprep.subr.bf16.mxu1 %v7230_v3  ;;  %v8690_v36 = vpop.permute.xlu0 %1019  ;;  %v1100_v21 = vpack.c.bf16 %v1049_v42, %v1049_v42  ;;  %v7262_v3 = vld [vmem:[%s9222_s2 + $0x9e8] sm:$0xff]   ;;  %v1048_v42 = vsel %vm1041_vm3, %v8682_v30, %v6920_v31 }
 0x24e   :  { %6665 = vmatpush3.bf16.msra.mxu0 %v7229_v11  ;;  %v1047_v0 = vsel %vm1041_vm3, %v8690_v36, %v8682_v30  ;;  %v1046_v33 = vsel %vm1041_vm3, %v6916_v6, %v8690_v36  ;;  %v7259_v6 = vld [vmem:[%s9222_s2 + $0x9a0] sm:$0xff]   ;;  %v7261_v11 = vld [vmem:[%s9222_s2 + $0xa08] sm:$0xff]   ;;  %v7265_v36 = vld [vmem:[%s9222_s2 + $0xa10] sm:$0xff]   ;;  %v1099_v30 = vpack.c.bf16 %v1048_v42, %v1048_v42 }
 0x24f   :  { %6666 = vmatprep.subr.bf16.mxu0 %v7232_v26  ;;  %v1098_v59 = vpack.c.bf16 %v1047_v0, %v1047_v0  ;;  %v1097_v39 = vpack.c.bf16 %v1046_v33, %v1046_v33  ;;  %v7264_v26 = vld [vmem:[%s9222_s2 + $0xa50] sm:$0xff]  }
 0x250   :  { %6651 = vmatpush3.bf16.msra.mxu1 %v7231_v15  ;;  %v7263_v15 = vld [vmem:[%s9222_s2 + $0x9a8] sm:$0xff]   ;;  %v7267_v0 = vld [vmem:[%s9222_s2 + $0x9b0] sm:$0xff]  }
 0x251   :  { %6652 = vmatprep.subr.bf16.mxu1 %v7234_v23  ;;  %4900 = vmatprep.mubr.bf16.mxu0 %v1098_v59  ;;  %v8733_v48 = vpop.permute.xlu1 %6923  ;;  %v7266_v23 = vld [vmem:[%s9222_s2 + $0x9f0] sm:$0xff]  }
 0x252   :  { %6667 = vmatpush3.bf16.msra.mxu0 %v7233_v49  ;;  %v8765_v9 = vpop.permute.xlu0 %1029  ;;  %v7268_v49 = vld [vmem:[%s9222_s2 + $0xa58] sm:$0xff]   ;;  %v6926_v59 = vunpack.i.h.bf16 %v8733_v48 }
 0x253   :  { %6668 = vmatprep.subr.bf16.mxu0 %v7236_v8  ;;  %v7270_v8 = vld [vmem:[%s9222_s2 + $0x9f8] sm:$0xff]  }
 0x254   :  { %6653 = vmatpush3.bf16.msra.mxu1 %v7235_v16  ;;  %v7269_v16 = vld [vmem:[%s9222_s2 + $0xa18] sm:$0xff]  }
 0x255   :  { %6654 = vmatprep.subr.bf16.mxu1 %v7238_v27  ;;  %v8767_v56 = vpop.permute.xlu1 %1027  ;;  %v6925_v27 = vunpack.i.l.bf16 %v8733_v48  ;;  %v7317_v48 = vld [vmem:[%s9222_s2 + $0xba8] sm:$0xff]  }
 0x256   :  { %6669 = vmatpush3.bf16.msra.mxu0 %v7237_v35  ;;  %v1051_v18 = vsel %vm1041_vm3, %v8767_v56, %v8765_v9  ;;  %v7272_v35 = vld [vmem:[%s9222_s2 + $0xa60] sm:$0xff]   ;;  %v1050_v33 = vsel %vm1041_vm3, %v6921_v34, %v8767_v56  ;;  %v7294_v56 = vld [vmem:[%s9222_s2 + $0xae8] sm:$0xff]  }
 0x257   :  { %v6414_v45 = vpop.f32.mrb[44].mxu0  ;;  %6670 = vmatprep.subr.bf16.mxu0 %v7240_v32  ;;  %v1102_v58 = vpack.c.bf16 %v1051_v18, %v1051_v18  ;;  %v7271_v32 = vld [vmem:[%s9222_s2 + $0x9b8] sm:$0xff]   ;;  %v7291_v34 = vld [vmem:[%s9222_s2 + $0xaa0] sm:$0xff]  }
 0x258   :  { %6655 = vmatpush3.bf16.msra.mxu1 %v7239_v38  ;;  %v6415_v50 = vpop.f32.mrb[45].mxu0  ;;  %v6436_v51 = vpop.f32.mrb[44].mxu1  ;;  %v7274_v38 = vld [vmem:[%s9222_s2 + $0xac0] sm:$0xff]  }
 0x259   :  { %v6416_v4 = vadd.f32 %v6415_v50, %v6414_v45  ;;  %v6437_v10 = vpop.f32.mrb[45].mxu1  ;;  %6684 = vmatprep.subr.bf16.mxu1 %v7242_v41  ;;  %v6417_v60 = vpop.f32.mrb[46].mxu0  ;;  %v1053_v41 = vsel %vm1041_vm3, %v6925_v27, %v6926_v59  ;;  %v7276_v45 = vld [vmem:[%s9222_s2 + $0xa68] sm:$0xff]  }
 0x25a   :  { %6671 = vmatpush3.bf16.msra.mxu0 %v7241_v44  ;;  %v6438_v52 = vadd.f32 %v6437_v10, %v6436_v51  ;;  %v6439_v28 = vpop.f32.mrb[46].mxu1  ;;  %v6418_v62 = vpop.f32.mrb[47].mxu0  ;;  %v7275_v51 = vld [vmem:[%s9222_s2 + $0xa80] sm:$0xff]  }
 0x25b   :  { %v4423_v7 = vadd.f32 %v6416_v4, %v8636_v57  ;;  %4861 = vmatmul.mubr.bf16.vlgmr.msra.gmra.mrb[64].mxu1 %v1095_v53  ;;  %6672 = vmatprep.subr.bf16.mxu0 %v7244_v46  ;;  %v6440_v63 = vpop.f32.mrb[47].mxu1  ;;  %v7250_v57 = vld [vmem:[%s9222_s2 + $0x9d0] sm:$0xff]   ;;  %v7278_v4 = vld [vmem:[%s9222_s2 + $0xac8] sm:$0xff]  }
 0x25c   :  { %6685 = vmatpush3.bf16.msra.mxu1 %v7243_v12  ;;  %4940 = vmatprep.mubr.bf16.mxu1 %v1100_v21  ;;  %v1104_v12 = vpack.c.bf16 %v1053_v41, %v1053_v41  ;;  %v7280_v62 = vld [vmem:[%s9222_s2 + $0xa70] sm:$0xff]   ;;  %v7307_v41 = vld [vmem:[%s9222_s2 + $0xb68] sm:$0xff]  }
 0x25d   :  { %v8751_v43 = vadd.f32 %v6438_v52, %v4423_v7  ;;  %6686 = vmatprep.subr.bf16.mxu1 %v7246_v54  ;;  %v7277_v52 = vld [vmem:[%s9222_s2 + $0xa28] sm:$0xff]   ;;  %v7282_v63 = vld [vmem:[%s9222_s2 + $0xad0] sm:$0xff]  }
 0x25e   :  { %6673 = vmatpush3.bf16.msra.mxu0 %v7245_v61  ;;  %v7279_v7 = vld [vmem:[%s9222_s2 + $0xa88] sm:$0xff]  }
 0x25f   :  { %6674 = vmatprep.subr.bf16.mxu0 %v7248_v24 }
 0x260   :  { %6687 = vmatpush3.bf16.msra.mxu1 %v7247_v55  ;;  %v8877_v55 = vpop.permute.xlu0 %6928 }
 0x261   :  { %6688 = vmatprep.subr.bf16.mxu1 %v7250_v57  ;;  %v7284_v57 = vld [vmem:[%s9222_s2 + $0xa78] sm:$0xff]  }
 0x262   :  { %6675 = vmatpush3.bf16.msra.mxu0 %v7249_v1  ;;  %v7283_v1 = vld [vmem:[%s9222_s2 + $0xa90] sm:$0xff]  }
 0x263   :  { %6676 = vmatprep.subr.bf16.mxu0 %v7252_v19  ;;  %v6931_v19 = vunpack.i.h.bf16 %v8877_v55 }
 0x264   :  { %6689 = vmatpush3.bf16.msra.mxu1 %v7251_v20  ;;  %v6930_v20 = vunpack.i.l.bf16 %v8877_v55 }
 0x265   :  { %6690 = vmatprep.subr.bf16.mxu1 %v7254_v5  ;;  %v7286_v5 = vld [vmem:[%s9222_s2 + $0xad8] sm:$0xff]  }
 0x266   :  { %6677 = vmatpush3.bf16.msra.mxu0 %v7253_v13  ;;  %v7285_v13 = vld [vmem:[%s9222_s2 + $0xa38] sm:$0xff]   ;;  %v1055_v18 = vsel %vm1041_vm3, %v6930_v20, %v6931_v19 }
 0x267   :  { %6706 = vmatprep.subr.bf16.mxu0 %v7256_v17  ;;  %v7288_v17 = vld [vmem:[%s9222_s2 + $0xb40] sm:$0xff]  }
 0x268   :  { %6691 = vmatpush3.bf16.msra.mxu1 %v7255_v14  ;;  %v7287_v14 = vld [vmem:[%s9222_s2 + $0xa98] sm:$0xff]  }
 0x269   :  { %4901 = vmatmul.mubr.bf16.vlgmr.msra.gmra.mrb[68].mxu0 %v1097_v39  ;;  %6692 = vmatprep.subr.bf16.mxu1 %v7258_v25  ;;  %v7290_v25 = vld [vmem:[%s9222_s2 + $0xae0] sm:$0xff]   ;;  %v1101_v39 = vpack.c.bf16 %v1050_v33, %v1050_v33 }
 0x26a   :  { %6707 = vmatpush3.bf16.msra.mxu0 %v7257_v47  ;;  %4980 = vmatprep.mubr.bf16.mxu0 %v1102_v58  ;;  %v7289_v47 = vld [vmem:[%s9222_s2 + $0xb00] sm:$0xff]   ;;  %v1106_v58 = vpack.c.bf16 %v1055_v18, %v1055_v18 }
 0x26b   :  { %6708 = vmatprep.subr.bf16.mxu0 %v7260_v29  ;;  %v7293_v29 = vld [vmem:[%s9222_s2 + $0xb08] sm:$0xff]  }
 0x26c   :  { %6693 = vmatpush3.bf16.msra.mxu1 %v7259_v6  ;;  %v7296_v6 = vld [vmem:[%s9222_s2 + $0xb50] sm:$0xff]  }
 0x26d   :  { %6694 = vmatprep.subr.bf16.mxu1 %v7262_v3  ;;  %v7295_v3 = vld [vmem:[%s9222_s2 + $0xaa8] sm:$0xff]  }
 0x26e   :  { %6709 = vmatpush3.bf16.msra.mxu0 %v7261_v11  ;;  %v7298_v11 = vld [vmem:[%s9222_s2 + $0xaf0] sm:$0xff]  }
 0x26f   :  { %6710 = vmatprep.subr.bf16.mxu0 %v7264_v26  ;;  %v7297_v26 = vld [vmem:[%s9222_s2 + $0xb10] sm:$0xff]  }
 0x270   :  { %6695 = vmatpush3.bf16.msra.mxu1 %v7263_v15  ;;  %v7300_v15 = vld [vmem:[%s9222_s2 + $0xb58] sm:$0xff]  }
 0x271   :  { %6696 = vmatprep.subr.bf16.mxu1 %v7266_v23  ;;  %v7299_v23 = vld [vmem:[%s9222_s2 + $0xab0] sm:$0xff]  }
 0x272   :  { %6711 = vmatpush3.bf16.msra.mxu0 %v7265_v36  ;;  %v7302_v36 = vld [vmem:[%s9222_s2 + $0xaf8] sm:$0xff]  }
 0x273   :  { %6712 = vmatprep.subr.bf16.mxu0 %v7268_v49  ;;  %v7301_v49 = vld [vmem:[%s9222_s2 + $0xb18] sm:$0xff]  }
 0x274   :  { %6697 = vmatpush3.bf16.msra.mxu1 %v7267_v0  ;;  %v7304_v0 = vld [vmem:[%s9222_s2 + $0xb60] sm:$0xff]  }
 0x275   :  { %6698 = vmatprep.subr.bf16.mxu1 %v7270_v8  ;;  %v7303_v8 = vld [vmem:[%s9222_s2 + $0xab8] sm:$0xff]  }
 0x276   :  { %6713 = vmatpush3.bf16.msra.mxu0 %v7269_v16  ;;  %v1052_v16 = vsel %vm1041_vm3, %v8765_v9, %v6925_v27  ;;  %v7306_v9 = vld [vmem:[%s9222_s2 + $0xb80] sm:$0xff]  }
 0x277   :  { %v6458_v44 = vpop.f32.mrb[48].mxu0  ;;  %6714 = vmatprep.subr.bf16.mxu0 %v7272_v35  ;;  %v7305_v35 = vld [vmem:[%s9222_s2 + $0xb20] sm:$0xff]   ;;  %v1103_v27 = vpack.c.bf16 %v1052_v16, %v1052_v16 }
 0x278   :  { %v6480_v46 = vpop.f32.mrb[48].mxu1  ;;  %6699 = vmatpush3.bf16.msra.mxu1 %v7271_v32  ;;  %v6459_v50 = vpop.f32.mrb[49].mxu0 }
 0x279   :  { %v6460_v31 = vadd.f32 %v6459_v50, %v6458_v44  ;;  %v6481_v21 = vpop.f32.mrb[49].mxu1  ;;  %v6461_v53 = vpop.f32.mrb[50].mxu0  ;;  %6728 = vmatprep.subr.bf16.mxu1 %v7274_v38 }
 0x27a   :  { %v6482_v10 = vadd.f32 %v6481_v21, %v6480_v46  ;;  %v6483_v54 = vpop.f32.mrb[50].mxu1  ;;  %6715 = vmatpush3.bf16.msra.mxu0 %v7273_v37  ;;  %v6462_v60 = vpop.f32.mrb[51].mxu0 }
 0x27b   :  { %v4503_v61 = vadd.f32 %v6460_v31, %v8751_v43  ;;  %v6484_v28 = vpop.f32.mrb[51].mxu1  ;;  %4941 = vmatmul.mubr.bf16.vlgmr.msra.gmra.mrb[68].mxu1 %v1099_v30  ;;  %6716 = vmatprep.subr.bf16.mxu0 %v7276_v45  ;;  %v7281_v43 = vld [vmem:[%s9222_s2 + $0xa30] sm:$0xff]   ;;  %v8966_v32 = vpop.permute.xlu1 %1039  ;;  %v7308_v31 = vld [vmem:[%s9222_s2 + $0xb28] sm:$0xff]  }
 0x27c   :  { %6729 = vmatpush3.bf16.msra.mxu1 %v7275_v51  ;;  %5020 = vmatprep.mubr.bf16.mxu1 %v1104_v12  ;;  %v1108_v50 = vpack.c.bf16 %v8966_v32, %v8966_v32  ;;  %v7311_v60 = vld [vmem:[%s9222_s2 + $0xb30] sm:$0xff]   ;;  %v7314_v28 = vld [vmem:[%s9222_s2 + $0xb38] sm:$0xff]  }
 0x27d   :  { %v8872_v24 = vadd.f32 %v6482_v10, %v4503_v61  ;;  %6730 = vmatprep.subr.bf16.mxu1 %v7278_v4  ;;  %v7310_v4 = vld [vmem:[%s9222_s2 + $0xb70] sm:$0xff]   ;;  %v7309_v10 = vld [vmem:[%s9222_s2 + $0xb88] sm:$0xff]  }
 0x27e   :  { %6717 = vmatpush3.bf16.msra.mxu0 %v7277_v52  ;;  %v7313_v52 = vld [vmem:[%s9222_s2 + $0xb78] sm:$0xff]   ;;  %v7312_v61 = vld [vmem:[%s9222_s2 + $0xb90] sm:$0xff]  }
 0x27f   :  { %6718 = vmatprep.subr.bf16.mxu0 %v7280_v62  ;;  %v1054_v62 = vsel %vm1041_vm3, %v6926_v59, %v6930_v20  ;;  %v7318_v59 = vld [vmem:[%s9222_s2 + $0xbb0] sm:$0xff]  }
 0x280   :  { %6731 = vmatpush3.bf16.msra.mxu1 %v7279_v7  ;;  %v7315_v7 = vld [vmem:[%s9222_s2 + $0xb98] sm:$0xff]  }
 0x281   :  { %6732 = vmatprep.subr.bf16.mxu1 %v7282_v63  ;;  %v7316_v63 = vld [vmem:[%s9222_s2 + $0xba0] sm:$0xff]  }
 0x282   :  { %6719 = vmatpush3.bf16.msra.mxu0 %v7281_v43  ;;  %v7319_v43 = vld [vmem:[%s9222_s2 + $0xbb8] sm:$0xff]  }
 0x283   :  { %6720 = vmatprep.subr.bf16.mxu0 %v7284_v57 }
 0x284   :  { %6733 = vmatpush3.bf16.msra.mxu1 %v7283_v1 }
 0x285   :  { %6734 = vmatprep.subr.bf16.mxu1 %v7286_v5  ;;  %v7320_v5 = vld [vmem:[%s9222_s2 + $0xbc0] sm:$0xff]  }
 0x286   :  { %6721 = vmatpush3.bf16.msra.mxu0 %v7285_v13 }
 0x287   :  { %6750 = vmatprep.subr.bf16.mxu0 %v7288_v17 }
 0x288   :  { %6735 = vmatpush3.bf16.msra.mxu1 %v7287_v14 }
 0x289   :  { %4981 = vmatmul.mubr.bf16.vlgmr.msra.gmra.mrb[72].mxu0 %v1101_v39  ;;  %6736 = vmatprep.subr.bf16.mxu1 %v7290_v25  ;;  %v7321_v39 = vld [vmem:[%s9222_s2 + $0xbc8] sm:$0xff]  }
 0x28a   :  { %6751 = vmatpush3.bf16.msra.mxu0 %v7289_v47  ;;  %5060 = vmatprep.mubr.bf16.mxu0 %v1106_v58 }
 0x28b   :  { %6752 = vmatprep.subr.bf16.mxu0 %v7292_v40 }
 0x28c   :  { %6737 = vmatpush3.bf16.msra.mxu1 %v7291_v34  ;;  %v7322_v34 = vld [vmem:[%s9222_s2 + $0xbd0] sm:$0x3f]  }
 0x28d   :  { %6738 = vmatprep.subr.bf16.mxu1 %v7294_v56  ;;  %v4146_v56 = vsel %vm4144_vm5, %v7322_v34, 0  ;;  %v6233_v34 = vld [vmem:[%s9224_s4] ss:$0 sm:$0xff] }
 0x28e   :  { %6753 = vmatpush3.bf16.msra.mxu0 %v7293_v29  ;;  %v1056_v29 = vsel %vm1041_vm3, %v6931_v19, %v8966_v32 }
 0x28f   :  { %6754 = vmatprep.subr.bf16.mxu0 %v7296_v6  ;;  %v1107_v6 = vpack.c.bf16 %v1056_v29, %v1056_v29 }
 0x290   :  { %6739 = vmatpush3.bf16.msra.mxu1 %v7295_v3 }
 0x291   :  { %6740 = vmatprep.subr.bf16.mxu1 %v7298_v11 }
 0x292   :  { %6755 = vmatpush3.bf16.msra.mxu0 %v7297_v26 }
 0x293   :  { %6756 = vmatprep.subr.bf16.mxu0 %v7300_v15 }
 0x294   :  { %6741 = vmatpush3.bf16.msra.mxu1 %v7299_v23 }
 0x295   :  { %6742 = vmatprep.subr.bf16.mxu1 %v7302_v36 }
 0x296   :  { %6757 = vmatpush3.bf16.msra.mxu0 %v7301_v49 }
 0x297   :  { %v6502_v38 = vpop.f32.mrb[52].mxu0  ;;  %6758 = vmatprep.subr.bf16.mxu0 %v7304_v0 }
 0x298   :  { %v6524_v42 = vpop.f32.mrb[52].mxu1  ;;  %6743 = vmatpush3.bf16.msra.mxu1 %v7303_v8  ;;  %v6503_v37 = vpop.f32.mrb[53].mxu0 }
 0x299   :  { %v6504_v44 = vadd.f32 %v6503_v37, %v6502_v38  ;;  %v6525_v45 = vpop.f32.mrb[53].mxu1  ;;  %v6505_v46 = vpop.f32.mrb[54].mxu0  ;;  %5068 = vmatprep.subr.bf16.mxu1 %v7345_v2  ;;  %v7348_v37 = vmov 0.0  }
 0x29a   :  { %v6526_v51 = vadd.f32 %v6525_v45, %v6524_v42  ;;  %v6527_v12 = vpop.f32.mrb[54].mxu1  ;;  %6759 = vmatpush3.bf16.msra.mxu0 %v7305_v35  ;;  %v6506_v30 = vpop.f32.mrb[55].mxu0 }
 0x29b   :  { %v4583_v21 = vadd.f32 %v6504_v44, %v8872_v24  ;;  %v6528_v53 = vpop.f32.mrb[55].mxu1  ;;  %5021 = vmatmul.mubr.bf16.vlgmr.msra.gmra.mrb[72].mxu1 %v1103_v27  ;;  %6760 = vmatprep.subr.bf16.mxu0 %v7307_v41  ;;  %v1105_v24 = vpack.c.bf16 %v1054_v62, %v1054_v62 }
 0x29c   :  { %5069 = vmatpush1.bf16.msra.mxu1 %v7306_v9  ;;  %6231 = vmatprep.mubr.msk.bf16.mxu1 %vm4140_vm4, %v1108_v50 }
 0x29d   :  { %v4623_v54 = vadd.f32 %v6526_v51, %v4583_v21  ;;  %5070 = vmatprep.subr.bf16.mxu1 %v7345_v2 }
 0x29e   :  { %6761 = vmatpush3.bf16.msra.mxu0 %v7308_v31 }
 0x29f   :  { %6762 = vmatprep.subr.bf16.mxu0 %v7310_v4 }
 0x2a0   :  { %5071 = vmatpush1.bf16.msra.mxu1 %v7309_v10 }
 0x2a1   :  { %5072 = vmatprep.subr.bf16.mxu1 %v7345_v2 }
 0x2a2   :  { %6763 = vmatpush3.bf16.msra.mxu0 %v7311_v60 }
 0x2a3   :  { %6764 = vmatprep.subr.bf16.mxu0 %v7313_v52 }
 0x2a4   :  { %5073 = vmatpush1.bf16.msra.mxu1 %v7312_v61 }
 0x2a5   :  { %5074 = vmatprep.subr.bf16.mxu1 %v7345_v2 }
 0x2a6   :  { %6765 = vmatpush3.bf16.msra.mxu0 %v7314_v28 }
 0x2a7   :  { %6802 = vmatprep.subr.bf16.mxu0 %v7348_v37 }
 0x2a8   :  { %5075 = vmatpush1.bf16.msra.mxu1 %v7315_v7 }
 0x2a9   :  { %5061 = vmatmul.mubr.bf16.vlgmr.msra.gmra.mrb[76].mxu0 %v1105_v24  ;;  %5076 = vmatprep.subr.bf16.mxu1 %v7345_v2 }
 0x2aa   :  { %6804 = vmatprep.mubr.msk.bf16.mxu0 %vm7349_vm6, %v7348_v37 }
 0x2ac   :  { %5077 = vmatpush1.bf16.msra.mxu1 %v7316_v63 }
 0x2ad   :  { %5078 = vmatprep.subr.bf16.mxu1 %v7345_v2 }
 0x2b0   :  { %5079 = vmatpush1.bf16.msra.mxu1 %v7317_v48 }
 0x2b1   :  { %5080 = vmatprep.subr.bf16.mxu1 %v7345_v2 }
 0x2b4   :  { %5081 = vmatpush1.bf16.msra.mxu1 %v7318_v59 }
 0x2b5   :  { %5082 = vmatprep.subr.bf16.mxu1 %v7345_v2 }
 0x2b7   :  { %v6546_v57 = vpop.f32.mrb[56].mxu0 }
 0x2b8   :  { %v6568_v1 = vpop.f32.mrb[56].mxu1  ;;  %5083 = vmatpush1.bf16.msra.mxu1 %v7319_v43  ;;  %v6547_v20 = vpop.f32.mrb[57].mxu0 }
 0x2b9   :  { %v6548_v13 = vadd.f32 %v6547_v20, %v6546_v57  ;;  %v6569_v17 = vpop.f32.mrb[57].mxu1  ;;  %v6549_v18 = vpop.f32.mrb[58].mxu0  ;;  %5084 = vmatprep.subr.bf16.mxu1 %v7345_v2 }
 0x2ba   :  { %v6570_v33 = vadd.f32 %v6569_v17, %v6568_v1  ;;  %v6571_v14 = vpop.f32.mrb[58].mxu1  ;;  %v6550_v25 = vpop.f32.mrb[59].mxu0 }
 0x2bb   :  { %v4663_v47 = vadd.f32 %v6548_v13, %v4623_v54  ;;  %v6572_v58 = vpop.f32.mrb[59].mxu1 }
 0x2bc   :  { %5085 = vmatpush1.bf16.msra.mxu1 %v7320_v5  ;;  %v6232_v58 = vld [vmem:[%s9223_s3] ss:$0 sm:$0xff]  ;;  %s7350_s3 = smov 20  }
 0x2bd   :  { %v4703_v40 = vadd.f32 %v6570_v33, %v4663_v47  ;;  %5086 = vmatprep.subr.bf16.mxu1 %v7345_v2 }
 0x2c0   :  { %5087 = vmatpush1.bf16.msra.mxu1 %v7321_v39 }
 0x2c1   :  { %5088 = vmatprep.subr.bf16.mxu1 %v7345_v2 }
 0x2c4   :  { %5089 = vmatpush1.bf16.msra.mxu1 %v4146_v56 }
 0x2c5   :  { %6814 = vmatprep.subr.bf16.mxu1 %v7348_v37 }
 0x2c7   :  { %5101 = vmatmul.mubr.bf16.vlgmr.msra.gmra.mrb[76].mxu1 %v1107_v6 }
 0x2c8   :  { %6822 = vmatprep.mubr.msk.bf16.mxu1 %vm7349_vm6, %v7348_v37 }
 0x2d7   :  { %v6590_v3 = vpop.f32.mrb[60].mxu0 }
 0x2d8   :  { %v6591_v11 = vpop.f32.mrb[61].mxu0 }
 0x2d9   :  { %v6592_v26 = vadd.f32 %v6591_v11, %v6590_v3  ;;  %v6593_v15 = vpop.f32.mrb[62].mxu0 }
 0x2da   :  { %v6594_v23 = vpop.f32.mrb[63].mxu0 }
 0x2db   :  { %v4743_v36 = vadd.f32 %v6592_v26, %v4703_v40 }
 0x30e   :  { %v6612_v49 = vpop.f32.mrb[60].mxu1 }
 0x30f   :  { %v6613_v0 = vpop.f32.mrb[61].mxu1 }
 0x310   :  { %v6614_v8 = vadd.f32 %v6613_v0, %v6612_v49  ;;  %v6615_v2 = vpop.f32.mrb[62].mxu1 }
 0x311   :  { %v6616_v16 = vpop.f32.mrb[63].mxu1 }
 0x312   :  { %v4783_v35 = vadd.f32 %v6614_v8, %v4743_v36  ;;  %v7323_v16 = vld [vmem:[%s9225_s5] sm:$0xff]  }
 0x313   :  { %6815 = vmatpush3.bf16.msra.mxu1 %v7323_v16 }
 0x314   :  { %6816 = vmatprep.subr.bf16.mxu1 %v7348_v37 }
 0x31c   :  { %v6634_v38 = vpop.f32.mrb[64].mxu0 }
 0x31d   :  { %v6635_v41 = vpop.f32.mrb[65].mxu0 }
 0x31e   :  { %v6636_v55 = vadd.f32 %v6635_v41, %v6634_v38  ;;  %v6637_v42 = vpop.f32.mrb[66].mxu0  ;;  %v7325_v38 = vld [vmem:[%s9225_s5 + $0x10] sm:$0xff]   ;;  %v7326_v41 = vld [vmem:[%s9225_s5 + $0x18] sm:$0x3f]  }
 0x31f   :  { %v6638_v19 = vpop.f32.mrb[67].mxu0 }
 0x320   :  { %v4823_v32 = vadd.f32 %v6636_v55, %v4783_v35  ;;  %v7324_v35 = vld [vmem:[%s9225_s5 + $0x8] sm:$0xff]   ;;  %v5264_v55 = vsel %vm4144_vm5, %v7326_v41, 0 }
 0x321   :  { %6817 = vmatpush3.bf16.msra.mxu1 %v7324_v35 }
 0x322   :  { %6818 = vmatprep.subr.bf16.mxu1 %v7348_v37 }
 0x325   :  { %6819 = vmatpush3.bf16.msra.mxu1 %v7325_v38 }
 0x326   :  { %6820 = vmatprep.subr.bf16.mxu1 %v7348_v37 }
 0x329   :  { %6821 = vmatpush3.bf16.msra.mxu1 %v5264_v55 }
 0x32a   :  { %6838 = vmatprep.subr.bf16.mxu1 %v7348_v37 }
 0x32e   :  { %v6656_v9 = vpop.f32.mrb[64].mxu1 }
 0x32f   :  { %v6657_v27 = vpop.f32.mrb[65].mxu1 }
 0x330   :  { %v6658_v44 = vadd.f32 %v6657_v27, %v6656_v9  ;;  %v6659_v45 = vpop.f32.mrb[66].mxu1 }
 0x331   :  { %v6660_v46 = vpop.f32.mrb[67].mxu1 }
 0x332   :  { %v4863_v50 = vadd.f32 %v6658_v44, %v4823_v32 }
 0x33c   :  { %v6678_v51 = vpop.f32.mrb[68].mxu0 }
 0x33d   :  { %v6679_v12 = vpop.f32.mrb[69].mxu0 }
 0x33e   :  { %v6680_v30 = vadd.f32 %v6679_v12, %v6678_v51  ;;  %v6681_v31 = vpop.f32.mrb[70].mxu0 }
 0x33f   :  { %v6682_v21 = vpop.f32.mrb[71].mxu0 }
 0x340   :  { %v4903_v53 = vadd.f32 %v6680_v30, %v4863_v50  ;;  %v6241_v30 = vld [vmem:[%s9226_s6] ss:$0 sm:$0xff] }
 0x341   :  { %v6242_v21 = vld [vmem:[%s9227_s7] ss:$0 sm:$0xff] }
 0x34e   :  { %v6700_v4 = vpop.f32.mrb[68].mxu1 }
 0x34f   :  { %v6701_v10 = vpop.f32.mrb[69].mxu1 }
 0x350   :  { %v6702_v54 = vadd.f32 %v6701_v10, %v6700_v4  ;;  %v6703_v60 = vpop.f32.mrb[70].mxu1 }
 0x351   :  { %v6704_v52 = vpop.f32.mrb[71].mxu1 }
 0x352   :  { %v4943_v61 = vadd.f32 %v6702_v54, %v4903_v53 }
 0x35c   :  { %v6722_v28 = vpop.f32.mrb[72].mxu0 }
 0x35d   :  { %v6723_v62 = vpop.f32.mrb[73].mxu0 }
 0x35e   :  { %v6724_v7 = vadd.f32 %v6723_v62, %v6722_v28  ;;  %v6725_v24 = vpop.f32.mrb[74].mxu0 }
 0x35f   :  { %v6726_v63 = vpop.f32.mrb[75].mxu0 }
 0x360   :  { %v4983_v48 = vadd.f32 %v6724_v7, %v4943_v61 }
 0x36e   :  { %v6744_v59 = vpop.f32.mrb[72].mxu1 }
 0x36f   :  { %v6745_v43 = vpop.f32.mrb[73].mxu1 }
 0x370   :  { %v6746_v57 = vadd.f32 %v6745_v43, %v6744_v59  ;;  %v6747_v1 = vpop.f32.mrb[74].mxu1 }
 0x371   :  { %v6748_v20 = vpop.f32.mrb[75].mxu1  ;;  %v7327_v1 = vld [vmem:[%s9228_s8] sm:$0xff]  }
 0x372   :  { %v5023_v5 = vadd.f32 %v6746_v57, %v4983_v48  ;;  %v7328_v20 = vld [vmem:[%s9228_s8 + $0x8] sm:$0xff]  }
 0x37c   :  { %v6766_v13 = vpop.f32.mrb[76].mxu0 }
 0x37d   :  { %v6767_v17 = vpop.f32.mrb[77].mxu0 }
 0x37e   :  { %v6768_v18 = vadd.f32 %v6767_v17, %v6766_v13  ;;  %v6769_v33 = vpop.f32.mrb[78].mxu0  ;;  %v7330_v13 = vld [vmem:[%s9228_s8 + $0x18] sm:$0x3f]  }
 0x37f   :  { %v6770_v14 = vpop.f32.mrb[79].mxu0  ;;  %v5461_v17 = vsel %vm4144_vm5, %v7330_v13, 0 }
 0x380   :  { %v5063_v25 = vadd.f32 %v6768_v18, %v5023_v5  ;;  %v7329_v5 = vld [vmem:[%s9228_s8 + $0x10] sm:$0xff]  }
 0x39a   :  { %v5102_v47 = vpop.f32.mrb[76].mxu1 }
 0x39b   :  { %v5103_v39 = vadd.f32 %v5102_v47, %v5063_v25  ;;  %v5104_v40 = vpop.f32.mrb[77].mxu1 }
 0x39c   :  { %v5105_v56 = vpop.f32.mrb[78].mxu1 }
 0x39d   :  { %v5115_v29 = vmul.f32 %v6232_v58, %v5103_v39  ;;  %v5106_v6 = vpop.f32.mrb[79].mxu1 }
 0x39e   :  { %v6250_v6 = vld [vmem:[%s9229_s9] ss:$0 sm:$0xff] }
 0x39f   :  { %v5123_v3 = vadd.f32 %v6233_v34, %v5115_v29 }
 0x3a1   :  { %v9055_v11 = vmax.f32 %v5123_v3, 0.0 }
 0x3a3   :  { %v5125_v26 = vpack.c.bf16 %v9055_v11, %v9055_v11  ;;  %v5323_v61 = vmul.f32 0.7, %v9055_v11 }
 0x3a5   :  { %v5127_v15 = vsel %vm111_vm0, %v5125_v26, 0  ;;  %v6251_v26 = vld [vmem:[%s9230_s10] ss:$0 sm:$0xff] }
 0x3a6   :  { %6803 = vmatpush3.bf16.msra.mxu0 %v5127_v15 }
 0x3a7   :  { %6808 = vmatprep.subr.bf16.mxu0 %v7348_v37 }
 0x3a9   :  { %6805 = vmatmul.mubr.msk.bf16.vlgmr.msra.gmra.mrb[80].mxu0 %vm107_vm1, %v7509_v22 }
 0x3aa   :  { %6810 = vmatprep.mubr.msk.bf16.mxu0 %vm7349_vm6, %v7348_v37 }
 0x47c   :  { %v5163_v23 = vpop.f32.mrb[80].mxu0 }
 0x47d   :  { %v5169_v36 = vpack.c.bf16 %v5163_v23, %v5163_v23  ;;  %5216 = vrot.lane.b32.xlu0 %v5163_v23, %s7350_s3  ;;  %v6806_v49 = vpop.f32.mrb[81].mxu0 }
 0x47e   :  { %v5166_v0 = vpop.f32.mrb[82].mxu0 }
 0x47f   :  { %v6807_v8 = vpop.f32.mrb[83].mxu0  ;;  %v5171_v2 = vsel %vm111_vm0, %v5169_v36, 0 }
 0x480   :  { %6809 = vmatpush3.bf16.msra.mxu0 %v5171_v2 }
 0x481   :  { %6826 = vmatprep.subr.bf16.mxu0 %v7348_v37 }
 0x483   :  { %6811 = vmatmul.mubr.msk.bf16.vlgmr.msra.gmra.mrb[84].mxu0 %vm107_vm1, %v7509_v22 }
 0x484   :  { %6828 = vmatprep.mubr.msk.bf16.mxu0 %vm7349_vm6, %v7348_v37 }
 0x4ef   :  { %v5217_v45 = vpop.permute.xlu0 %5216 }
 0x4f0   :  { %v5224_v46 = vsel %vm5223_vm7, %v9055_v11, %v5217_v45  ;;  %v7331_v45 = vld [vmem:[%s9232_s11] sm:$0xff]  }
 0x556   :  { %v5207_v42 = vpop.f32.mrb[84].mxu0 }
 0x557   :  { %v5213_v19 = vmul.f32 2.0, %v5207_v42  ;;  %v6812_v32 = vpop.f32.mrb[85].mxu0 }
 0x558   :  { %v5210_v9 = vpop.f32.mrb[86].mxu0  ;;  %v6261_v32 = vld [vmem:[%s9231_s14] ss:$0 sm:$0xff] }
 0x559   :  { %v5214_v27 = vsub.f32 %v5213_v19, %v9055_v11  ;;  %v6813_v44 = vpop.f32.mrb[87].mxu0 }
 0x55a   :  { %v7352_v44 = vmov 1  }
 0x55b   :  { %5220 = vrot.lane.b32.xlu1 %v5214_v27, %s7351_s18 }
 0x55c   :  { %6933 = vset.pattern.permute.xlu1 %v7352_v44 }
 0x5cd   :  { %v5221_v50 = vpop.permute.xlu1 %5220 }
 0x5ce   :  { %v5226_v51 = vsel %vm5225_vm8, %v5224_v46, %v5221_v50  ;;  %v7332_v46 = vld [vmem:[%s9232_s11 + $0x8] sm:$0xff]   ;;  %v7334_v50 = vld [vmem:[%s9232_s11 + $0x18] sm:$0x3f]  }
 0x5cf   :  { %v5227_v12 = vpack.c.bf16 %v5226_v51, %v5226_v51  ;;  %v5658_v51 = vsel %vm4144_vm5, %v7334_v50, 0 }
 0x5d1   :  { %6823 = vmatmul.mubr.msk.bf16.vlgmr.msra.gmra.mrb[80].mxu1 %vm5259_vm9, %v5227_v12 }
 0x5d2   :  { %6846 = vmatprep.mubr.msk.bf16.mxu1 %vm7349_vm6, %v7348_v37  ;;  %6839 = vmatpush3.bf16.msra.mxu1 %v7327_v1  ;;  %v6260_v1 = vld [vmem:[%s9235_s13] ss:$0 sm:$0xff] }
 0x5d3   :  { %6840 = vmatprep.subr.bf16.mxu1 %v7348_v37 }
 0x5d6   :  { %6841 = vmatpush3.bf16.msra.mxu1 %v7328_v20 }
 0x5d7   :  { %6842 = vmatprep.subr.bf16.mxu1 %v7348_v37 }
 0x5da   :  { %6843 = vmatpush3.bf16.msra.mxu1 %v7329_v5 }
 0x5db   :  { %6844 = vmatprep.subr.bf16.mxu1 %v7348_v37 }
 0x5de   :  { %6845 = vmatpush3.bf16.msra.mxu1 %v5461_v17 }
 0x5df   :  { %6862 = vmatprep.subr.bf16.mxu1 %v7348_v37 }
 0x6a4   :  { %v5300_v31 = vpop.f32.mrb[80].mxu1 }
 0x6a5   :  { %v5313_v53 = vmul.f32 %v6241_v30, %v5300_v31  ;;  %v6824_v4 = vpop.f32.mrb[81].mxu1 }
 0x6a6   :  { %v5303_v10 = vpop.f32.mrb[82].mxu1 }
 0x6a7   :  { %v5321_v54 = vadd.f32 %v6242_v21, %v5313_v53  ;;  %v6825_v60 = vpop.f32.mrb[83].mxu1  ;;  %v7353_v10 = vmov 2  }
 0x6a9   :  { %v5322_v52 = vmax.f32 %v5321_v54, 0.0  ;;  %v7354_v54 = vmov 3  }
 0x6ab   :  { %v9104_v28 = vadd.f32 %v5323_v61, %v5322_v52 }
 0x6ad   :  { %v5325_v62 = vpack.c.bf16 %v9104_v28, %v9104_v28  ;;  %v5520_v2 = vmul.f32 0.7, %v9104_v28 }
 0x6af   :  { %v5327_v7 = vsel %vm111_vm0, %v5325_v62, 0 }
 0x6b0   :  { %6827 = vmatpush3.bf16.msra.mxu0 %v5327_v7 }
 0x6b1   :  { %6832 = vmatprep.subr.bf16.mxu0 %v7348_v37 }
 0x6b3   :  { %6829 = vmatmul.mubr.msk.bf16.vlgmr.msra.gmra.mrb[88].mxu0 %vm107_vm1, %v7509_v22 }
 0x6b4   :  { %6834 = vmatprep.mubr.msk.bf16.mxu0 %vm7349_vm6, %v7348_v37 }
 0x786   :  { %v5363_v24 = vpop.f32.mrb[88].mxu0 }
 0x787   :  { %v5369_v63 = vpack.c.bf16 %v5363_v24, %v5363_v24  ;;  %5416 = vrot.lane.b32.xlu0 %v5363_v24, %s7350_s3  ;;  %v6830_v48 = vpop.f32.mrb[89].mxu0  ;;  %v7335_v24 = vld [vmem:[%s9233_s15] sm:$0xff]  }
 0x788   :  { %v5366_v59 = vpop.f32.mrb[90].mxu0 }
 0x789   :  { %v6831_v43 = vpop.f32.mrb[91].mxu0  ;;  %v5371_v57 = vsel %vm111_vm0, %v5369_v63, 0  ;;  %v7336_v63 = vld [vmem:[%s9233_s15 + $0x8] ss:$0 sps:$4 sm:$0x33]  }
 0x78a   :  { %6833 = vmatpush3.bf16.msra.mxu0 %v5371_v57  ;;  %v5772_v48 = vsel %vm111_vm0, %v7336_v63, 0  ;;  %v6259_v43 = vld [vmem:[%s9234_s12] ss:$0 sm:$0xff] }
 0x78b   :  { %6850 = vmatprep.subr.bf16.mxu0 %v7348_v37 }
 0x78d   :  { %6835 = vmatmul.mubr.msk.bf16.vlgmr.msra.gmra.mrb[92].mxu0 %vm107_vm1, %v7509_v22 }
 0x78e   :  { %6852 = vmatprep.mubr.msk.bf16.mxu0 %vm7349_vm6, %v7348_v37 }
 0x7f9   :  { %v5417_v39 = vpop.permute.xlu0 %5416 }
 0x7fa   :  { %v5423_v40 = vsel %vm5223_vm7, %v9104_v28, %v5417_v39 }
 0x860   :  { %v5407_v18 = vpop.f32.mrb[92].mxu0 }
 0x861   :  { %v5413_v33 = vmul.f32 2.0, %v5407_v18  ;;  %v6836_v14 = vpop.f32.mrb[93].mxu0 }
 0x862   :  { %v5410_v25 = vpop.f32.mrb[94].mxu0 }
 0x863   :  { %v5414_v47 = vsub.f32 %v5413_v33, %v9104_v28  ;;  %v6837_v58 = vpop.f32.mrb[95].mxu0 }
 0x865   :  { %5420 = vrot.lane.b32.xlu1 %v5414_v47, %s7351_s18 }
 0x8d7   :  { %v5421_v34 = vpop.permute.xlu1 %5420 }
 0x8d8   :  { %v5424_v56 = vsel %vm5225_vm8, %v5423_v40, %v5421_v34 }
 0x8d9   :  { %v5425_v29 = vpack.c.bf16 %v5424_v56, %v5424_v56 }
 0x8db   :  { %6847 = vmatmul.mubr.msk.bf16.vlgmr.msra.gmra.mrb[84].mxu1 %vm5259_vm9, %v5425_v29 }
 0x8dc   :  { %6870 = vmatprep.mubr.msk.bf16.mxu1 %vm7349_vm6, %v7348_v37  ;;  %6863 = vmatpush3.bf16.msra.mxu1 %v7331_v45 }
 0x8dd   :  { %6864 = vmatprep.subr.bf16.mxu1 %v7348_v37 }
 0x8e0   :  { %6865 = vmatpush3.bf16.msra.mxu1 %v7332_v46 }
 0x8e1   :  { %6866 = vmatprep.subr.bf16.mxu1 %v7348_v37 }
 0x9ae   :  { %v5497_v3 = vpop.f32.mrb[84].mxu1 }
 0x9af   :  { %v5510_v15 = vmul.f32 %v6250_v6, %v5497_v3  ;;  %v6848_v23 = vpop.f32.mrb[85].mxu1 }
 0x9b0   :  { %v5500_v36 = vpop.f32.mrb[86].mxu1 }
 0x9b1   :  { %v5518_v49 = vadd.f32 %v6251_v26, %v5510_v15  ;;  %v6849_v0 = vpop.f32.mrb[87].mxu1 }
 0x9b3   :  { %v5519_v8 = vmax.f32 %v5518_v49, 0.0 }
 0x9b5   :  { %v9153_v16 = vadd.f32 %v5520_v2, %v5519_v8 }
 0x9b7   :  { %v5522_v35 = vpack.c.bf16 %v9153_v16, %v9153_v16  ;;  %v5717_v39 = vmul.f32 0.7, %v9153_v16 }
 0x9b9   :  { %v5524_v38 = vsel %vm111_vm0, %v5522_v35, 0 }
 0x9ba   :  { %6851 = vmatpush3.bf16.msra.mxu0 %v5524_v38 }
 0x9bb   :  { %6856 = vmatprep.subr.bf16.mxu0 %v7348_v37 }
 0x9bd   :  { %6853 = vmatmul.mubr.msk.bf16.vlgmr.msra.gmra.mrb[96].mxu0 %vm107_vm1, %v7509_v22 }
 0x9be   :  { %6858 = vmatprep.mubr.msk.bf16.mxu0 %vm7349_vm6, %v7348_v37 }
 0xa90   :  { %v5560_v41 = vpop.f32.mrb[96].mxu0 }
 0xa91   :  { %v5566_v55 = vpack.c.bf16 %v5560_v41, %v5560_v41  ;;  %5613 = vrot.lane.b32.xlu0 %v5560_v41, %s7350_s3  ;;  %v6854_v42 = vpop.f32.mrb[97].mxu0 }
 0xa92   :  { %v5563_v19 = vpop.f32.mrb[98].mxu0 }
 0xa93   :  { %v6855_v9 = vpop.f32.mrb[99].mxu0  ;;  %v5568_v27 = vsel %vm111_vm0, %v5566_v55, 0 }
 0xa94   :  { %6857 = vmatpush3.bf16.msra.mxu0 %v5568_v27 }
 0xa95   :  { %5726 = vperm.xlu0 %6932, %v6261_v32   ;;  %6874 = vmatprep.subr.bf16.mxu0 %v7348_v37 }
 0xa97   :  { %6859 = vmatmul.mubr.msk.bf16.vlgmr.msra.gmra.mrb[100].mxu0 %vm107_vm1, %v7509_v22  ;;  %v7333_v22 = vld [vmem:[%s9232_s11 + $0x10] sm:$0xff]  }
 0xa98   :  { %6878 = vmatprep.mubr.msk.bf16.mxu0 %vm7349_vm6, %v7348_v37  ;;  %6867 = vmatpush3.bf16.msra.mxu1 %v7333_v22 }
 0xa99   :  { %6868 = vmatprep.subr.bf16.mxu1 %v7348_v37  ;;  %6935 = vset.pattern.permute.xlu0 %v7354_v54 }
 0xa9a   :  { %5743 = vperm.xlu0 %6935, %v6261_v32   ;;  %6875 = vmatpush3.bf16.msra.mxu0 %v7335_v24 }
 0xa9b   :  { %6876 = vmatprep.subr.bf16.mxu0 %v7348_v37 }
 0xa9c   :  { %6869 = vmatpush3.bf16.msra.mxu1 %v5658_v51 }
 0xa9e   :  { %6877 = vmatpush3.bf16.msra.mxu0 %v5772_v48 }
 0xb03   :  { %v5614_v60 = vpop.permute.xlu0 %5613 }
 0xb04   :  { %v5620_v52 = vsel %vm5223_vm7, %v9153_v16, %v5614_v60 }
 0xb14   :  { %v5727_v20 = vpop.permute.xlu0 %5726 }
 0xb15   :  { %v5729_v25 = vmul.f32 %v5727_v20, %v9055_v11 }
 0xb19   :  { %v5744_v40 = vpop.permute.xlu0 %5743 }
 0xb6a   :  { %v5604_v12 = vpop.f32.mrb[100].mxu0 }
 0xb6b   :  { %v5610_v30 = vmul.f32 2.0, %v5604_v12  ;;  %v6860_v31 = vpop.f32.mrb[101].mxu0 }
 0xb6c   :  { %v5607_v21 = vpop.f32.mrb[102].mxu0 }
 0xb6d   :  { %v5611_v53 = vsub.f32 %v5610_v30, %v9153_v16  ;;  %v6861_v4 = vpop.f32.mrb[103].mxu0 }
 0xb6f   :  { %5617 = vrot.lane.b32.xlu1 %v5611_v53, %s7351_s18 }
 0xb73   :  { %5731 = vperm.xlu1 %6933, %v6261_v32  }
 0xb77   :  { %6934 = vset.pattern.permute.xlu1 %v7353_v10 }
 0xb78   :  { %5737 = vperm.xlu1 %6934, %v6261_v32  }
 0xbe1   :  { %v5618_v61 = vpop.permute.xlu1 %5617 }
 0xbe2   :  { %v5621_v62 = vsel %vm5225_vm8, %v5620_v52, %v5618_v61 }
 0xbe3   :  { %v5622_v7 = vpack.c.bf16 %v5621_v62, %v5621_v62 }
 0xbe5   :  { %6871 = vmatmul.mubr.msk.bf16.vlgmr.msra.gmra.mrb[88].mxu1 %vm5259_vm9, %v5622_v7 }
 0xbf2   :  { %v5732_v59 = vpop.permute.xlu1 %5731 }
 0xbf3   :  { %v5734_v18 = vmul.f32 %v5732_v59, %v9104_v28  ;;  %v6262_v28 = vld [vmem:[%s9236_s16] ss:$0 sm:$0xff] }
 0xbf5   :  { %v5735_v34 = vadd.f32 %v5734_v18, %v5729_v25 }
 0xbf7   :  { %v5738_v13 = vpop.permute.xlu1 %5737 }
 0xbf8   :  { %v5740_v47 = vmul.f32 %v5738_v13, %v9153_v16 }
 0xbfa   :  { %v5741_v29 = vadd.f32 %v5740_v47, %v5735_v34 }
 0xcb8   :  { %v5694_v57 = vpop.f32.mrb[88].mxu1 }
 0xcb9   :  { %v5707_v5 = vmul.f32 %v6259_v43, %v5694_v57  ;;  %v6872_v37 = vpop.f32.mrb[89].mxu1 }
 0xcba   :  { %v5697_v17 = vpop.f32.mrb[90].mxu1 }
 0xcbb   :  { %v5715_v33 = vadd.f32 %v6260_v1, %v5707_v5  ;;  %v6873_v14 = vpop.f32.mrb[91].mxu1 }
 0xcbd   :  { %v5716_v58 = vmax.f32 %v5715_v33, 0.0 }
 0xcbf   :  { %v5718_v56 = vadd.f32 %v5717_v39, %v5716_v58 }
 0xcc1   :  { %v5746_v6 = vmul.f32 %v5744_v40, %v5718_v56 }
 0xcc3   :  { %v5747_v3 = vadd.f32 %v5746_v6, %v5741_v29 }
 0xcc5   :  { %v5748_v26 = vpack.c.bf16 %v5747_v3, %v5747_v3 }
 0xcc7   :  { %6879 = vmatmul.mubr.msk.bf16.vlgmr.msra.gmra.mrb[104].mxu0 %vm5223_vm7, %v5748_v26 }
 0xd9a   :  { %v5808_v15 = vpop.f32.mrb[104].mxu0 }
 0xd9b   :  { %v5809_v11 = vadd.f32 %v6262_v28, %v5808_v15  ;;  %v6880_v23 = vpop.f32.mrb[105].mxu0 }
 0xd9c   :  { %v5811_v36 = vpop.f32.mrb[106].mxu0 }
 0xd9d   :  { %5815 = vst.msk [vmem:[%s9237_s17] sm:$0xf] %vm5814_vm10, %v5809_v11  ;;  %v6881_v49 = vpop.f32.mrb[107].mxu0 }

</bundles_post_ra>
